<compile_context>
chip_gen: v7x
topology: tpu7x:2x2x1
jax: 0.10.0
libtpu: 0.0.40
codegen_flags: <defaults>
</compile_context>

<pallas_src>
import jax
import jax.numpy as jnp
from jax.experimental import pallas as pl
from jax.experimental.pallas import tpu as pltpu

_MAX_TILE = 32  # batch tile cap; keeps per-step VMEM ~20 MiB (ok on v7x too)


# --------------------------------------------------------------------------
# Fused kernel: conv1 + pool + conv2 + pool + fc1 + fc2 + fc + log_softmax
# --------------------------------------------------------------------------
def _fused_cnn_kernel(p_ref, band1_ref, b1_ref, band2_ref, b2_ref,
                      fc1w_ref, fc1b_ref, fc2w_ref, fc2b_ref, fcw_ref, fcb_ref,
                      o_ref):
    tb = o_ref.shape[0]
    f32 = jnp.float32
    bf16 = jnp.bfloat16

    # ---- conv1: one banded MXU matmul for the whole batch tile -------------
    #   rows = (image, out-h) with even h first inside each image
    #   cols = (w parity, w//2, channel) -> W-pool is a max of lane halves
    acc1 = jnp.dot(p_ref[...], band1_ref[...], preferred_element_type=f32)
    wmax = jnp.maximum(acc1[:, :768], acc1[:, 768:])            # (tb*24, 768)
    y1 = wmax.reshape(tb, 24, 768)
    hmax = jnp.maximum(y1[:, :12, :], y1[:, 12:, :])            # (tb, 12, 768)
    x2 = jnp.maximum(hmax + b1_ref[...], 0.0).astype(bf16)      # bias + ReLU

    # ---- conv2: 5 h-shifted slabs concatenated along lanes -> one matmul ---
    lhs2 = jnp.concatenate([x2[:, ki:ki + 8, :] for ki in range(5)], axis=-1)
    lhs2 = lhs2.reshape(tb * 8, 5 * 768)                        # (tb*8, 3840)
    acc2 = jnp.dot(lhs2, band2_ref[...], preferred_element_type=f32)  # (tb*8, 512)
    yw2 = jnp.maximum(acc2[:, :256], acc2[:, 256:]).reshape(tb, 8, 256)  # W-pool
    b2 = b2_ref[...]

    # ---- H-pool + bias + ReLU fused with fc1 (4 row-pair partial matmuls) --
    acc = jnp.zeros((tb, 128), f32)
    for q in range(4):
        fq = jnp.maximum(yw2[:, 2 * q, :], yw2[:, 2 * q + 1, :])     # (tb, 256)
        fq = jnp.maximum(fq + b2, 0.0).astype(bf16)
        acc = acc + jnp.dot(fq, fc1w_ref[q * 256:(q + 1) * 256, :],
                            preferred_element_type=f32)
    h = jnp.maximum(acc + fc1b_ref[...], 0.0)                   # fc1 + ReLU

    # ---- fc2 + ReLU, fc, log_softmax ---------------------------------------
    h = jnp.dot(h.astype(bf16), fc2w_ref[...], preferred_element_type=f32)
    h = jnp.maximum(h + fc2b_ref[...], 0.0)                     # (tb, 64)
    h = jnp.dot(h.astype(bf16), fcw_ref[...], preferred_element_type=f32)
    h = h + fcb_ref[...]                                        # (tb, dim_out)
    m = jnp.max(h, axis=-1, keepdims=True)
    s = h - m
    lse = jnp.log(jnp.sum(jnp.exp(s), axis=-1, keepdims=True))
    o_ref[...] = (s - lse).astype(o_ref.dtype)


# --------------------------------------------------------------------------
# pallas_call wrapper
# --------------------------------------------------------------------------
def _fused_forward(lhs1, kp, B, tb, dim_out):
    flops = 2 * B * (24 * 140 * 1536 + 8 * 3840 * 512
                     + 1024 * 128 + 128 * 64 + 64 * dim_out)
    bytes_accessed = (int(lhs1.size) * 2 + B * dim_out * 4
                      + int(kp["band1"].size) * 2 + int(kp["band2"].size) * 2
                      + int(kp["fc1_w"].size) * 2 + int(kp["fc2_w"].size) * 2
                      + int(kp["fc_w"].size) * 2
                      + (768 + 256 + 128 + 64 + dim_out) * 4)
    return pl.pallas_call(
        _fused_cnn_kernel,
        out_shape=jax.ShapeDtypeStruct((B, dim_out), jnp.float32),
        grid_spec=pltpu.PrefetchScalarGridSpec(
            num_scalar_prefetch=0,
            grid=(B // tb,),
            in_specs=[
                pl.BlockSpec((tb * 24, 140), lambda i: (i, 0)),   # conv1 operand
                pl.BlockSpec((140, 1536), lambda i: (0, 0)),      # band1
                pl.BlockSpec((1, 768), lambda i: (0, 0)),         # conv1 bias (tiled)
                pl.BlockSpec((3840, 512), lambda i: (0, 0)),      # band2
                pl.BlockSpec((1, 256), lambda i: (0, 0)),         # conv2 bias (tiled)
                pl.BlockSpec((1024, 128), lambda i: (0, 0)),      # fc1 w (row-permuted)
                pl.BlockSpec((1, 128), lambda i: (0, 0)),
                pl.BlockSpec((128, 64), lambda i: (0, 0)),        # fc2 w
                pl.BlockSpec((1, 64), lambda i: (0, 0)),
                pl.BlockSpec((64, dim_out), lambda i: (0, 0)),    # fc w
                pl.BlockSpec((1, dim_out), lambda i: (0, 0)),
            ],
            out_specs=pl.BlockSpec((tb, dim_out), lambda i: (i, 0)),
        ),
        compiler_params=pltpu.CompilerParams(
            dimension_semantics=("parallel",),
            vmem_limit_bytes=48 * 1024 * 1024,
        ),
        cost_estimate=pl.CostEstimate(flops=flops, transcendentals=B * dim_out,
                                      bytes_accessed=bytes_accessed),
    )(lhs1, kp["band1"], kp["b1"], kp["band2"], kp["b2"],
      kp["fc1_w"], kp["fc1_b"], kp["fc2_w"], kp["fc2_b"],
      kp["fc_w"], kp["fc_b"])


# --------------------------------------------------------------------------
# plain-JAX glue: conv1 matmul operand (5 row-shifted slabs, ~2x raw bytes)
# --------------------------------------------------------------------------
def _conv1_rows(x):
    """(B,28,28) f32 -> (B*24, 140) bf16 conv1 LHS.

    Row (b, r): image b, conv1 output row h = 2r if r < 12 else 2*(r-12)+1
    (even h first, so the kernel's H-pool is a max of two contiguous blocks).
    Column ki*28 + w_in holds x[b, h+ki, w_in].
    """
    B = x.shape[0]
    p = jnp.concatenate([x[:, ki:ki + 24, :] for ki in range(5)], axis=-1)  # (B,24,140)
    order = jnp.concatenate([jnp.arange(0, 24, 2), jnp.arange(1, 24, 2)])
    p = jnp.take(p, order, axis=1)
    return p.reshape(B * 24, 140).astype(jnp.bfloat16)


# --------------------------------------------------------------------------
# Parameters (deterministic init matching nn.Module shapes) + preparation
# --------------------------------------------------------------------------
def init_params(key, dim_out=10):
    ks = jax.random.split(key, 10)

    def u(k, shape, fan_in):
        bound = 1.0 / (fan_in ** 0.5)
        return jax.random.uniform(k, shape, jnp.float32, -bound, bound)

    return {
        "conv1_w": u(ks[0], (64, 1, 5, 5), 1 * 25),
        "conv1_b": u(ks[1], (64,), 1 * 25),
        "conv2_w": u(ks[2], (64, 64, 5, 5), 64 * 25),
        "conv2_b": u(ks[3], (64,), 64 * 25),
        "fc1_w": u(ks[4], (128, 1024), 1024),
        "fc1_b": u(ks[5], (128,), 1024),
        "fc2_w": u(ks[6], (64, 128), 128),
        "fc2_b": u(ks[7], (64,), 128),
        "fc_w": u(ks[8], (dim_out, 64), 64),
        "fc_b": u(ks[9], (dim_out,), 64),
    }


def prepare_params(params):
    """One-time build of banded conv weights / permuted fc1 / bf16 casts."""
    dim_out = params["fc_w"].shape[0]

    # conv1 -> banded weight (140, 1536): rows = (ki, w_in), cols = (w, c)
    # with the 24 output columns permuted even-w-first (free W-pool in-kernel).
    wk1 = jnp.transpose(params["conv1_w"][:, 0], (1, 2, 0))          # (ki, kj, c)
    band1 = jnp.zeros((5, 28, 24, 64), jnp.float32)                  # (ki, w_in, w, c)
    j = jnp.arange(24)
    for kj in range(5):
        band1 = band1.at[:, j + kj, j, :].set(wk1[:, kj, :][:, None, :])
    wperm = jnp.concatenate([jnp.arange(0, 24, 2), jnp.arange(1, 24, 2)])
    band1 = band1[:, :, wperm, :].reshape(140, 1536).astype(jnp.bfloat16)

    # conv2 -> banded weight (3840, 512): rows = (ki, w_in, cin), cols = (w, cout)
    # with the 8 output columns permuted even-w-first.
    wk2 = jnp.transpose(params["conv2_w"], (2, 3, 1, 0))             # (ki, kj, cin, cout)
    band2 = jnp.zeros((5, 12, 8, 64, 64), jnp.float32)               # (ki, w_in, w, cin, cout)
    j8 = jnp.arange(8)
    for kj in range(5):
        band2 = band2.at[:, j8 + kj, j8, :, :].set(wk2[:, kj][:, None, :, :])
    band2 = jnp.transpose(band2, (0, 1, 3, 2, 4))                    # (ki, w_in, cin, w, cout)
    wperm2 = jnp.concatenate([jnp.arange(0, 8, 2), jnp.arange(1, 8, 2)])
    band2 = band2[:, :, :, wperm2, :].reshape(3840, 512).astype(jnp.bfloat16)

    # fc1 weight rows permuted from PyTorch's NCHW flatten (c*16 + h*4 + w)
    # to the kernel's NHWC flatten (h*256 + w*64 + c).
    fc1 = params["fc1_w"].reshape(128, 64, 4, 4)                     # (out, c, h, w)
    fc1 = jnp.transpose(fc1, (2, 3, 1, 0)).reshape(1024, 128)        # rows = h*256+w*64+c

    return {
        "band1": band1,
        "b1": jnp.tile(params["conv1_b"], 12).reshape(1, 768).astype(jnp.float32),
        "band2": band2,
        "b2": jnp.tile(params["conv2_b"], 4).reshape(1, 256).astype(jnp.float32),
        "fc1_w": fc1.astype(jnp.bfloat16),
        "fc1_b": params["fc1_b"].reshape(1, 128).astype(jnp.float32),
        "fc2_w": params["fc2_w"].T.astype(jnp.bfloat16),             # (128, 64)
        "fc2_b": params["fc2_b"].reshape(1, 64).astype(jnp.float32),
        "fc_w": params["fc_w"].T.astype(jnp.bfloat16),               # (64, dim_out)
        "fc_b": params["fc_b"].reshape(1, dim_out).astype(jnp.float32),
    }


# --------------------------------------------------------------------------
# Forward pass (matches CNNMnist.forward, dropout2d treated as identity)
# --------------------------------------------------------------------------
def cnn_mnist_forward(kparams, x_nchw):
    x = x_nchw[:, 0, :, :].astype(jnp.float32)                      # (B, 28, 28)
    assert x.shape[1] == 28 and x.shape[2] == 28, "CNNMnist expects 28x28 inputs"
    B = x.shape[0]
    dim_out = kparams["fc_w"].shape[1]
    if B <= _MAX_TILE:
        tb, Bp = B, B
    else:
        tb = _MAX_TILE
        Bp = ((B + tb - 1) // tb) * tb                              # pad awkward batches
        x = jnp.pad(x, ((0, Bp - B), (0, 0), (0, 0)))
    lhs1 = _conv1_rows(x)                                           # (Bp*24, 140) bf16
    out = _fused_forward(lhs1, kparams, Bp, tb, dim_out)            # (Bp, dim_out) f32
    return out[:B]


if __name__ == "__main__":
    key = jax.random.PRNGKey(0)
    pkey, xkey = jax.random.split(key)
    dim_out = 10
    params = init_params(pkey, dim_out=dim_out)
    kparams = prepare_params(params)
    # MNIST-shaped input (two 5x5 valid convs + two 2x2 pools -> 1024 features)
    x = jax.random.normal(xkey, (2, 1, 28, 28), dtype=jnp.float32)

    out = jax.jit(cnn_mnist_forward)(kparams, x)
    out = jax.block_until_ready(out)

    assert out.shape == (2, dim_out), out.shape
    assert bool(jnp.all(jnp.isfinite(out)))
    # log_softmax rows should sum (in prob space) to ~1
    assert bool(jnp.allclose(jnp.sum(jnp.exp(out), axis=1), 1.0, atol=1e-3))
    print("KERNEL_OK")
</pallas_src>

<mosaic_0001>
module attributes {stable_mosaic.version = 11 : i64} {
  func.func @_fused_cnn_kernel(%arg0: i32, %arg1: memref<48x140xbf16, #tpu.memory_space<vmem>>, %arg2: memref<140x1536xbf16, #tpu.memory_space<vmem>>, %arg3: memref<1x768xf32, #tpu.memory_space<vmem>>, %arg4: memref<3840x512xbf16, #tpu.memory_space<vmem>>, %arg5: memref<1x256xf32, #tpu.memory_space<vmem>>, %arg6: memref<1024x128xbf16, #tpu.memory_space<vmem>>, %arg7: memref<1x128xf32, #tpu.memory_space<vmem>>, %arg8: memref<128x64xbf16, #tpu.memory_space<vmem>>, %arg9: memref<1x64xf32, #tpu.memory_space<vmem>>, %arg10: memref<64x10xbf16, #tpu.memory_space<vmem>>, %arg11: memref<1x10xf32, #tpu.memory_space<vmem>>, %arg12: memref<2x10xf32, #tpu.memory_space<vmem>>) attributes {dimension_semantics = [#tpu.dimension_semantics<parallel>], iteration_bounds = array<i64: 1>, scalar_prefetch = 0 : i64, scratch_operands = 0 : i64, tpu.core_type = #tpu.core_type<tc>, window_params = [{transform_indices = @transform_0, window_bounds = array<i64: 48, 140>}, {pipeline_mode = #tpu.pipeline_mode<synchronous>, transform_indices = @transform_1, window_bounds = array<i64: 140, 1536>}, {pipeline_mode = #tpu.pipeline_mode<synchronous>, transform_indices = @transform_2, window_bounds = array<i64: 1, 768>}, {pipeline_mode = #tpu.pipeline_mode<synchronous>, transform_indices = @transform_3, window_bounds = array<i64: 3840, 512>}, {pipeline_mode = #tpu.pipeline_mode<synchronous>, transform_indices = @transform_4, window_bounds = array<i64: 1, 256>}, {pipeline_mode = #tpu.pipeline_mode<synchronous>, transform_indices = @transform_5, window_bounds = array<i64: 1024, 128>}, {pipeline_mode = #tpu.pipeline_mode<synchronous>, transform_indices = @transform_6, window_bounds = array<i64: 1, 128>}, {pipeline_mode = #tpu.pipeline_mode<synchronous>, transform_indices = @transform_7, window_bounds = array<i64: 128, 64>}, {pipeline_mode = #tpu.pipeline_mode<synchronous>, transform_indices = @transform_8, window_bounds = array<i64: 1, 64>}, {pipeline_mode = #tpu.pipeline_mode<synchronous>, transform_indices = @transform_9, window_bounds = array<i64: 64, 10>}, {pipeline_mode = #tpu.pipeline_mode<synchronous>, transform_indices = @transform_10, window_bounds = array<i64: 1, 10>}, {transform_indices = @transform_11, window_bounds = array<i64: 2, 10>}]} {
    %c0 = arith.constant 0 : index
    %c0_0 = arith.constant 0 : index
    %0 = vector.load %arg1[%c0, %c0_0] : memref<48x140xbf16, #tpu.memory_space<vmem>>, vector<48x140xbf16>
    %c0_1 = arith.constant 0 : index
    %c0_2 = arith.constant 0 : index
    %1 = vector.load %arg2[%c0_1, %c0_2] : memref<140x1536xbf16, #tpu.memory_space<vmem>>, vector<140x1536xbf16>
    %cst = arith.constant dense<0.000000e+00> : vector<48x1536xf32>
    %2 = tpu.matmul %0, %1, %cst {dimension_numbers = #tpu.dot_dimension_numbers<[1], [0], [0], [1], [0, 0, 1, 1], [], []>} : vector<48x140xbf16>, vector<140x1536xbf16>, vector<48x1536xf32> -> vector<48x1536xf32>
    %3 = vector.extract_strided_slice %2 {offsets = [0, 0], sizes = [48, 768], strides = [1, 1]} : vector<48x1536xf32> to vector<48x768xf32>
    %4 = vector.extract_strided_slice %2 {offsets = [0, 768], sizes = [48, 768], strides = [1, 1]} : vector<48x1536xf32> to vector<48x768xf32>
    %5 = arith.maximumf %3, %4 : vector<48x768xf32>
    %6 = vector.shape_cast %5 : vector<48x768xf32> to vector<2x24x768xf32>
    %7 = vector.extract_strided_slice %6 {offsets = [0, 0, 0], sizes = [2, 12, 768], strides = [1, 1, 1]} : vector<2x24x768xf32> to vector<2x12x768xf32>
    %8 = vector.extract_strided_slice %6 {offsets = [0, 12, 0], sizes = [2, 12, 768], strides = [1, 1, 1]} : vector<2x24x768xf32> to vector<2x12x768xf32>
    %9 = arith.maximumf %7, %8 : vector<2x12x768xf32>
    %c0_3 = arith.constant 0 : index
    %c0_4 = arith.constant 0 : index
    %10 = vector.load %arg3[%c0_3, %c0_4] : memref<1x768xf32, #tpu.memory_space<vmem>>, vector<1x768xf32>
    %11 = vector.shape_cast %10 : vector<1x768xf32> to vector<1x1x768xf32>
    %12 = vector.broadcast %11 : vector<1x1x768xf32> to vector<2x12x768xf32>
    %13 = arith.addf %9, %12 : vector<2x12x768xf32>
    %cst_5 = arith.constant 0.000000e+00 : f32
    %14 = vector.broadcast %cst_5 : f32 to vector<2x12x768xf32>
    %15 = arith.maximumf %13, %14 : vector<2x12x768xf32>
    %16 = arith.truncf %15 : vector<2x12x768xf32> to vector<2x12x768xbf16>
    %17 = vector.extract_strided_slice %16 {offsets = [0, 0, 0], sizes = [2, 8, 768], strides = [1, 1, 1]} : vector<2x12x768xbf16> to vector<2x8x768xbf16>
    %18 = vector.extract_strided_slice %16 {offsets = [0, 1, 0], sizes = [2, 8, 768], strides = [1, 1, 1]} : vector<2x12x768xbf16> to vector<2x8x768xbf16>
    %19 = vector.extract_strided_slice %16 {offsets = [0, 2, 0], sizes = [2, 8, 768], strides = [1, 1, 1]} : vector<2x12x768xbf16> to vector<2x8x768xbf16>
    %20 = vector.extract_strided_slice %16 {offsets = [0, 3, 0], sizes = [2, 8, 768], strides = [1, 1, 1]} : vector<2x12x768xbf16> to vector<2x8x768xbf16>
    %21 = vector.extract_strided_slice %16 {offsets = [0, 4, 0], sizes = [2, 8, 768], strides = [1, 1, 1]} : vector<2x12x768xbf16> to vector<2x8x768xbf16>
    %22 = tpu.concatenate %17, %18, %19, %20, %21 in 2 : vector<2x8x768xbf16>, vector<2x8x768xbf16>, vector<2x8x768xbf16>, vector<2x8x768xbf16>, vector<2x8x768xbf16> -> vector<2x8x3840xbf16>
    %23 = vector.shape_cast %22 : vector<2x8x3840xbf16> to vector<16x3840xbf16>
    %c0_6 = arith.constant 0 : index
    %c0_7 = arith.constant 0 : index
    %24 = vector.load %arg4[%c0_6, %c0_7] : memref<3840x512xbf16, #tpu.memory_space<vmem>>, vector<3840x512xbf16>
    %cst_8 = arith.constant dense<0.000000e+00> : vector<16x512xf32>
    %25 = tpu.matmul %23, %24, %cst_8 {dimension_numbers = #tpu.dot_dimension_numbers<[1], [0], [0], [1], [0, 0, 1, 1], [], []>} : vector<16x3840xbf16>, vector<3840x512xbf16>, vector<16x512xf32> -> vector<16x512xf32>
    %26 = vector.extract_strided_slice %25 {offsets = [0, 0], sizes = [16, 256], strides = [1, 1]} : vector<16x512xf32> to vector<16x256xf32>
    %27 = vector.extract_strided_slice %25 {offsets = [0, 256], sizes = [16, 256], strides = [1, 1]} : vector<16x512xf32> to vector<16x256xf32>
    %28 = arith.maximumf %26, %27 : vector<16x256xf32>
    %29 = vector.shape_cast %28 : vector<16x256xf32> to vector<2x8x256xf32>
    %c0_9 = arith.constant 0 : index
    %c0_10 = arith.constant 0 : index
    %30 = vector.load %arg5[%c0_9, %c0_10] : memref<1x256xf32, #tpu.memory_space<vmem>>, vector<1x256xf32>
    %cst_11 = arith.constant 0.000000e+00 : f32
    %31 = vector.broadcast %cst_11 : f32 to vector<2x128xf32>
    %32 = vector.extract_strided_slice %29 {offsets = [0, 0, 0], sizes = [2, 1, 256], strides = [1, 1, 1]} : vector<2x8x256xf32> to vector<2x1x256xf32>
    %33 = vector.shape_cast %32 : vector<2x1x256xf32> to vector<2x256xf32>
    %34 = vector.extract_strided_slice %29 {offsets = [0, 1, 0], sizes = [2, 1, 256], strides = [1, 1, 1]} : vector<2x8x256xf32> to vector<2x1x256xf32>
    %35 = vector.shape_cast %34 : vector<2x1x256xf32> to vector<2x256xf32>
    %36 = arith.maximumf %33, %35 : vector<2x256xf32>
    %37 = vector.broadcast %30 : vector<1x256xf32> to vector<2x256xf32>
    %38 = arith.addf %36, %37 : vector<2x256xf32>
    %cst_12 = arith.constant 0.000000e+00 : f32
    %39 = vector.broadcast %cst_12 : f32 to vector<2x256xf32>
    %40 = arith.maximumf %38, %39 : vector<2x256xf32>
    %41 = arith.truncf %40 : vector<2x256xf32> to vector<2x256xbf16>
    %c0_13 = arith.constant 0 : index
    %c0_14 = arith.constant 0 : index
    %42 = vector.load %arg6[%c0_13, %c0_14] : memref<1024x128xbf16, #tpu.memory_space<vmem>>, vector<256x128xbf16>
    %cst_15 = arith.constant dense<0.000000e+00> : vector<2x128xf32>
    %43 = tpu.matmul %41, %42, %cst_15 {dimension_numbers = #tpu.dot_dimension_numbers<[1], [0], [0], [1], [0, 0, 1, 1], [], []>} : vector<2x256xbf16>, vector<256x128xbf16>, vector<2x128xf32> -> vector<2x128xf32>
    %44 = arith.addf %31, %43 : vector<2x128xf32>
    %45 = vector.extract_strided_slice %29 {offsets = [0, 2, 0], sizes = [2, 1, 256], strides = [1, 1, 1]} : vector<2x8x256xf32> to vector<2x1x256xf32>
    %46 = vector.shape_cast %45 : vector<2x1x256xf32> to vector<2x256xf32>
    %47 = vector.extract_strided_slice %29 {offsets = [0, 3, 0], sizes = [2, 1, 256], strides = [1, 1, 1]} : vector<2x8x256xf32> to vector<2x1x256xf32>
    %48 = vector.shape_cast %47 : vector<2x1x256xf32> to vector<2x256xf32>
    %49 = arith.maximumf %46, %48 : vector<2x256xf32>
    %50 = vector.broadcast %30 : vector<1x256xf32> to vector<2x256xf32>
    %51 = arith.addf %49, %50 : vector<2x256xf32>
    %cst_16 = arith.constant 0.000000e+00 : f32
    %52 = vector.broadcast %cst_16 : f32 to vector<2x256xf32>
    %53 = arith.maximumf %51, %52 : vector<2x256xf32>
    %54 = arith.truncf %53 : vector<2x256xf32> to vector<2x256xbf16>
    %c256 = arith.constant 256 : index
    %c0_17 = arith.constant 0 : index
    %55 = vector.load %arg6[%c256, %c0_17] : memref<1024x128xbf16, #tpu.memory_space<vmem>>, vector<256x128xbf16>
    %cst_18 = arith.constant dense<0.000000e+00> : vector<2x128xf32>
    %56 = tpu.matmul %54, %55, %cst_18 {dimension_numbers = #tpu.dot_dimension_numbers<[1], [0], [0], [1], [0, 0, 1, 1], [], []>} : vector<2x256xbf16>, vector<256x128xbf16>, vector<2x128xf32> -> vector<2x128xf32>
    %57 = arith.addf %44, %56 : vector<2x128xf32>
    %58 = vector.extract_strided_slice %29 {offsets = [0, 4, 0], sizes = [2, 1, 256], strides = [1, 1, 1]} : vector<2x8x256xf32> to vector<2x1x256xf32>
    %59 = vector.shape_cast %58 : vector<2x1x256xf32> to vector<2x256xf32>
    %60 = vector.extract_strided_slice %29 {offsets = [0, 5, 0], sizes = [2, 1, 256], strides = [1, 1, 1]} : vector<2x8x256xf32> to vector<2x1x256xf32>
    %61 = vector.shape_cast %60 : vector<2x1x256xf32> to vector<2x256xf32>
    %62 = arith.maximumf %59, %61 : vector<2x256xf32>
    %63 = vector.broadcast %30 : vector<1x256xf32> to vector<2x256xf32>
    %64 = arith.addf %62, %63 : vector<2x256xf32>
    %cst_19 = arith.constant 0.000000e+00 : f32
    %65 = vector.broadcast %cst_19 : f32 to vector<2x256xf32>
    %66 = arith.maximumf %64, %65 : vector<2x256xf32>
    %67 = arith.truncf %66 : vector<2x256xf32> to vector<2x256xbf16>
    %c512 = arith.constant 512 : index
    %c0_20 = arith.constant 0 : index
    %68 = vector.load %arg6[%c512, %c0_20] : memref<1024x128xbf16, #tpu.memory_space<vmem>>, vector<256x128xbf16>
    %cst_21 = arith.constant dense<0.000000e+00> : vector<2x128xf32>
    %69 = tpu.matmul %67, %68, %cst_21 {dimension_numbers = #tpu.dot_dimension_numbers<[1], [0], [0], [1], [0, 0, 1, 1], [], []>} : vector<2x256xbf16>, vector<256x128xbf16>, vector<2x128xf32> -> vector<2x128xf32>
    %70 = arith.addf %57, %69 : vector<2x128xf32>
    %71 = vector.extract_strided_slice %29 {offsets = [0, 6, 0], sizes = [2, 1, 256], strides = [1, 1, 1]} : vector<2x8x256xf32> to vector<2x1x256xf32>
    %72 = vector.shape_cast %71 : vector<2x1x256xf32> to vector<2x256xf32>
    %73 = vector.extract_strided_slice %29 {offsets = [0, 7, 0], sizes = [2, 1, 256], strides = [1, 1, 1]} : vector<2x8x256xf32> to vector<2x1x256xf32>
    %74 = vector.shape_cast %73 : vector<2x1x256xf32> to vector<2x256xf32>
    %75 = arith.maximumf %72, %74 : vector<2x256xf32>
    %76 = vector.broadcast %30 : vector<1x256xf32> to vector<2x256xf32>
    %77 = arith.addf %75, %76 : vector<2x256xf32>
    %cst_22 = arith.constant 0.000000e+00 : f32
    %78 = vector.broadcast %cst_22 : f32 to vector<2x256xf32>
    %79 = arith.maximumf %77, %78 : vector<2x256xf32>
    %80 = arith.truncf %79 : vector<2x256xf32> to vector<2x256xbf16>
    %c768 = arith.constant 768 : index
    %c0_23 = arith.constant 0 : index
    %81 = vector.load %arg6[%c768, %c0_23] : memref<1024x128xbf16, #tpu.memory_space<vmem>>, vector<256x128xbf16>
    %cst_24 = arith.constant dense<0.000000e+00> : vector<2x128xf32>
    %82 = tpu.matmul %80, %81, %cst_24 {dimension_numbers = #tpu.dot_dimension_numbers<[1], [0], [0], [1], [0, 0, 1, 1], [], []>} : vector<2x256xbf16>, vector<256x128xbf16>, vector<2x128xf32> -> vector<2x128xf32>
    %83 = arith.addf %70, %82 : vector<2x128xf32>
    %c0_25 = arith.constant 0 : index
    %c0_26 = arith.constant 0 : index
    %84 = vector.load %arg7[%c0_25, %c0_26] : memref<1x128xf32, #tpu.memory_space<vmem>>, vector<1x128xf32>
    %85 = vector.broadcast %84 : vector<1x128xf32> to vector<2x128xf32>
    %86 = arith.addf %83, %85 : vector<2x128xf32>
    %cst_27 = arith.constant 0.000000e+00 : f32
    %87 = vector.broadcast %cst_27 : f32 to vector<2x128xf32>
    %88 = arith.maximumf %86, %87 : vector<2x128xf32>
    %89 = arith.truncf %88 : vector<2x128xf32> to vector<2x128xbf16>
    %c0_28 = arith.constant 0 : index
    %c0_29 = arith.constant 0 : index
    %90 = vector.load %arg8[%c0_28, %c0_29] : memref<128x64xbf16, #tpu.memory_space<vmem>>, vector<128x64xbf16>
    %cst_30 = arith.constant dense<0.000000e+00> : vector<2x64xf32>
    %91 = tpu.matmul %89, %90, %cst_30 {dimension_numbers = #tpu.dot_dimension_numbers<[1], [0], [0], [1], [0, 0, 1, 1], [], []>} : vector<2x128xbf16>, vector<128x64xbf16>, vector<2x64xf32> -> vector<2x64xf32>
    %c0_31 = arith.constant 0 : index
    %c0_32 = arith.constant 0 : index
    %92 = vector.load %arg9[%c0_31, %c0_32] : memref<1x64xf32, #tpu.memory_space<vmem>>, vector<1x64xf32>
    %93 = vector.broadcast %92 : vector<1x64xf32> to vector<2x64xf32>
    %94 = arith.addf %91, %93 : vector<2x64xf32>
    %cst_33 = arith.constant 0.000000e+00 : f32
    %95 = vector.broadcast %cst_33 : f32 to vector<2x64xf32>
    %96 = arith.maximumf %94, %95 : vector<2x64xf32>
    %97 = arith.truncf %96 : vector<2x64xf32> to vector<2x64xbf16>
    %c0_34 = arith.constant 0 : index
    %c0_35 = arith.constant 0 : index
    %98 = vector.load %arg10[%c0_34, %c0_35] : memref<64x10xbf16, #tpu.memory_space<vmem>>, vector<64x10xbf16>
    %cst_36 = arith.constant dense<0.000000e+00> : vector<2x10xf32>
    %99 = tpu.matmul %97, %98, %cst_36 {dimension_numbers = #tpu.dot_dimension_numbers<[1], [0], [0], [1], [0, 0, 1, 1], [], []>} : vector<2x64xbf16>, vector<64x10xbf16>, vector<2x10xf32> -> vector<2x10xf32>
    %c0_37 = arith.constant 0 : index
    %c0_38 = arith.constant 0 : index
    %100 = vector.load %arg11[%c0_37, %c0_38] : memref<1x10xf32, #tpu.memory_space<vmem>>, vector<1x10xf32>
    %101 = vector.broadcast %100 : vector<1x10xf32> to vector<2x10xf32>
    %102 = arith.addf %99, %101 : vector<2x10xf32>
    %cst_39 = arith.constant dense<0xFF800000> : vector<2xf32>
    %103 = vector.multi_reduction <maximumf>, %102, %cst_39 [1] : vector<2x10xf32> to vector<2xf32>
    %104 = vector.shape_cast %103 : vector<2xf32> to vector<2x1xf32>
    %105 = vector.broadcast %104 : vector<2x1xf32> to vector<2x10xf32>
    %106 = arith.subf %102, %105 : vector<2x10xf32>
    %107 = math.exp %106 : vector<2x10xf32>
    %cst_40 = arith.constant dense<0.000000e+00> : vector<2xf32>
    %108 = vector.multi_reduction <add>, %107, %cst_40 [1] : vector<2x10xf32> to vector<2xf32>
    %109 = vector.shape_cast %108 : vector<2xf32> to vector<2x1xf32>
    %110 = math.log %109 : vector<2x1xf32>
    %111 = vector.broadcast %110 : vector<2x1xf32> to vector<2x10xf32>
    %112 = arith.subf %106, %111 : vector<2x10xf32>
    %c0_41 = arith.constant 0 : index
    %c0_42 = arith.constant 0 : index
    %113 = vector.load %arg12[%c0_41, %c0_42] : memref<2x10xf32, #tpu.memory_space<vmem>>, vector<2x10xf32>
    tpu.vector_store %arg12[%c0_41, %c0_42], %112 {strides = array<i32>} : memref<2x10xf32, #tpu.memory_space<vmem>>, vector<2x10xf32>,
    return
  }
  func.func @transform_0(%arg0: i32) -> (i32, i32) {
    %c0_i32 = arith.constant 0 : i32
    %c0_i32_0 = arith.constant 0 : i32
    return %arg0, %c0_i32 : i32, i32
  }
  func.func @transform_1(%arg0: i32) -> (i32, i32) {
    %c0_i32 = arith.constant 0 : i32
    %c0_i32_0 = arith.constant 0 : i32
    %c0_i32_1 = arith.constant 0 : i32
    return %c0_i32, %c0_i32_0 : i32, i32
  }
  func.func @transform_2(%arg0: i32) -> (i32, i32) {
    %c0_i32 = arith.constant 0 : i32
    %c0_i32_0 = arith.constant 0 : i32
    %c0_i32_1 = arith.constant 0 : i32
    return %c0_i32, %c0_i32_0 : i32, i32
  }
  func.func @transform_3(%arg0: i32) -> (i32, i32) {
    %c0_i32 = arith.constant 0 : i32
    %c0_i32_0 = arith.constant 0 : i32
    %c0_i32_1 = arith.constant 0 : i32
    return %c0_i32, %c0_i32_0 : i32, i32
  }
  func.func @transform_4(%arg0: i32) -> (i32, i32) {
    %c0_i32 = arith.constant 0 : i32
    %c0_i32_0 = arith.constant 0 : i32
    %c0_i32_1 = arith.constant 0 : i32
    return %c0_i32, %c0_i32_0 : i32, i32
  }
  func.func @transform_5(%arg0: i32) -> (i32, i32) {
    %c0_i32 = arith.constant 0 : i32
    %c0_i32_0 = arith.constant 0 : i32
    %c0_i32_1 = arith.constant 0 : i32
    return %c0_i32, %c0_i32_0 : i32, i32
  }
  func.func @transform_6(%arg0: i32) -> (i32, i32) {
    %c0_i32 = arith.constant 0 : i32
    %c0_i32_0 = arith.constant 0 : i32
    %c0_i32_1 = arith.constant 0 : i32
    return %c0_i32, %c0_i32_0 : i32, i32
  }
  func.func @transform_7(%arg0: i32) -> (i32, i32) {
    %c0_i32 = arith.constant 0 : i32
    %c0_i32_0 = arith.constant 0 : i32
    %c0_i32_1 = arith.constant 0 : i32
    return %c0_i32, %c0_i32_0 : i32, i32
  }
  func.func @transform_8(%arg0: i32) -> (i32, i32) {
    %c0_i32 = arith.constant 0 : i32
    %c0_i32_0 = arith.constant 0 : i32
    %c0_i32_1 = arith.constant 0 : i32
    return %c0_i32, %c0_i32_0 : i32, i32
  }
  func.func @transform_9(%arg0: i32) -> (i32, i32) {
    %c0_i32 = arith.constant 0 : i32
    %c0_i32_0 = arith.constant 0 : i32
    %c0_i32_1 = arith.constant 0 : i32
    return %c0_i32, %c0_i32_0 : i32, i32
  }
  func.func @transform_10(%arg0: i32) -> (i32, i32) {
    %c0_i32 = arith.constant 0 : i32
    %c0_i32_0 = arith.constant 0 : i32
    %c0_i32_1 = arith.constant 0 : i32
    return %c0_i32, %c0_i32_0 : i32, i32
  }
  func.func @transform_11(%arg0: i32) -> (i32, i32) {
    %c0_i32 = arith.constant 0 : i32
    %c0_i32_0 = arith.constant 0 : i32
    return %arg0, %c0_i32 : i32, i32
  }
}

</mosaic_0001>

<bundles_post_ra>
// kernel: cnn_mnist_forward.1
= control target key start
LH: loop header
LB: loop body
LE: loop exit
PB: predicated region body
PF: predicated region fallthrough
CT: control target
= control target key end

     0   :  { %16 = vsyncpa [#allocation3], 0  ;;  %s14012_s0 = inlined_call_operand.vmem [shape: bf16[48,140], index: 0, kind: input, shape index: {}]   ;;  %s14013_s1 = inlined_call_operand.hbm [shape: bf16[140,1536], index: 1, kind: input, shape index: {}]   ;;  %s14014_s2 = inlined_call_operand.hbm [shape: f32[1,768], index: 2, kind: input, shape index: {}]   ;;  %s14015_s3 = inlined_call_operand.hbm [shape: bf16[3840,512], index: 3, kind: input, shape index: {}]   ;;  %s14016_s4 = inlined_call_operand.hbm [shape: f32[1,256], index: 4, kind: input, shape index: {}]   ;;  %s14017_s5 = inlined_call_operand.hbm [shape: bf16[1024,128], index: 5, kind: input, shape index: {}]   ;;  %s14018_s6 = inlined_call_operand.hbm [shape: f32[1,128], index: 6, kind: input, shape index: {}]   ;;  %s14019_s7 = inlined_call_operand.vmem [shape: bf16[128,64], index: 7, kind: input, shape index: {}]   ;;  %s14020_s8 = inlined_call_operand.hbm [shape: f32[1,64], index: 8, kind: input, shape index: {}]   ;;  %s14021_s9 = inlined_call_operand.vmem [shape: bf16[64,10], index: 9, kind: input, shape index: {}]   ;;  %s14022_s10 = inlined_call_operand.hbm [shape: f32[1,10], index: 10, kind: input, shape index: {}]   ;;  %s14023_s11 = inlined_call_operand.hbm [shape: f32[2,10], index: 11, kind: output, shape index: {}]  }
   0x1   :  { %17 = vsyncpa [#allocation6], 0 }
   0x2   :  { %18 = vsyncpa [#allocation9], 0 }
   0x3   :  { %19 = vsyncpa [#allocation12], 0 }
   0x4   :  { %20 = vsyncpa [#allocation15], 0 }
   0x5   :  { %21 = vsyncpa [#allocation4], 0  ;;  %s13178_s17 = smov [#allocation5]   ;;  %s13179_s19 = smov [#allocation8]  }
   0x6   :  { %s42_s18 = sshll.u32 %s13178_s17, 4  ;;  %s64_s20 = sshll.u32 %s13179_s19, 4  ;;  %s43_s18 = int_to_ptr.vmem [resolvable:$true] %s42_s18  ;;  %s65_s20 = int_to_ptr.vmem [resolvable:$true] %s64_s20 }
   0x7   :  { %s12968_s23 = scalar_lea.hbm %s14014_s2, 96 }
   0x8   :  { %p12969_p0 = scmp.ne.s32.totalorder %s14014_s2, %s12968_s23  ;;  %p12972_p1 = scmp.lt.u32.totalorder %s12968_s23, %s14014_s2 }
   0xa   :  { %p12974_p2 = pnand %p12972_p1, %p12969_p0 }
   0xc   :  { %12977 = shalt.err (!%p12974_p2)
}
   0xd   :  { %s12978_s28 = scalar_lea.vmem %s43_s18, 96  ;;  %p12983_p4 = scmp.lt.s32.totalorder %s43_s18, %s43_s18 }
   0xe   :  { %p12979_p3 = scmp.ne.s32.totalorder %s43_s18, %s12978_s28  ;;  %p12984_p5 = scmp.lt.s32.totalorder %s12978_s28, %s12978_s28 }
  0x10   :  { %p12985_p6 = por %p12984_p5, %p12983_p4 }
  0x12   :  { %p12986_p7 = pnand %p12985_p6, %p12979_p3 }
  0x14   :  { %12989 = shalt.err (!%p12986_p7)
}
  0x15   :  { %45 = dma.hbm_to_vmem [thread:$0]  %s14014_s2, 96, %s43_s18, [#allocation6]  }
  0x16   :  { %s12990_s14 = scalar_lea.hbm %s14016_s4, 32 }
  0x17   :  { %p12991_p8 = scmp.ne.s32.totalorder %s14016_s4, %s12990_s14  ;;  %p12994_p9 = scmp.lt.u32.totalorder %s12990_s14, %s14016_s4 }
  0x19   :  { %p12996_p10 = pnand %p12994_p9, %p12991_p8 }
  0x1b   :  { %12999 = shalt.err (!%p12996_p10)
}
  0x1c   :  { %s13000_s21 = scalar_lea.vmem %s65_s20, 32  ;;  %p13005_p12 = scmp.lt.s32.totalorder %s65_s20, %s65_s20 }
  0x1d   :  { %p13001_p11 = scmp.ne.s32.totalorder %s65_s20, %s13000_s21  ;;  %p13006_p13 = scmp.lt.s32.totalorder %s13000_s21, %s13000_s21 }
  0x1f   :  { %p13007_p0 = por %p13006_p13, %p13005_p12 }
  0x21   :  { %p13008_p1 = pnand %p13007_p0, %p13001_p11 }
  0x23   :  { %13011 = shalt.err (!%p13008_p1)
}
  0x24   :  { %67 = dma.hbm_to_vmem [thread:$0]  %s14016_s4, 32, %s65_s20, [#allocation9]  }
  0x25   :  { %s13180_s22 = smov [#allocation11]   ;;  %s13181_s24 = smov [#allocation2]  }
  0x26   :  { %s86_s23 = sshll.u32 %s13180_s22, 4  ;;  %s29_s25 = sshll.u32 %s13181_s24, 4  ;;  %s87_s23 = int_to_ptr.vmem [resolvable:$true] %s86_s23  ;;  %s13279_s25 = int_to_ptr.vmem [resolvable:$true] %s29_s25 }
  0x27   :  { %s13012_s28 = scalar_lea.hbm %s14018_s6, 16 }
  0x28   :  { %p13013_p2 = scmp.ne.s32.totalorder %s14018_s6, %s13012_s28  ;;  %p13016_p3 = scmp.lt.u32.totalorder %s13012_s28, %s14018_s6 }
  0x2a   :  { %p13018_p4 = pnand %p13016_p3, %p13013_p2 }
  0x2c   :  { %13021 = shalt.err (!%p13018_p4)
}
  0x2d   :  { %s13022_s4 = scalar_lea.vmem %s87_s23, 16  ;;  %s13026_s20 = scalar_lea.vmem %s87_s23, 32 }
  0x2e   :  { %p13023_p5 = scmp.ne.s32.totalorder %s87_s23, %s13022_s4  ;;  %p13027_p6 = scmp.lt.s32.totalorder %s87_s23, %s87_s23 }
  0x2f   :  { %p13028_p7 = scmp.lt.s32.totalorder %s13026_s20, %s13022_s4 }
  0x31   :  { %p13029_p8 = por %p13028_p7, %p13027_p6 }
  0x33   :  { %p13030_p9 = pnand %p13029_p8, %p13023_p5 }
  0x35   :  { %13033 = shalt.err (!%p13030_p9)
}
  0x36   :  { %89 = dma.hbm_to_vmem [thread:$0]  %s14018_s6, 16, %s87_s23, [#allocation12]  }
  0x37   :  { %s13034_s19 = scalar_lea.hbm %s14013_s1, 13824 }
  0x38   :  { %p13035_p10 = scmp.ne.s32.totalorder %s14013_s1, %s13034_s19  ;;  %p13038_p11 = scmp.lt.u32.totalorder %s13034_s19, %s14013_s1 }
  0x3a   :  { %p13040_p12 = pnand %p13038_p11, %p13035_p10 }
  0x3c   :  { %13043 = shalt.err (!%p13040_p12)
}
  0x3d   :  { %s13044_s24 = scalar_lea.vmem %s13279_s25, 13824  ;;  %p13049_p0 = scmp.lt.s32.totalorder %s13279_s25, %s13279_s25 }
  0x3e   :  { %p13045_p13 = scmp.ne.s32.totalorder %s13279_s25, %s13044_s24  ;;  %p13050_p1 = scmp.lt.s32.totalorder %s13044_s24, %s13044_s24 }
  0x40   :  { %p13051_p2 = por %p13050_p1, %p13049_p0 }
  0x42   :  { %p13052_p3 = pnand %p13051_p2, %p13045_p13 }
  0x44   :  { %13055 = shalt.err (!%p13052_p3)
}
  0x45   :  { %s13182_s6 = smov 768   ;;  %s13183_s23 = smov 48  }
  0x46   :  { %35 = dma.hbm_to_vmem [thread:$0]  %s14013_s1, 13824, %s13279_s25, [#allocation3], %s13182_s6, %s13182_s6, %s13183_s23  }
  0x47   :  { %s13184_s28 = smov [#allocation7]   ;;  %s13056_s13 = scalar_lea.hbm %s14015_s3, 122880 }
  0x48   :  { %s51_s29 = sshll.u32 %s13184_s28, 4  ;;  %p13057_p4 = scmp.ne.s32.totalorder %s14015_s3, %s13056_s13  ;;  %s52_s29 = int_to_ptr.vmem [resolvable:$true] %s51_s29 }
  0x49   :  { %p13060_p5 = scmp.lt.u32.totalorder %s13056_s13, %s14015_s3 }
  0x4b   :  { %p13062_p6 = pnand %p13060_p5, %p13057_p4 }
  0x4d   :  { %13065 = shalt.err (!%p13062_p6)
}
  0x4e   :  { %s13066_s16 = scalar_lea.vmem %s52_s29, 122880  ;;  %p13071_p8 = scmp.lt.s32.totalorder %s52_s29, %s52_s29 }
  0x4f   :  { %p13067_p7 = scmp.ne.s32.totalorder %s52_s29, %s13066_s16  ;;  %p13072_p9 = scmp.lt.s32.totalorder %s13066_s16, %s13066_s16 }
  0x51   :  { %p13073_p10 = por %p13072_p9, %p13071_p8 }
  0x53   :  { %p13074_p11 = pnand %p13073_p10, %p13067_p7 }
  0x55   :  { %13077 = shalt.err (!%p13074_p11)
}
  0x56   :  { %s13185_s1 = smov 256   ;;  %s13186_s25 = smov 16  }
  0x57   :  { %57 = dma.hbm_to_vmem [thread:$0]  %s14015_s3, 122880, %s52_s29, [#allocation6], %s13185_s1, %s13185_s1, %s13186_s25  }
  0x58   :  { %s13187_s21 = smov [#allocation10]   ;;  %s13078_s24 = scalar_lea.hbm %s14017_s5, 8192 }
  0x59   :  { %s73_s2 = sshll.u32 %s13187_s21, 4  ;;  %p13079_p12 = scmp.ne.s32.totalorder %s14017_s5, %s13078_s24  ;;  %s74_s2 = int_to_ptr.vmem [resolvable:$true] %s73_s2 }
  0x5a   :  { %p13082_p13 = scmp.lt.u32.totalorder %s13078_s24, %s14017_s5 }
  0x5c   :  { %p13084_p0 = pnand %p13082_p13, %p13079_p12 }
  0x5e   :  { %13087 = shalt.err (!%p13084_p0)
}
  0x5f   :  { %s13088_s28 = scalar_lea.vmem %s74_s2, 8192  ;;  %p13093_p2 = scmp.lt.s32.totalorder %s74_s2, %s74_s2 }
  0x60   :  { %p13089_p1 = scmp.ne.s32.totalorder %s74_s2, %s13088_s28  ;;  %p13094_p3 = scmp.lt.s32.totalorder %s13088_s28, %s13088_s28 }
  0x62   :  { %p13095_p4 = por %p13094_p3, %p13093_p2 }
  0x64   :  { %p13096_p5 = pnand %p13095_p4, %p13089_p1 }
  0x66   :  { %13099 = shalt.err (!%p13096_p5)
}
  0x67   :  { %s13188_s3 = smov 64   ;;  %s13189_s29 = smov 4  }
  0x68   :  { %79 = dma.hbm_to_vmem [thread:$0]  %s14017_s5, 8192, %s74_s2, [#allocation9], %s13188_s3, %s13188_s3, %s13189_s29  }
  0x69   :  { %s13190_s13 = smov [#allocation13]   ;;  %s13191_s20 = smov [#allocation14]  }
  0x6a   :  { %s98_s4 = sshll.u32 %s13190_s13, 4  ;;  %s110_s14 = sshll.u32 %s13191_s20, 4  ;;  %s99_s4 = int_to_ptr.vmem [resolvable:$true] %s98_s4  ;;  %s111_s14 = int_to_ptr.vmem [resolvable:$true] %s110_s14 }
  0x6b   :  { %s13100_s1 = scalar_lea.hbm %s14020_s8, 16 }
  0x6c   :  { %p13101_p6 = scmp.ne.s32.totalorder %s14020_s8, %s13100_s1  ;;  %p13104_p7 = scmp.lt.u32.totalorder %s13100_s1, %s14020_s8 }
  0x6e   :  { %p13106_p8 = pnand %p13104_p7, %p13101_p6 }
  0x70   :  { %13109 = shalt.err (!%p13106_p8)
}
  0x71   :  { %s13110_s5 = scalar_lea.vmem %s99_s4, 16  ;;  %s13114_s2 = scalar_lea.vmem %s99_s4, 32 }
  0x72   :  { %p13111_p9 = scmp.ne.s32.totalorder %s99_s4, %s13110_s5  ;;  %p13115_p10 = scmp.lt.s32.totalorder %s99_s4, %s99_s4 }
  0x73   :  { %p13116_p11 = scmp.lt.s32.totalorder %s13114_s2, %s13110_s5 }
  0x75   :  { %p13117_p12 = por %p13116_p11, %p13115_p10 }
  0x77   :  { %p13118_p13 = pnand %p13117_p12, %p13111_p9 }
  0x79   :  { %13121 = shalt.err (!%p13118_p13)
}
  0x7a   :  { %101 = dma.hbm_to_vmem [thread:$0]  %s14020_s8, 16, %s99_s4, [#allocation12]  }
  0x7b   :  { %s13122_s23 = scalar_lea.hbm %s14022_s10, 16 }
  0x7c   :  { %p13123_p0 = scmp.ne.s32.totalorder %s14022_s10, %s13122_s23  ;;  %p13126_p1 = scmp.lt.u32.totalorder %s13122_s23, %s14022_s10 }
  0x7e   :  { %p13128_p2 = pnand %p13126_p1, %p13123_p0 }
  0x80   :  { %13131 = shalt.err (!%p13128_p2)
}
  0x81   :  { %s13132_s29 = scalar_lea.vmem %s111_s14, 16  ;;  %s13136_s30 = scalar_lea.vmem %s111_s14, 32 }
  0x82   :  { %p13133_p3 = scmp.ne.s32.totalorder %s111_s14, %s13132_s29  ;;  %p13137_p4 = scmp.lt.s32.totalorder %s111_s14, %s111_s14 }
  0x83   :  { %p13138_p5 = scmp.lt.s32.totalorder %s13136_s30, %s13132_s29 }
  0x85   :  { %p13139_p6 = por %p13138_p5, %p13137_p4 }
  0x87   :  { %p13140_p7 = pnand %p13139_p6, %p13133_p3 }
  0x89   :  { %13143 = shalt.err (!%p13140_p7)
}
  0x8a   :  { %113 = dma.hbm_to_vmem [thread:$0]  %s14022_s10, 16, %s111_s14, [#allocation15]  }
  0x8b   :  { %13166 = dma.done.wait [#allocation3], 13824  }
  0x8c   :  { %13167 = vsyncadd [#allocation3], 4294953472 }
  0x8d   :  { %13168 = dma.done.wait [#allocation6], 122976  }
  0x8e   :  { %13169 = vsyncadd [#allocation6], 4294844320 }
  0x8f   :  { %13170 = dma.done.wait [#allocation9], 8224  }
  0x90   :  { %13171 = vsyncadd [#allocation9], 4294959072 }
  0x91   :  { %13172 = dma.done.wait [#allocation12], 32  }
  0x92   :  { %13173 = vsyncadd [#allocation12], 4294967264 }
  0x93   :  { %13174 = dma.done.wait [#allocation15], 16  }
  0x94   :  { %13175 = vsyncadd [#allocation15], 4294967280  ;;  %v11277_v0 = vld [vmem:[#allocation2 + $0x4] ss:$48 sps:$4 sm:$0xff]   ;;  %v11279_v1 = vld [vmem:[#allocation2 + $0xc] ss:$48 sps:$4 sm:$0xff]  }
  0x95   :  { %855 = vmatprep.subr.bf16.mxu0 %v11277_v0  ;;  %v11281_v2 = vld [vmem:[#allocation2] ss:$48 sps:$4 sm:$0xff]   ;;  %v11282_v3 = vld [vmem:[#allocation2 + $0x8] ss:$48 sps:$4 sm:$0xff]   ;;  %918 = vmatprep.subr.bf16.mxu1 %v11279_v1  ;;  %v11283_v4 = vld [vmem:[#allocation2 + $0x64] ss:$48 sps:$4 sm:$0xff]  }
  0x96   :  { %856 = vmatpush1.bf16.msra.mxu0 %v11281_v2  ;;  %919 = vmatpush1.bf16.msra.mxu1 %v11282_v3  ;;  %v11285_v5 = vld [vmem:[#allocation2 + $0x6c] ss:$48 sps:$4 sm:$0xff]   ;;  %v11287_v6 = vld [vmem:[#allocation2 + $0x60] ss:$48 sps:$4 sm:$0xff]   ;;  %v11288_v7 = vld [vmem:[#allocation2 + $0x68] ss:$48 sps:$4 sm:$0xff]  }
  0x97   :  { %857 = vmatprep.subr.bf16.mxu0 %v11283_v4  ;;  %920 = vmatprep.subr.bf16.mxu1 %v11285_v5  ;;  %v11289_v8 = vld [vmem:[#allocation2 + $0xc4] ss:$48 sps:$4 sm:$0xff]   ;;  %v11291_v9 = vld [vmem:[#allocation2 + $0xcc] ss:$48 sps:$4 sm:$0xff]   ;;  %v11293_v10 = vld [vmem:[#allocation2 + $0xc0] ss:$48 sps:$4 sm:$0xff]  }
  0x98   :  { %v11294_v11 = vld [vmem:[#allocation2 + $0xc8] ss:$48 sps:$4 sm:$0xff]   ;;  %v11295_v12 = vld [vmem:[#allocation2 + $0x124] ss:$48 sps:$4 sm:$0xff]   ;;  %v11297_v13 = vld [vmem:[#allocation2 + $0x12c] ss:$48 sps:$4 sm:$0xff]  }
  0x99   :  { %v11299_v14 = vld [vmem:[#allocation2 + $0x120] ss:$48 sps:$4 sm:$0xff]   ;;  %v11300_v15 = vld [vmem:[#allocation2 + $0x128] ss:$48 sps:$4 sm:$0xff]   ;;  %v11301_v16 = vld [vmem:[#allocation2 + $0x184] ss:$48 sps:$4 sm:$0xff]  }
  0x9a   :  { %858 = vmatpush1.bf16.msra.mxu0 %v11287_v6  ;;  %921 = vmatpush1.bf16.msra.mxu1 %v11288_v7  ;;  %v11303_v17 = vld [vmem:[#allocation2 + $0x18c] ss:$48 sps:$4 sm:$0xff]   ;;  %v11305_v18 = vld [vmem:[#allocation2 + $0x180] ss:$48 sps:$4 sm:$0xff]   ;;  %v11306_v19 = vld [vmem:[#allocation2 + $0x188] ss:$48 sps:$4 sm:$0xff]  }
  0x9b   :  { %859 = vmatprep.subr.bf16.mxu0 %v11289_v8  ;;  %922 = vmatprep.subr.bf16.mxu1 %v11291_v9  ;;  %v11307_v20 = vld [vmem:[#allocation2 + $0x1e4] ss:$48 sps:$4 sm:$0xff]   ;;  %v11309_v21 = vld [vmem:[#allocation2 + $0x1ec] ss:$48 sps:$4 sm:$0xff]   ;;  %v11311_v22 = vld [vmem:[#allocation2 + $0x1e0] ss:$48 sps:$4 sm:$0xff]  }
  0x9c   :  { %v11312_v23 = vld [vmem:[#allocation2 + $0x1e8] ss:$48 sps:$4 sm:$0xff]   ;;  %v11313_v24 = vld [vmem:[#allocation2 + $0x244] ss:$48 sps:$4 sm:$0xff]   ;;  %v11315_v25 = vld [vmem:[#allocation2 + $0x24c] ss:$48 sps:$4 sm:$0xff]  }
  0x9d   :  { %v11317_v26 = vld [vmem:[#allocation2 + $0x240] ss:$48 sps:$4 sm:$0xff]   ;;  %v11318_v27 = vld [vmem:[#allocation2 + $0x248] ss:$48 sps:$4 sm:$0xff]   ;;  %v11319_v28 = vld [vmem:[#allocation2 + $0x2a4] ss:$48 sps:$4 sm:$0xff]  }
  0x9e   :  { %860 = vmatpush1.bf16.msra.mxu0 %v11293_v10  ;;  %923 = vmatpush1.bf16.msra.mxu1 %v11294_v11  ;;  %vm808_vm0 = vcmask 97280   ;;  %v11321_v29 = vld [vmem:[#allocation2 + $0x2ac] ss:$48 sps:$4 sm:$0xff]   ;;  %v11323_v31 = vld [vmem:[#allocation2 + $0x2a0] ss:$48 sps:$4 sm:$0xff]   ;;  %vm818_vm1 = vcmask 1045504  }
  0x9f   :  { %861 = vmatprep.subr.bf16.mxu0 %v11295_v12  ;;  %924 = vmatprep.subr.bf16.mxu1 %v11297_v13  ;;  %v13361_v30 = vld [vmem:[%s14012_s0 + $0x4] ss:$8 sps:$4 sm:$0xff]   ;;  %v11324_v32 = vld [vmem:[#allocation2 + $0x2a8] ss:$48 sps:$4 sm:$0xff]   ;;  %v11334_v42 = vld [vmem:[#allocation2 + $0x10] ss:$48 sps:$4 sm:$0xff]  }
  0xa0   :  { %v11325_v33 = vld [vmem:[#allocation2 + $0x304] ss:$48 sps:$4 sm:$0x3f]   ;;  %v11327_v34 = vld [vmem:[#allocation2 + $0x30c] ss:$48 sps:$4 sm:$0x3f]   ;;  %9919 = vmatprep.mubr.msk.bf16.mxu1 %vm808_vm0, %v13361_v30  ;;  %9915 = vmatprep.mubr.msk.bf16.mxu0 %vm808_vm0, %v13361_v30 }
  0xa1   :  { %v11329_v35 = vld [vmem:[#allocation2 + $0x300] ss:$48 sps:$4 sm:$0x3f]   ;;  %v11330_v36 = vld [vmem:[#allocation2 + $0x308] ss:$48 sps:$4 sm:$0x3f]  }
  0xa2   :  { %862 = vmatpush1.bf16.msra.mxu0 %v11299_v14  ;;  %925 = vmatpush1.bf16.msra.mxu1 %v11300_v15  ;;  %v820_v37 = vsel %vm818_vm1, %v11329_v35, 0  ;;  %v826_v38 = vsel %vm818_vm1, %v11330_v36, 0  ;;  %v11336_v39 = vld [vmem:[#allocation2 + $0x14] ss:$48 sps:$4 sm:$0xff]   ;;  %v11339_v40 = vld [vmem:[#allocation2 + $0x1c] ss:$48 sps:$4 sm:$0xff]  }
  0xa3   :  { %863 = vmatprep.subr.bf16.mxu0 %v11301_v16  ;;  %926 = vmatprep.subr.bf16.mxu1 %v11303_v17  ;;  %v13374_v41 = vld [vmem:[%s14012_s0] ss:$8 sps:$4 sm:$0xff]   ;;  %v11342_v44 = vld [vmem:[#allocation2 + $0x74] ss:$48 sps:$4 sm:$0xff]   ;;  %v11345_v45 = vld [vmem:[#allocation2 + $0x7c] ss:$48 sps:$4 sm:$0xff]  }
  0xa4   :  { %v11337_v43 = vld [vmem:[#allocation2 + $0x18] ss:$48 sps:$4 sm:$0xff]   ;;  %v13379_v46 = vld [vmem:[%s14012_s0 + $0x14] ss:$8 sps:$4 sm:$0xff]   ;;  %v11340_v47 = vld [vmem:[#allocation2 + $0x70] ss:$48 sps:$4 sm:$0xff]  }
  0xa5   :  { %v11343_v48 = vld [vmem:[#allocation2 + $0x78] ss:$48 sps:$4 sm:$0xff]   ;;  %v11348_v49 = vld [vmem:[#allocation2 + $0xd4] ss:$48 sps:$4 sm:$0xff]   ;;  %v11351_v50 = vld [vmem:[#allocation2 + $0xdc] ss:$48 sps:$4 sm:$0xff]  }
  0xa6   :  { %864 = vmatpush1.bf16.msra.mxu0 %v11305_v18  ;;  %927 = vmatpush1.bf16.msra.mxu1 %v11306_v19  ;;  %v11346_v51 = vld [vmem:[#allocation2 + $0xd0] ss:$48 sps:$4 sm:$0xff]   ;;  %v11349_v52 = vld [vmem:[#allocation2 + $0xd8] ss:$48 sps:$4 sm:$0xff]   ;;  %v11354_v54 = vld [vmem:[#allocation2 + $0x134] ss:$48 sps:$4 sm:$0xff]  }
  0xa7   :  { %865 = vmatprep.subr.bf16.mxu0 %v11307_v20  ;;  %928 = vmatprep.subr.bf16.mxu1 %v11309_v21  ;;  %v13390_v53 = vld [vmem:[%s14012_s0 + $0x10] ss:$8 sps:$4 sm:$0xff]   ;;  %v11357_v55 = vld [vmem:[#allocation2 + $0x13c] ss:$48 sps:$4 sm:$0xff]   ;;  %v11362_v59 = vld [vmem:[#allocation2 + $0x194] ss:$48 sps:$4 sm:$0xff]  }
  0xa8   :  { %v13395_v56 = vld [vmem:[%s14012_s0 + $0x24] ss:$8 sps:$4 sm:$0xff]   ;;  %v11352_v57 = vld [vmem:[#allocation2 + $0x130] ss:$48 sps:$4 sm:$0xff]   ;;  %v11355_v58 = vld [vmem:[#allocation2 + $0x138] ss:$48 sps:$4 sm:$0xff]  }
  0xa9   :  { %v11365_v60 = vld [vmem:[#allocation2 + $0x19c] ss:$48 sps:$4 sm:$0xff]   ;;  %v13406_v61 = vld [vmem:[%s14012_s0 + $0x20] ss:$8 sps:$4 sm:$0xff]   ;;  %v11369_v0 = vld [vmem:[#allocation2 + $0x1f4] ss:$48 sps:$4 sm:$0xff]  }
  0xaa   :  { %866 = vmatpush1.bf16.msra.mxu0 %v11311_v22  ;;  %929 = vmatpush1.bf16.msra.mxu1 %v11312_v23  ;;  %v11360_v62 = vld [vmem:[#allocation2 + $0x190] ss:$48 sps:$4 sm:$0xff]   ;;  %v11363_v63 = vld [vmem:[#allocation2 + $0x198] ss:$48 sps:$4 sm:$0xff]   ;;  %v11372_v1 = vld [vmem:[#allocation2 + $0x1fc] ss:$48 sps:$4 sm:$0xff]  }
  0xab   :  { %867 = vmatprep.subr.bf16.mxu0 %v11313_v24  ;;  %930 = vmatprep.subr.bf16.mxu1 %v11315_v25  ;;  %v11367_v2 = vld [vmem:[#allocation2 + $0x1f0] ss:$48 sps:$4 sm:$0xff]   ;;  %v11370_v3 = vld [vmem:[#allocation2 + $0x1f8] ss:$48 sps:$4 sm:$0xff]   ;;  %v11377_v4 = vld [vmem:[#allocation2 + $0x254] ss:$48 sps:$4 sm:$0xff]  }
  0xac   :  { %v11380_v5 = vld [vmem:[#allocation2 + $0x25c] ss:$48 sps:$4 sm:$0xff]   ;;  %v11375_v6 = vld [vmem:[#allocation2 + $0x250] ss:$48 sps:$4 sm:$0xff]   ;;  %v11378_v7 = vld [vmem:[#allocation2 + $0x258] ss:$48 sps:$4 sm:$0xff]  }
  0xad   :  { %v11384_v8 = vld [vmem:[#allocation2 + $0x2b4] ss:$48 sps:$4 sm:$0xff]   ;;  %v11387_v9 = vld [vmem:[#allocation2 + $0x2bc] ss:$48 sps:$4 sm:$0xff]   ;;  %v11382_v10 = vld [vmem:[#allocation2 + $0x2b0] ss:$48 sps:$4 sm:$0xff]  }
  0xae   :  { %868 = vmatpush1.bf16.msra.mxu0 %v11317_v26  ;;  %931 = vmatpush1.bf16.msra.mxu1 %v11318_v27  ;;  %v11388_v11 = vld [vmem:[#allocation2 + $0x314] ss:$48 sps:$4 sm:$0x3f]   ;;  %v11390_v12 = vld [vmem:[#allocation2 + $0x31c] ss:$48 sps:$4 sm:$0x3f]  }
  0xaf   :  { %869 = vmatprep.subr.bf16.mxu0 %v11319_v28  ;;  %932 = vmatprep.subr.bf16.mxu1 %v11321_v29  ;;  %v11385_v13 = vld [vmem:[#allocation2 + $0x2b8] ss:$48 sps:$4 sm:$0xff]   ;;  %v11392_v14 = vld [vmem:[#allocation2 + $0x310] ss:$48 sps:$4 sm:$0x3f]   ;;  %vm1293_vm2 = vcmask 1043456  }
  0xb0   :  { %v11393_v15 = vld [vmem:[#allocation2 + $0x318] ss:$48 sps:$4 sm:$0x3f]   ;;  %v11396_v16 = vld [vmem:[#allocation2 + $0x24] ss:$48 sps:$4 sm:$0xff]   ;;  %v832_v17 = vsel %vm818_vm1, %v11392_v14, 0 }
  0xb1   :  { %v838_v18 = vsel %vm818_vm1, %v11393_v15, 0  ;;  %v11399_v19 = vld [vmem:[#allocation2 + $0x2c] ss:$48 sps:$4 sm:$0xff]   ;;  %v11394_v20 = vld [vmem:[#allocation2 + $0x20] ss:$48 sps:$4 sm:$0xff]   ;;  %vm8914_vm3 = vcmask 1041409  }
  0xb2   :  { %870 = vmatpush1.bf16.msra.mxu0 %v11323_v31  ;;  %933 = vmatpush1.bf16.msra.mxu1 %v11324_v32  ;;  %v11397_v21 = vld [vmem:[#allocation2 + $0x28] ss:$48 sps:$4 sm:$0xff]   ;;  %v11402_v22 = vld [vmem:[#allocation2 + $0x84] ss:$48 sps:$4 sm:$0xff]   ;;  %v11405_v23 = vld [vmem:[#allocation2 + $0x8c] ss:$48 sps:$4 sm:$0xff]  }
  0xb3   :  { %9914 = vmatprep.subr.msk.bf16.mxu0 %vm818_vm1, %v11325_v33  ;;  %9918 = vmatprep.subr.msk.bf16.mxu1 %vm818_vm1, %v11327_v34  ;;  %v11400_v24 = vld [vmem:[#allocation2 + $0x80] ss:$48 sps:$4 sm:$0xff]   ;;  %v11403_v25 = vld [vmem:[#allocation2 + $0x88] ss:$48 sps:$4 sm:$0xff]   ;;  %v11408_v26 = vld [vmem:[#allocation2 + $0xe4] ss:$48 sps:$4 sm:$0xff]  }
  0xb4   :  { %v11411_v27 = vld [vmem:[#allocation2 + $0xec] ss:$48 sps:$4 sm:$0xff]   ;;  %v11406_v28 = vld [vmem:[#allocation2 + $0xe0] ss:$48 sps:$4 sm:$0xff]   ;;  %v11409_v29 = vld [vmem:[#allocation2 + $0xe8] ss:$48 sps:$4 sm:$0xff]  }
  0xb5   :  { %v11414_v31 = vld [vmem:[#allocation2 + $0x144] ss:$48 sps:$4 sm:$0xff]   ;;  %v11417_v32 = vld [vmem:[#allocation2 + $0x14c] ss:$48 sps:$4 sm:$0xff]   ;;  %v11412_v33 = vld [vmem:[#allocation2 + $0x140] ss:$48 sps:$4 sm:$0xff]  }
  0xb6   :  { %872 = vmatpush1.bf16.msra.mxu0 %v820_v37  ;;  %935 = vmatpush1.bf16.msra.mxu1 %v826_v38  ;;  %v11415_v34 = vld [vmem:[#allocation2 + $0x148] ss:$48 sps:$4 sm:$0xff]   ;;  %v11420_v35 = vld [vmem:[#allocation2 + $0x1a4] ss:$48 sps:$4 sm:$0xff]   ;;  %v11423_v36 = vld [vmem:[#allocation2 + $0x1ac] ss:$48 sps:$4 sm:$0xff]  }
  0xb7   :  { %981 = vmatprep.subr.bf16.mxu0 %v11336_v39  ;;  %1044 = vmatprep.subr.bf16.mxu1 %v11339_v40  ;;  %v11418_v37 = vld [vmem:[#allocation2 + $0x1a0] ss:$48 sps:$4 sm:$0xff]   ;;  %v11421_v38 = vld [vmem:[#allocation2 + $0x1a8] ss:$48 sps:$4 sm:$0xff]   ;;  %v11426_v39 = vld [vmem:[#allocation2 + $0x204] ss:$48 sps:$4 sm:$0xff]  }
  0xb8   :  { %v11429_v40 = vld [vmem:[#allocation2 + $0x20c] ss:$48 sps:$4 sm:$0xff]   ;;  %v11478_v14 = vld [vmem:[#allocation7 + $0xa0] ss:$16 sps:$4 sm:$0xff]   ;;  %vm13193_vm4 = vmmov 0   ;;  %vm9723_vm5 = vcmask 523264  }
  0xb9   :  { %951 = vmatmul.mubr.bf16.vlgmr.msra.gmra.mrb[0].mxu1 %v13374_v41  ;;  %888 = vmatmul.mubr.bf16.vlgmr.msra.gmra.mrb[0].mxu0 %v13374_v41  ;;  %v11481_v15 = vld [vmem:[#allocation7 + $0xa8] ss:$16 sps:$4 sm:$0xff]   ;;  %vm9767_vm6 = vcmask 74752  }
  0xba   :  { %982 = vmatpush1.bf16.msra.mxu0 %v11334_v42  ;;  %1045 = vmatpush1.bf16.msra.mxu1 %v11337_v43  ;;  %v11424_v42 = vld [vmem:[#allocation2 + $0x200] ss:$48 sps:$4 sm:$0xff]   ;;  %v11427_v43 = vld [vmem:[#allocation2 + $0x208] ss:$48 sps:$4 sm:$0xff]  }
  0xbb   :  { %983 = vmatprep.subr.bf16.mxu0 %v11342_v44  ;;  %1046 = vmatprep.subr.bf16.mxu1 %v11345_v45  ;;  %v11432_v44 = vld [vmem:[#allocation2 + $0x264] ss:$48 sps:$4 sm:$0xff]   ;;  %v11435_v45 = vld [vmem:[#allocation2 + $0x26c] ss:$48 sps:$4 sm:$0xff]  }
  0xbc   :  { %9920 = vmatprep.mubr.msk.bf16.mxu1 %vm808_vm0, %v13379_v46  ;;  %9916 = vmatprep.mubr.msk.bf16.mxu0 %vm808_vm0, %v13379_v46 }
  0xbe   :  { %984 = vmatpush1.bf16.msra.mxu0 %v11340_v47  ;;  %1047 = vmatpush1.bf16.msra.mxu1 %v11343_v48  ;;  %v11430_v47 = vld [vmem:[#allocation2 + $0x260] ss:$48 sps:$4 sm:$0xff]   ;;  %v11433_v48 = vld [vmem:[#allocation2 + $0x268] ss:$48 sps:$4 sm:$0xff]  }
  0xbf   :  { %985 = vmatprep.subr.bf16.mxu0 %v11348_v49  ;;  %1048 = vmatprep.subr.bf16.mxu1 %v11351_v50  ;;  %v11438_v49 = vld [vmem:[#allocation2 + $0x2c4] ss:$48 sps:$4 sm:$0xff]   ;;  %v11441_v50 = vld [vmem:[#allocation2 + $0x2cc] ss:$48 sps:$4 sm:$0xff]  }
  0xc1   :  { %961 = vmatmul.mubr.bf16.gmra.mrb[4].mxu1 %v13390_v53  ;;  %898 = vmatmul.mubr.bf16.gmra.mrb[4].mxu0 %v13390_v53 }
  0xc2   :  { %986 = vmatpush1.bf16.msra.mxu0 %v11346_v51  ;;  %1049 = vmatpush1.bf16.msra.mxu1 %v11349_v52  ;;  %v11436_v51 = vld [vmem:[#allocation2 + $0x2c0] ss:$48 sps:$4 sm:$0xff]   ;;  %v11439_v52 = vld [vmem:[#allocation2 + $0x2c8] ss:$48 sps:$4 sm:$0xff]  }
  0xc3   :  { %987 = vmatprep.subr.bf16.mxu0 %v11354_v54  ;;  %1050 = vmatprep.subr.bf16.mxu1 %v11357_v55  ;;  %v11442_v54 = vld [vmem:[#allocation2 + $0x324] ss:$48 sps:$4 sm:$0x3f]   ;;  %v11444_v55 = vld [vmem:[#allocation2 + $0x32c] ss:$48 sps:$4 sm:$0x3f]  }
  0xc4   :  { %9921 = vmatprep.mubr.msk.bf16.mxu1 %vm808_vm0, %v13395_v56  ;;  %9917 = vmatprep.mubr.msk.bf16.mxu0 %vm808_vm0, %v13395_v56 }
  0xc6   :  { %988 = vmatpush1.bf16.msra.mxu0 %v11352_v57  ;;  %1051 = vmatpush1.bf16.msra.mxu1 %v11355_v58  ;;  %v11446_v57 = vld [vmem:[#allocation2 + $0x320] ss:$48 sps:$4 sm:$0x3f]   ;;  %v11447_v58 = vld [vmem:[#allocation2 + $0x328] ss:$48 sps:$4 sm:$0x3f]  }
  0xc7   :  { %989 = vmatprep.subr.bf16.mxu0 %v11362_v59  ;;  %1052 = vmatprep.subr.bf16.mxu1 %v11365_v60  ;;  %v850_v59 = vsel %vm818_vm1, %v11447_v58, 0  ;;  %v11448_v60 = vld [vmem:[#allocation7] ss:$16 sps:$4 sm:$0xff]   ;;  %v11543_v58 = vld [vmem:[#allocation7 + $0x1ec] ss:$16 sps:$4 sm:$0xff]  }
  0xc9   :  { %971 = vmatmul.mubr.bf16.gmra.mrb[8].mxu1 %v13406_v61  ;;  %908 = vmatmul.mubr.bf16.gmra.mrb[8].mxu0 %v13406_v61 }
  0xca   :  { %990 = vmatpush1.bf16.msra.mxu0 %v11360_v62  ;;  %1053 = vmatpush1.bf16.msra.mxu1 %v11363_v63  ;;  %v11450_v62 = vld [vmem:[#allocation7 + $0x4] ss:$16 sps:$4 sm:$0xff]   ;;  %v11451_v63 = vld [vmem:[#allocation7 + $0x8] ss:$16 sps:$4 sm:$0xff]  }
  0xcb   :  { %991 = vmatprep.subr.bf16.mxu0 %v11369_v0  ;;  %1054 = vmatprep.subr.bf16.mxu1 %v11372_v1  ;;  %v11456_v0 = vld [vmem:[#allocation7 + $0x24] ss:$16 sps:$4 sm:$0xff]   ;;  %v11454_v1 = vld [vmem:[#allocation7 + $0x20] ss:$16 sps:$4 sm:$0xff]  }
  0xcc   :  { %9927 = vmatprep.mubr.msk.bf16.mxu1 %vm808_vm0, %v13361_v30  ;;  %9923 = vmatprep.mubr.msk.bf16.mxu0 %vm808_vm0, %v13361_v30 }
  0xce   :  { %992 = vmatpush1.bf16.msra.mxu0 %v11367_v2  ;;  %1055 = vmatpush1.bf16.msra.mxu1 %v11370_v3  ;;  %v11462_v2 = vld [vmem:[#allocation7 + $0x44] ss:$16 sps:$4 sm:$0xff]   ;;  %v11460_v3 = vld [vmem:[#allocation7 + $0x40] ss:$16 sps:$4 sm:$0xff]  }
  0xcf   :  { %993 = vmatprep.subr.bf16.mxu0 %v11377_v4  ;;  %1056 = vmatprep.subr.bf16.mxu1 %v11380_v5  ;;  %v11463_v4 = vld [vmem:[#allocation7 + $0x48] ss:$16 sps:$4 sm:$0xff]   ;;  %v11468_v5 = vld [vmem:[#allocation7 + $0x64] ss:$16 sps:$4 sm:$0xff]  }
  0xd2   :  { %994 = vmatpush1.bf16.msra.mxu0 %v11375_v6  ;;  %1057 = vmatpush1.bf16.msra.mxu1 %v11378_v7  ;;  %v11471_v6 = vld [vmem:[#allocation7 + $0x6c] ss:$16 sps:$4 sm:$0xff]   ;;  %v11469_v7 = vld [vmem:[#allocation7 + $0x68] ss:$16 sps:$4 sm:$0xff]  }
  0xd3   :  { %995 = vmatprep.subr.bf16.mxu0 %v11384_v8  ;;  %1058 = vmatprep.subr.bf16.mxu1 %v11387_v9  ;;  %v11474_v8 = vld [vmem:[#allocation7 + $0x84] ss:$16 sps:$4 sm:$0xff]   ;;  %v11477_v9 = vld [vmem:[#allocation7 + $0x8c] ss:$16 sps:$4 sm:$0xff]  }
  0xd6   :  { %996 = vmatpush1.bf16.msra.mxu0 %v11382_v10  ;;  %1059 = vmatpush1.bf16.msra.mxu1 %v11385_v13  ;;  %v11472_v10 = vld [vmem:[#allocation7 + $0x80] ss:$16 sps:$4 sm:$0xff]   ;;  %v11483_v13 = vld [vmem:[#allocation7 + $0xac] ss:$16 sps:$4 sm:$0xff]  }
  0xd7   :  { %9922 = vmatprep.subr.msk.bf16.mxu0 %vm818_vm1, %v11388_v11  ;;  %9926 = vmatprep.subr.msk.bf16.mxu1 %vm818_vm1, %v11390_v12  ;;  %v11475_v11 = vld [vmem:[#allocation7 + $0x88] ss:$16 sps:$4 sm:$0xff]   ;;  %v11480_v12 = vld [vmem:[#allocation7 + $0xa4] ss:$16 sps:$4 sm:$0xff]  }
  0xda   :  { %998 = vmatpush1.bf16.msra.mxu0 %v832_v17  ;;  %1061 = vmatpush1.bf16.msra.mxu1 %v838_v18  ;;  %v11489_v17 = vld [vmem:[#allocation7 + $0xcc] ss:$16 sps:$4 sm:$0xff]   ;;  %v11484_v18 = vld [vmem:[#allocation7 + $0xc0] ss:$16 sps:$4 sm:$0xff]  }
  0xdb   :  { %1107 = vmatprep.subr.bf16.mxu0 %v11396_v16  ;;  %1170 = vmatprep.subr.bf16.mxu1 %v11399_v19  ;;  %v11486_v16 = vld [vmem:[#allocation7 + $0xc4] ss:$16 sps:$4 sm:$0xff]   ;;  %v11487_v19 = vld [vmem:[#allocation7 + $0xc8] ss:$16 sps:$4 sm:$0xff]  }
  0xdd   :  { %1077 = vmatmul.mubr.bf16.vlgmr.msra.gmra.mrb[12].mxu1 %v13374_v41  ;;  %1014 = vmatmul.mubr.bf16.vlgmr.msra.gmra.mrb[12].mxu0 %v13374_v41 }
  0xde   :  { %1108 = vmatpush1.bf16.msra.mxu0 %v11394_v20  ;;  %1171 = vmatpush1.bf16.msra.mxu1 %v11397_v21  ;;  %v11492_v20 = vld [vmem:[#allocation7 + $0xe4] ss:$16 sps:$4 sm:$0xff]   ;;  %v11495_v21 = vld [vmem:[#allocation7 + $0xec] ss:$16 sps:$4 sm:$0xff]  }
  0xdf   :  { %1109 = vmatprep.subr.bf16.mxu0 %v11402_v22  ;;  %1172 = vmatprep.subr.bf16.mxu1 %v11405_v23  ;;  %v11490_v22 = vld [vmem:[#allocation7 + $0xe0] ss:$16 sps:$4 sm:$0xff]   ;;  %v11493_v23 = vld [vmem:[#allocation7 + $0xe8] ss:$16 sps:$4 sm:$0xff]  }
  0xe0   :  { %9928 = vmatprep.mubr.msk.bf16.mxu1 %vm808_vm0, %v13379_v46  ;;  %9924 = vmatprep.mubr.msk.bf16.mxu0 %vm808_vm0, %v13379_v46 }
  0xe2   :  { %1110 = vmatpush1.bf16.msra.mxu0 %v11400_v24  ;;  %1173 = vmatpush1.bf16.msra.mxu1 %v11403_v25  ;;  %v11498_v24 = vld [vmem:[#allocation7 + $0x104] ss:$16 sps:$4 sm:$0xff]   ;;  %v11501_v25 = vld [vmem:[#allocation7 + $0x10c] ss:$16 sps:$4 sm:$0xff]  }
  0xe3   :  { %1111 = vmatprep.subr.bf16.mxu0 %v11408_v26  ;;  %1174 = vmatprep.subr.bf16.mxu1 %v11411_v27  ;;  %v11496_v26 = vld [vmem:[#allocation7 + $0x100] ss:$16 sps:$4 sm:$0xff]   ;;  %v11499_v27 = vld [vmem:[#allocation7 + $0x108] ss:$16 sps:$4 sm:$0xff]  }
  0xe5   :  { %1087 = vmatmul.mubr.bf16.gmra.mrb[16].mxu1 %v13390_v53  ;;  %1024 = vmatmul.mubr.bf16.gmra.mrb[16].mxu0 %v13390_v53 }
  0xe6   :  { %1112 = vmatpush1.bf16.msra.mxu0 %v11406_v28  ;;  %1175 = vmatpush1.bf16.msra.mxu1 %v11409_v29  ;;  %v11504_v28 = vld [vmem:[#allocation7 + $0x124] ss:$16 sps:$4 sm:$0xff]   ;;  %v11507_v29 = vld [vmem:[#allocation7 + $0x12c] ss:$16 sps:$4 sm:$0xff]  }
  0xe7   :  { %1113 = vmatprep.subr.bf16.mxu0 %v11414_v31  ;;  %1176 = vmatprep.subr.bf16.mxu1 %v11417_v32  ;;  %v11502_v31 = vld [vmem:[#allocation7 + $0x120] ss:$16 sps:$4 sm:$0xff]   ;;  %v11505_v32 = vld [vmem:[#allocation7 + $0x128] ss:$16 sps:$4 sm:$0xff]  }
  0xe8   :  { %9929 = vmatprep.mubr.msk.bf16.mxu1 %vm808_vm0, %v13395_v56  ;;  %9925 = vmatprep.mubr.msk.bf16.mxu0 %vm808_vm0, %v13395_v56 }
  0xea   :  { %1114 = vmatpush1.bf16.msra.mxu0 %v11412_v33  ;;  %1177 = vmatpush1.bf16.msra.mxu1 %v11415_v34  ;;  %v11510_v33 = vld [vmem:[#allocation7 + $0x144] ss:$16 sps:$4 sm:$0xff]   ;;  %v11513_v34 = vld [vmem:[#allocation7 + $0x14c] ss:$16 sps:$4 sm:$0xff]  }
  0xeb   :  { %1115 = vmatprep.subr.bf16.mxu0 %v11420_v35  ;;  %1178 = vmatprep.subr.bf16.mxu1 %v11423_v36  ;;  %v11508_v35 = vld [vmem:[#allocation7 + $0x140] ss:$16 sps:$4 sm:$0xff]   ;;  %v11511_v36 = vld [vmem:[#allocation7 + $0x148] ss:$16 sps:$4 sm:$0xff]  }
  0xed   :  { %1097 = vmatmul.mubr.bf16.gmra.mrb[20].mxu1 %v13406_v61  ;;  %1034 = vmatmul.mubr.bf16.gmra.mrb[20].mxu0 %v13406_v61 }
  0xee   :  { %1116 = vmatpush1.bf16.msra.mxu0 %v11418_v37  ;;  %1179 = vmatpush1.bf16.msra.mxu1 %v11421_v38  ;;  %v11516_v37 = vld [vmem:[#allocation7 + $0x164] ss:$16 sps:$4 sm:$0xff]   ;;  %v11519_v38 = vld [vmem:[#allocation7 + $0x16c] ss:$16 sps:$4 sm:$0xff]  }
  0xef   :  { %1117 = vmatprep.subr.bf16.mxu0 %v11426_v39  ;;  %1180 = vmatprep.subr.bf16.mxu1 %v11429_v40  ;;  %v11514_v39 = vld [vmem:[#allocation7 + $0x160] ss:$16 sps:$4 sm:$0xff]   ;;  %v11517_v40 = vld [vmem:[#allocation7 + $0x168] ss:$16 sps:$4 sm:$0xff]  }
  0xf0   :  { %9931 = vmatprep.mubr.msk.bf16.mxu0 %vm808_vm0, %v13361_v30  ;;  %9935 = vmatprep.mubr.msk.bf16.mxu1 %vm808_vm0, %v13361_v30  ;;  %v844_v30 = vsel %vm818_vm1, %v11446_v57, 0  ;;  %v11540_v57 = vld [vmem:[#allocation7 + $0x1e4] ss:$16 sps:$4 sm:$0xff]  }
  0xf2   :  { %1118 = vmatpush1.bf16.msra.mxu0 %v11424_v42  ;;  %1181 = vmatpush1.bf16.msra.mxu1 %v11427_v43  ;;  %v11522_v42 = vld [vmem:[#allocation7 + $0x184] ss:$16 sps:$4 sm:$0xff]   ;;  %v11525_v43 = vld [vmem:[#allocation7 + $0x18c] ss:$16 sps:$4 sm:$0xff]  }
  0xf3   :  { %1119 = vmatprep.subr.bf16.mxu0 %v11432_v44  ;;  %1182 = vmatprep.subr.bf16.mxu1 %v11435_v45  ;;  %v11520_v44 = vld [vmem:[#allocation7 + $0x180] ss:$16 sps:$4 sm:$0xff]   ;;  %v11523_v45 = vld [vmem:[#allocation7 + $0x188] ss:$16 sps:$4 sm:$0xff]  }
  0xf6   :  { %1120 = vmatpush1.bf16.msra.mxu0 %v11430_v47  ;;  %1183 = vmatpush1.bf16.msra.mxu1 %v11433_v48  ;;  %v11528_v47 = vld [vmem:[#allocation7 + $0x1a4] ss:$16 sps:$4 sm:$0xff]   ;;  %v11531_v48 = vld [vmem:[#allocation7 + $0x1ac] ss:$16 sps:$4 sm:$0xff]  }
  0xf7   :  { %1121 = vmatprep.subr.bf16.mxu0 %v11438_v49  ;;  %1184 = vmatprep.subr.bf16.mxu1 %v11441_v50  ;;  %v11526_v49 = vld [vmem:[#allocation7 + $0x1a0] ss:$16 sps:$4 sm:$0xff]   ;;  %v11529_v50 = vld [vmem:[#allocation7 + $0x1a8] ss:$16 sps:$4 sm:$0xff]  }
  0xfa   :  { %1122 = vmatpush1.bf16.msra.mxu0 %v11436_v51  ;;  %1185 = vmatpush1.bf16.msra.mxu1 %v11439_v52  ;;  %v11534_v51 = vld [vmem:[#allocation7 + $0x1c4] ss:$16 sps:$4 sm:$0xff]   ;;  %v11537_v52 = vld [vmem:[#allocation7 + $0x1cc] ss:$16 sps:$4 sm:$0xff]  }
  0xfb   :  { %9930 = vmatprep.subr.msk.bf16.mxu0 %vm818_vm1, %v11442_v54  ;;  %9934 = vmatprep.subr.msk.bf16.mxu1 %vm818_vm1, %v11444_v55  ;;  %v11532_v54 = vld [vmem:[#allocation7 + $0x1c0] ss:$16 sps:$4 sm:$0xff]   ;;  %v11535_v55 = vld [vmem:[#allocation7 + $0x1c8] ss:$16 sps:$4 sm:$0xff]  }
  0xfe   :  { %1124 = vmatpush1.bf16.msra.mxu0 %v844_v30  ;;  %1187 = vmatpush1.bf16.msra.mxu1 %v850_v59  ;;  %v11538_v30 = vld [vmem:[#allocation7 + $0x1e0] ss:$16 sps:$4 sm:$0xff]   ;;  %v11541_v59 = vld [vmem:[#allocation7 + $0x1e8] ss:$16 sps:$4 sm:$0xff]  }
  0xff   :  { %7506 = vmatprep.subr.bf16.mxu0 %v11450_v62  ;;  %v11549_v62 = vld [vmem:[#allocation7 + $0x20c] ss:$16 sps:$4 sm:$0xff]  }
 0x101   :  { %1140 = vmatmul.mubr.bf16.vlgmr.msra.gmra.mrb[24].mxu0 %v13374_v41  ;;  %1203 = vmatmul.mubr.bf16.vlgmr.msra.gmra.mrb[24].mxu1 %v13374_v41  ;;  %v11453_v41 = vld [vmem:[#allocation7 + $0xc] ss:$16 sps:$4 sm:$0xff]  }
 0x102   :  { %9932 = vmatprep.mubr.msk.bf16.mxu0 %vm808_vm0, %v13379_v46  ;;  %9936 = vmatprep.mubr.msk.bf16.mxu1 %vm808_vm0, %v13379_v46  ;;  %v11459_v46 = vld [vmem:[#allocation7 + $0x2c] ss:$16 sps:$4 sm:$0xff]  }
 0x103   :  { %8151 = vmatprep.subr.bf16.mxu1 %v11453_v41  ;;  %7507 = vmatpush1.bf16.msra.mxu0 %v11448_v60  ;;  %v11546_v60 = vld [vmem:[#allocation7 + $0x204] ss:$16 sps:$4 sm:$0xff]  }
 0x104   :  { %8152 = vmatpush1.bf16.msra.mxu1 %v11451_v63  ;;  %7508 = vmatprep.subr.bf16.mxu0 %v11456_v0  ;;  %v1380_v63 = vlaneseq  ;;  %v13456_v0 = vld [vmem:[#allocation5] sm:$0x3f] }
 0x105   :  { %8153 = vmatprep.subr.bf16.mxu1 %v11459_v46 }
 0x106   :  { %v13454_v41 = vshrl.u32 %v1380_v63, 7 }
 0x107   :  { %7509 = vmatpush1.bf16.msra.mxu0 %v11454_v1 }
 0x108   :  { %7510 = vmatprep.subr.bf16.mxu0 %v11462_v2  ;;  %v1390_v46 = vsub.s32 2, %v13454_v41  ;;  %v1398_v1 = vsub.s32 4, %v13454_v41 }
 0x109   :  { %1150 = vmatmul.mubr.bf16.gmra.mrb[28].mxu0 %v13390_v53  ;;  %1213 = vmatmul.mubr.bf16.gmra.mrb[28].mxu1 %v13390_v53  ;;  %v11457_v53 = vld [vmem:[#allocation7 + $0x28] ss:$16 sps:$4 sm:$0xff]  }
 0x10a   :  { %9933 = vmatprep.mubr.msk.bf16.mxu0 %vm808_vm0, %v13395_v56  ;;  %9937 = vmatprep.mubr.msk.bf16.mxu1 %vm808_vm0, %v13395_v56  ;;  %v11465_v56 = vld [vmem:[#allocation7 + $0x4c] ss:$16 sps:$4 sm:$0xff]   ;;  %v13464_v2 = vrot.slane %v13456_v0, %v1398_v1 }
 0x10b   :  { %8154 = vmatpush1.bf16.msra.mxu1 %v11457_v53  ;;  %7511 = vmatpush1.bf16.msra.mxu0 %v11460_v3  ;;  %v13461_v53 = vrot.slane %v13456_v0, %v1390_v46 }
 0x10c   :  { %8155 = vmatprep.subr.bf16.mxu1 %v11465_v56  ;;  %7512 = vmatprep.subr.bf16.mxu0 %v11468_v5  ;;  %v1402_v56 = vsub.s32 5, %v13454_v41 }
 0x10e   :  { %v13468_v3 = vrot.slane %v13456_v0, %v1402_v56 }
 0x10f   :  { %8156 = vmatpush1.bf16.msra.mxu1 %v11463_v4 }
 0x110   :  { %8157 = vmatprep.subr.bf16.mxu1 %v11471_v6 }
 0x111   :  { %1160 = vmatmul.mubr.bf16.gmra.mrb[32].mxu0 %v13406_v61  ;;  %1223 = vmatmul.mubr.bf16.gmra.mrb[32].mxu1 %v13406_v61  ;;  %v11466_v61 = vld [vmem:[#allocation7 + $0x60] ss:$16 sps:$4 sm:$0xff]  }
 0x112   :  { %7513 = vmatpush1.bf16.msra.mxu0 %v11466_v61 }
 0x113   :  { %8158 = vmatpush1.bf16.msra.mxu1 %v11469_v7  ;;  %7514 = vmatprep.subr.bf16.mxu0 %v11474_v8 }
 0x114   :  { %8159 = vmatprep.subr.bf16.mxu1 %v11477_v9 }
 0x116   :  { %7515 = vmatpush1.bf16.msra.mxu0 %v11472_v10 }
 0x117   :  { %8160 = vmatpush1.bf16.msra.mxu1 %v11475_v11  ;;  %7516 = vmatprep.subr.bf16.mxu0 %v11480_v12 }
 0x118   :  { %8161 = vmatprep.subr.bf16.mxu1 %v11483_v13 }
 0x11a   :  { %7517 = vmatpush1.bf16.msra.mxu0 %v11478_v14 }
 0x11b   :  { %8162 = vmatpush1.bf16.msra.mxu1 %v11481_v15  ;;  %7518 = vmatprep.subr.bf16.mxu0 %v11486_v16 }
 0x11c   :  { %8163 = vmatprep.subr.bf16.mxu1 %v11489_v17 }
 0x11e   :  { %7519 = vmatpush1.bf16.msra.mxu0 %v11484_v18 }
 0x11f   :  { %8164 = vmatpush1.bf16.msra.mxu1 %v11487_v19  ;;  %7520 = vmatprep.subr.bf16.mxu0 %v11492_v20 }
 0x120   :  { %8165 = vmatprep.subr.bf16.mxu1 %v11495_v21 }
 0x122   :  { %7521 = vmatpush1.bf16.msra.mxu0 %v11490_v22 }
 0x123   :  { %8166 = vmatpush1.bf16.msra.mxu1 %v11493_v23  ;;  %7522 = vmatprep.subr.bf16.mxu0 %v11498_v24 }
 0x124   :  { %8167 = vmatprep.subr.bf16.mxu1 %v11501_v25 }
 0x126   :  { %7523 = vmatpush1.bf16.msra.mxu0 %v11496_v26 }
 0x127   :  { %8168 = vmatpush1.bf16.msra.mxu1 %v11499_v27  ;;  %7524 = vmatprep.subr.bf16.mxu0 %v11504_v28 }
 0x128   :  { %8169 = vmatprep.subr.bf16.mxu1 %v11507_v29 }
 0x12a   :  { %7525 = vmatpush1.bf16.msra.mxu0 %v11502_v31 }
 0x12b   :  { %8170 = vmatpush1.bf16.msra.mxu1 %v11505_v32  ;;  %7526 = vmatprep.subr.bf16.mxu0 %v11510_v33 }
 0x12c   :  { %8171 = vmatprep.subr.bf16.mxu1 %v11513_v34 }
 0x12e   :  { %7527 = vmatpush1.bf16.msra.mxu0 %v11508_v35 }
 0x12f   :  { %8172 = vmatpush1.bf16.msra.mxu1 %v11511_v36  ;;  %7528 = vmatprep.subr.bf16.mxu0 %v11516_v37 }
 0x130   :  { %8173 = vmatprep.subr.bf16.mxu1 %v11519_v38 }
 0x132   :  { %7529 = vmatpush1.bf16.msra.mxu0 %v11514_v39 }
 0x133   :  { %8174 = vmatpush1.bf16.msra.mxu1 %v11517_v40  ;;  %7530 = vmatprep.subr.bf16.mxu0 %v11522_v42  ;;  %v14025_v40 = vsub.s32 0, %v13454_v41 }
 0x134   :  { %8175 = vmatprep.subr.bf16.mxu1 %v11525_v43  ;;  %v14024_v43 = vsub.s32 1, %v13454_v41 }
 0x136   :  { %7531 = vmatpush1.bf16.msra.mxu0 %v11520_v44 }
 0x137   :  { %8176 = vmatpush1.bf16.msra.mxu1 %v11523_v45  ;;  %7532 = vmatprep.subr.bf16.mxu0 %v11528_v47 }
 0x138   :  { %8177 = vmatprep.subr.bf16.mxu1 %v11531_v48 }
 0x13a   :  { %7533 = vmatpush1.bf16.msra.mxu0 %v11526_v49 }
 0x13b   :  { %8178 = vmatpush1.bf16.msra.mxu1 %v11529_v50  ;;  %7534 = vmatprep.subr.bf16.mxu0 %v11534_v51 }
 0x13c   :  { %8179 = vmatprep.subr.bf16.mxu1 %v11537_v52 }
 0x13e   :  { %7535 = vmatpush1.bf16.msra.mxu0 %v11532_v54 }
 0x13f   :  { %8180 = vmatpush1.bf16.msra.mxu1 %v11535_v55  ;;  %7536 = vmatprep.subr.bf16.mxu0 %v11540_v57  ;;  %v1383_v55 = vrot.slane %v13456_v0, %v14025_v40 }
 0x140   :  { %8181 = vmatprep.subr.bf16.mxu1 %v11543_v58 }
 0x142   :  { %7537 = vmatpush1.bf16.msra.mxu0 %v11538_v30 }
 0x143   :  { %8182 = vmatpush1.bf16.msra.mxu1 %v11541_v59  ;;  %7549 = vmatprep.subr.bf16.mxu0 %v11546_v60 }
 0x144   :  { %8194 = vmatprep.subr.bf16.mxu1 %v11549_v62  ;;  %v1387_v62 = vrot.slane %v13456_v0, %v14024_v43 }
 0x18c   :  { %v13470_v4 = vpop.f32.mrb[0].mxu1  ;;  %v889_v5 = vpop.f32.mrb[0].mxu0 }
 0x18d   :  { %v13472_v6 = vpop.f32.mrb[1].mxu1  ;;  %v891_v61 = vpop.f32.mrb[1].mxu0 }
 0x18e   :  { %v13474_v7 = vpop.f32.mrb[2].mxu1  ;;  %v893_v8 = vpop.f32.mrb[2].mxu0 }
 0x18f   :  { %v13476_v9 = vpop.f32.mrb[3].mxu1  ;;  %v895_v10 = vpop.f32.mrb[3].mxu0 }
 0x194   :  { %v13478_v11 = vpop.f32.mrb[4].mxu1  ;;  %v899_v12 = vpop.f32.mrb[4].mxu0 }
 0x195   :  { %v13480_v13 = vpop.f32.mrb[5].mxu1  ;;  %v901_v14 = vpop.f32.mrb[5].mxu0 }
 0x196   :  { %v13482_v15 = vpop.f32.mrb[6].mxu1  ;;  %v13484_v16 = vpop.f32.mrb[6].mxu0 }
 0x197   :  { %v13486_v17 = vpop.f32.mrb[7].mxu1  ;;  %v13488_v18 = vpop.f32.mrb[7].mxu0 }
 0x19c   :  { %v13490_v19 = vpop.f32.mrb[8].mxu1  ;;  %v909_v20 = vpop.f32.mrb[8].mxu0 }
 0x19d   :  { %v13492_v21 = vpop.f32.mrb[9].mxu1  ;;  %v911_v22 = vpop.f32.mrb[9].mxu0 }
 0x19e   :  { %v13494_v23 = vpop.f32.mrb[10].mxu1  ;;  %v13496_v24 = vpop.f32.mrb[10].mxu0 }
 0x19f   :  { %v13498_v25 = vpop.f32.mrb[11].mxu1  ;;  %v13500_v26 = vpop.f32.mrb[11].mxu0 }
 0x1a0   :  { %14028 = vst [vmem:[#allocation23_spill] sm:$0xff] %v13498_v25  ;;  %v11567_v25 = vld [vmem:[#allocation7 + $0x26c] ss:$16 sps:$4 sm:$0xff]  }
 0x1b0   :  { %v1078_v27 = vpop.f32.mrb[12].mxu1  ;;  %v13502_v28 = vpop.f32.mrb[12].mxu0 }
 0x1b1   :  { %v1233_v29 = vmax.f32 %v889_v5, %v1078_v27  ;;  %v1080_v31 = vpop.f32.mrb[13].mxu1  ;;  %v13504_v32 = vpop.f32.mrb[13].mxu0 }
 0x1b2   :  { %v1234_v33 = vmax.f32 %v891_v61, %v1080_v31  ;;  %v1082_v34 = vpop.f32.mrb[14].mxu1  ;;  %v13506_v35 = vpop.f32.mrb[14].mxu0 }
 0x1b3   :  { %v1239_v36 = vmax.f32 %v893_v8, %v1082_v34  ;;  %v1084_v37 = vpop.f32.mrb[15].mxu1  ;;  %v13508_v38 = vpop.f32.mrb[15].mxu0 }
 0x1b4   :  { %v1240_v39 = vmax.f32 %v895_v10, %v1084_v37 }
 0x1b5   :  { %v1294_v49 = vrot.slane %v1239_v36, 4 }
 0x1b6   :  { %v1297_v59 = vrot.slane %v1240_v39, 4 }
 0x1b8   :  { %v1088_v42 = vpop.f32.mrb[16].mxu1  ;;  %v13512_v44 = vpop.f32.mrb[16].mxu0 }
 0x1b9   :  { %v1245_v45 = vmax.f32 %v899_v12, %v1088_v42  ;;  %v1090_v47 = vpop.f32.mrb[17].mxu1  ;;  %v13514_v48 = vpop.f32.mrb[17].mxu0 }
 0x1ba   :  { %v1246_v50 = vmax.f32 %v901_v14, %v1090_v47  ;;  %v1092_v51 = vpop.f32.mrb[18].mxu1  ;;  %v13516_v52 = vpop.f32.mrb[18].mxu0 }
 0x1bb   :  { %v1295_v54 = vrot.slane %v1245_v45, 4  ;;  %v1251_v57 = vmax.f32 %v13484_v16, %v1092_v51  ;;  %v1094_v58 = vpop.f32.mrb[19].mxu1  ;;  %v13522_v30 = vpop.f32.mrb[19].mxu0 }
 0x1bc   :  { %v1298_v60 = vrot.slane %v1246_v50, 4  ;;  %v1252_v63 = vmax.f32 %v13488_v18, %v1094_v58 }
 0x1bd   :  { %v1296_v46 = vsel %vm1293_vm2, %v1294_v49, %v1295_v54  ;;  %v1360_v1 = vmax.f32 %v1239_v36, %v1295_v54 }
 0x1be   :  { %v1354_v56 = vmax.f32 %v1233_v29, %v1296_v46  ;;  %v1299_v5 = vsel %vm1293_vm2, %v1297_v59, %v1298_v60  ;;  %v1361_v61 = vmax.f32 %v1240_v39, %v1298_v60 }
 0x1bf   :  { %v1416_v8 = vadd.f32 %v1383_v55, %v1360_v1  ;;  %v1355_v10 = vmax.f32 %v1234_v33, %v1299_v5 }
 0x1c0   :  { %v1410_v12 = vadd.f32 %v1383_v55, %v1354_v56  ;;  %v1417_v14 = vadd.f32 %v1387_v62, %v1361_v61  ;;  %v1098_v16 = vpop.f32.mrb[20].mxu1  ;;  %v13530_v27 = vpop.f32.mrb[20].mxu0 }
 0x1c1   :  { %v1440_v31 = vmax.f32 %v1416_v8, 0.0  ;;  %v1257_v34 = vmax.f32 %v909_v20, %v1098_v16  ;;  %v1100_v37 = vpop.f32.mrb[21].mxu1  ;;  %v13532_v42 = vpop.f32.mrb[21].mxu0  ;;  %v1411_v18 = vadd.f32 %v1387_v62, %v1355_v10 }
 0x1c2   :  { %v1434_v45 = vmax.f32 %v1410_v12, 0.0  ;;  %v1441_v47 = vmax.f32 %v1417_v14, 0.0  ;;  %v1258_v36 = vmax.f32 %v911_v22, %v1100_v37  ;;  %v1102_v29 = vpop.f32.mrb[22].mxu1  ;;  %v13534_v49 = vpop.f32.mrb[22].mxu0 }
 0x1c3   :  { %14029 = vst [vmem:[#allocation24_spill] sm:$0xff] %v13534_v49  ;;  %v1263_v39 = vmax.f32 %v13496_v24, %v1102_v29  ;;  %v1104_v33 = vpop.f32.mrb[23].mxu1  ;;  %v1435_v50 = vmax.f32 %v1411_v18, 0.0  ;;  %v13537_v51 = vpop.f32.mrb[23].mxu0  ;;  %v1312_v58 = vrot.slane %v1257_v34, 4 }
 0x1c4   :  { %14030 = vst [vmem:[#allocation25_spill] sm:$0xff] %v13537_v51  ;;  %v13539_v54 = vpack.c.bf16 %v1440_v31, %v1434_v45  ;;  %v1264_v20 = vmax.f32 %v13500_v26, %v1104_v33  ;;  %v1315_v46 = vrot.slane %v1258_v36, 4  ;;  %v11547_v33 = vld [vmem:[#allocation7 + $0x208] ss:$16 sps:$4 sm:$0xff]   ;;  %v11561_v51 = vld [vmem:[#allocation7 + $0x24c] ss:$16 sps:$4 sm:$0xff]  }
 0x1c5   :  { %v1313_v59 = vrot.slane %v1263_v39, 4  ;;  %v13542_v60 = vpack.c.bf16 %v1441_v47, %v1435_v50  ;;  %v11544_v39 = vld [vmem:[#allocation7 + $0x200] ss:$16 sps:$4 sm:$0xff]  }
 0x1c6   :  { %v1316_v1 = vrot.slane %v1264_v20, 4  ;;  %v1473_v14 = vshll.u32 %v13539_v54, 16 }
 0x1c7   :  { %v1314_v22 = vsel %vm1293_vm2, %v1312_v58, %v1313_v59  ;;  %v1372_v56 = vmax.f32 %v1257_v34, %v1313_v59  ;;  %v1480_v12 = vshll.u32 %v13542_v60, 16  ;;  %v1478_v31 = vshrl.u32 %v13542_v60, 16  ;;  %v11552_v59 = vld [vmem:[#allocation7 + $0x224] ss:$16 sps:$4 sm:$0xff]  }
 0x1c8   :  { %v1366_v5 = vmax.f32 %v1251_v57, %v1314_v22  ;;  %v1317_v24 = vsel %vm1293_vm2, %v1315_v46, %v1316_v1  ;;  %v1373_v61 = vmax.f32 %v1258_v36, %v1316_v1  ;;  %v1471_v34 = vshrl.u32 %v13539_v54, 16  ;;  %v11555_v46 = vld [vmem:[#allocation7 + $0x22c] ss:$16 sps:$4 sm:$0xff]  }
 0x1c9   :  { %v1428_v8 = vadd.f32 %v1383_v55, %v1372_v56  ;;  %v1367_v10 = vmax.f32 %v1252_v63, %v1317_v24  ;;  %v1482_v36 = vrot.slane %v1480_v12, 1  ;;  %v1475_v20 = vrot.slane %v1473_v14, 1 }
 0x1ca   :  { %v1422_v26 = vadd.f32 %v1383_v55, %v1366_v5  ;;  %v1429_v16 = vadd.f32 %v1387_v62, %v1373_v61  ;;  %v1567_v55 = vrot.slane %v13542_v60, 1  ;;  %v13553_v1 = vrot.slane %v1478_v31, 1 }
 0x1cb   :  { %v1452_v37 = vmax.f32 %v1428_v8, 0.0  ;;  %v1423_v18 = vadd.f32 %v1387_v62, %v1367_v10  ;;  %v1566_v56 = vrot.slane %v13539_v54, 1  ;;  %v13558_v5 = vrot.slane %v1480_v12, 2 }
 0x1cc   :  { %v1446_v47 = vmax.f32 %v1422_v26, 0.0  ;;  %v1453_v29 = vmax.f32 %v1429_v16, 0.0  ;;  %v13562_v8 = vrot.slane %v1471_v34, 1 }
 0x1cd   :  { %v1447_v57 = vmax.f32 %v1423_v18, 0.0  ;;  %v13572_v18 = vrot.slane %v1473_v14, 2 }
 0x1ce   :  { %v13550_v63 = vpack.c.bf16 %v1452_v37, %v1446_v47  ;;  %v11008_v58 = vpack.c.bf16 %v1446_v47, %v1434_v45  ;;  %v11550_v47 = vld [vmem:[#allocation7 + $0x220] ss:$16 sps:$4 sm:$0xff]  }
 0x1cf   :  { %v13555_v22 = vpack.c.bf16 %v1453_v29, %v1447_v57  ;;  %v11009_v62 = vpack.c.bf16 %v1447_v57, %v1435_v50  ;;  %v11553_v29 = vld [vmem:[#allocation7 + $0x228] ss:$16 sps:$4 sm:$0xff]   ;;  %v1483_v57 = vor.u32 %v1482_v36, %v1478_v31  ;;  %v1580_v14 = vor.u32 %v13572_v18, %v13562_v8  ;;  %v11564_v18 = vld [vmem:[#allocation7 + $0x264] ss:$16 sps:$4 sm:$0xff]  }
 0x1d0   :  { %v1515_v24 = vshll.u32 %v13550_v63, 16  ;;  %v1572_v61 = vrot.slane %v13550_v63, 1  ;;  %v1513_v10 = vshrl.u32 %v13550_v63, 16 }
 0x1d1   :  { %7538 = vmatprep.mubr.bf16.mxu0 %v11009_v62  ;;  %8183 = vmatprep.mubr.bf16.mxu1 %v11009_v62  ;;  %v1522_v45 = vshll.u32 %v13555_v22, 16  ;;  %v1573_v26 = vrot.slane %v13555_v22, 1  ;;  %v1520_v12 = vshrl.u32 %v13555_v22, 16 }
 0x1d2   :  { %7539 = vmatmul.mubr.bf16.vlgmr.msra.gmra.mrb[36].mxu0 %v11008_v58  ;;  %8184 = vmatmul.mubr.bf16.vlgmr.msra.gmra.mrb[36].mxu1 %v11008_v58  ;;  %v1517_v16 = vrot.slane %v1515_v24, 1  ;;  %v13570_v37 = vcombine.low %v1566_v56, %v1572_v61  ;;  %v11558_v58 = vld [vmem:[#allocation7 + $0x244] ss:$16 sps:$4 sm:$0xff]   ;;  %v1476_v56 = vor.u32 %v1475_v20, %v1471_v34  ;;  %v1394_v34 = vsub.s32 3, %v13454_v41 }
 0x1d3   :  { %7550 = vmatpush1.bf16.msra.mxu0 %v11544_v39  ;;  %8195 = vmatpush1.bf16.msra.mxu1 %v11547_v33  ;;  %v1524_v62 = vrot.slane %v1522_v45, 1  ;;  %v13574_v43 = vcombine.low %v1567_v55, %v1573_v26  ;;  %v11556_v55 = vld [vmem:[#allocation7 + $0x240] ss:$16 sps:$4 sm:$0xff]   ;;  %v1596_v26 = vrot.slane %v1513_v10, 1  ;;  %v1599_v31 = vrot.slane %v1520_v12, 1 }
 0x1d4   :  { %14031 = vst [vmem:[#allocation26_spill] sm:$0xff] %v13570_v37  ;;  %v13576_v40 = vpop.f32.mrb[24].mxu0  ;;  %v13578_v50 = vpop.f32.mrb[24].mxu1  ;;  %7551 = vmatprep.subr.bf16.mxu0 %v11552_v59  ;;  %8196 = vmatprep.subr.bf16.mxu1 %v11555_v46  ;;  %v1518_v61 = vor.u32 %v1517_v16, %v1513_v10  ;;  %v11559_v59 = vld [vmem:[#allocation7 + $0x248] ss:$16 sps:$4 sm:$0xff]  }
 0x1d5   :  { %14032 = vst [vmem:[#allocation27_spill] sm:$0xff] %v13574_v43  ;;  %v13586_v33 = vpop.f32.mrb[25].mxu0  ;;  %v13588_v36 = vpop.f32.mrb[25].mxu1  ;;  %v1525_v46 = vor.u32 %v1524_v62, %v1520_v12 }
 0x1d6   :  { %v1145_v8 = vpop.f32.mrb[26].mxu0  ;;  %v1208_v16 = vpop.f32.mrb[26].mxu1  ;;  %v13594_v39 = vcombine.low %v1476_v56, %v1518_v61  ;;  %v11562_v56 = vld [vmem:[#allocation7 + $0x260] ss:$16 sps:$4 sm:$0xff]  }
 0x1d7   :  { %v13597_v37 = vmax.f32 %v13474_v7, %v1145_v8  ;;  %v13600_v43 = vmax.f32 %v13506_v35, %v1208_v16  ;;  %7552 = vmatpush1.bf16.msra.mxu0 %v11550_v47  ;;  %8197 = vmatpush1.bf16.msra.mxu1 %v11553_v29  ;;  %v1147_v10 = vpop.f32.mrb[27].mxu0  ;;  %v1210_v62 = vpop.f32.mrb[27].mxu1  ;;  %v13603_v20 = vcombine.low %v1483_v57, %v1525_v46  ;;  %v1600_v7 = vrot.slane %v1522_v45, 2  ;;  %v11565_v47 = vld [vmem:[#allocation7 + $0x268] ss:$16 sps:$4 sm:$0xff]  }
 0x1d8   :  { %v13606_v49 = vmax.f32 %v13476_v9, %v1147_v10  ;;  %v13609_v12 = vmax.f32 %v13508_v38, %v1210_v62  ;;  %7553 = vmatprep.subr.bf16.mxu0 %v11558_v58  ;;  %8198 = vmatprep.subr.bf16.mxu1 %v11561_v51  ;;  %v1597_v35 = vrot.slane %v1515_v24, 2  ;;  %v11570_v8 = vld [vmem:[#allocation7 + $0x284] ss:$16 sps:$4 sm:$0xff]   ;;  %v11573_v16 = vld [vmem:[#allocation7 + $0x28c] ss:$16 sps:$4 sm:$0xff]   ;;  %v1615_v9 = vrot.slane %v13542_v60, 2 }
 0x1d9   :  { %v1300_v29 = vrot.slane %v13597_v37, 4  ;;  %v1306_v61 = vrot.slane %v13600_v43, 4  ;;  %v1601_v57 = vor.u32 %v1600_v7, %v1599_v31  ;;  %v1621_v38 = vrot.slane %v13555_v22, 2  ;;  %v11571_v62 = vld [vmem:[#allocation7 + $0x288] ss:$16 sps:$4 sm:$0xff]  }
 0x1da   :  { %v1598_v46 = vor.u32 %v1597_v35, %v1596_v26  ;;  %v1614_v51 = vrot.slane %v13539_v54, 2  ;;  %v13617_v58 = vrot.slane %v13456_v0, %v1394_v34  ;;  %v14033_v10 = vor.u32 %v13558_v5, %v13553_v1  ;;  %v11568_v34 = vld [vmem:[#allocation7 + $0x280] ss:$16 sps:$4 sm:$0xff]  }
 0x1db   :  { %7554 = vmatpush1.bf16.msra.mxu0 %v11556_v55  ;;  %8199 = vmatpush1.bf16.msra.mxu1 %v11559_v59  ;;  %v1620_v60 = vrot.slane %v13550_v63, 2  ;;  %v1303_v22 = vrot.slane %v13606_v49, 4 }
 0x1dc   :  { %v1151_v45 = vpop.f32.mrb[28].mxu0  ;;  %v1214_v24 = vpop.f32.mrb[28].mxu1  ;;  %7555 = vmatprep.subr.bf16.mxu0 %v11564_v18  ;;  %8200 = vmatprep.subr.bf16.mxu1 %v11567_v25  ;;  %v13622_v31 = vcombine.low %v14033_v10, %v1601_v57  ;;  %v13624_v55 = vcombine.low %v1580_v14, %v1598_v46  ;;  %v13630_v18 = vcombine.low %v1615_v9, %v1621_v38  ;;  %v1309_v25 = vrot.slane %v13609_v12, 4  ;;  %v11574_v10 = vld [vmem:[#allocation7 + $0x2a0] ss:$16 sps:$4 sm:$0xff]  }
 0x1dd   :  { %v1247_v54 = vmax.f32 %v13478_v11, %v1151_v45  ;;  %v1249_v59 = vmax.f32 %v13512_v44, %v1214_v24  ;;  %v1153_v26 = vpop.f32.mrb[29].mxu0  ;;  %v1216_v0 = vpop.f32.mrb[29].mxu1  ;;  %v13639_v7 = vcombine.low %v1614_v51, %v1620_v60  ;;  %v11576_v60 = vld [vmem:[#allocation7 + $0x2a4] ss:$16 sps:$4 sm:$0xff]  }
 0x1de   :  { %v1248_v1 = vmax.f32 %v13480_v13, %v1153_v26  ;;  %v1250_v5 = vmax.f32 %v13514_v48, %v1216_v0  ;;  %v13635_v14 = vpop.f32.mrb[30].mxu0  ;;  %v13637_v63 = vpop.f32.mrb[30].mxu1  ;;  %v14035_v0 = vmax.f32 %v13502_v28, %v13578_v50  ;;  %v14037_v50 = vmax.f32 %v13504_v32, %v13588_v36 }
 0x1df   :  { %v1301_v11 = vrot.slane %v1247_v54, 4  ;;  %v1307_v44 = vrot.slane %v1249_v59, 4  ;;  %v1253_v35 = vmax.f32 %v13482_v15, %v13635_v14  ;;  %7556 = vmatpush1.bf16.msra.mxu0 %v11562_v56  ;;  %8201 = vmatpush1.bf16.msra.mxu1 %v11565_v47  ;;  %v13643_v57 = vpop.f32.mrb[31].mxu0  ;;  %v1255_v13 = vmax.f32 %v13516_v52, %v13637_v63  ;;  %v13647_v48 = vpop.f32.mrb[31].mxu1  ;;  %v11579_v54 = vld [vmem:[#allocation7 + $0x2ac] ss:$16 sps:$4 sm:$0xff]  }
 0x1e0   :  { %v1304_v46 = vrot.slane %v1248_v1, 4  ;;  %v1310_v9 = vrot.slane %v1250_v5, 4  ;;  %v1254_v38 = vmax.f32 %v13486_v17, %v13643_v57  ;;  %v1256_v51 = vmax.f32 %v13522_v30, %v13647_v48  ;;  %7557 = vmatprep.subr.bf16.mxu0 %v11570_v8  ;;  %8202 = vmatprep.subr.bf16.mxu1 %v11573_v16  ;;  %v11582_v1 = vld [vmem:[#allocation7 + $0x2c4] ss:$16 sps:$4 sm:$0xff]   ;;  %v11603_v57 = vld [vmem:[#allocation7 + $0x32c] ss:$16 sps:$4 sm:$0xff]  }
 0x1e1   :  { %v1302_v56 = vsel %vm1293_vm2, %v1300_v29, %v1301_v11  ;;  %v1362_v47 = vmax.f32 %v13597_v37, %v1301_v11  ;;  %v1308_v45 = vsel %vm1293_vm2, %v1306_v61, %v1307_v44  ;;  %v1364_v24 = vmax.f32 %v13600_v43, %v1307_v44  ;;  %v11577_v37 = vld [vmem:[#allocation7 + $0x2a8] ss:$16 sps:$4 sm:$0xff]   ;;  %v11600_v15 = vld [vmem:[#allocation7 + $0x324] ss:$16 sps:$4 sm:$0xff]  }
 0x1e2   :  { %v14034_v59 = vmax.f32 %v13470_v4, %v13576_v40  ;;  %v1358_v8 = vmax.f32 %v14035_v0, %v1308_v45  ;;  %v1305_v16 = vsel %vm1293_vm2, %v1303_v22, %v1304_v46  ;;  %v1363_v29 = vmax.f32 %v13606_v49, %v1304_v46  ;;  %v11585_v45 = vld [vmem:[#allocation7 + $0x2cc] ss:$16 sps:$4 sm:$0xff]  }
 0x1e3   :  { %v1418_v61 = vadd.f32 %v13461_v53, %v1362_v47  ;;  %v1420_v43 = vadd.f32 %v13464_v2, %v1364_v24  ;;  %v14036_v5 = vmax.f32 %v13472_v6, %v13586_v33  ;;  %v1311_v4 = vsel %vm1293_vm2, %v1309_v25, %v1310_v9  ;;  %7558 = vmatpush1.bf16.msra.mxu0 %v11568_v34 }
 0x1e4   :  { %v1356_v26 = vmax.f32 %v14034_v59, %v1302_v56  ;;  %v13675_v40 = vadd.f32 %v13464_v2, %v1358_v8  ;;  %v13678_v49 = vadd.f32 %v13617_v58, %v1363_v29  ;;  %v1359_v22 = vmax.f32 %v14037_v50, %v1311_v4  ;;  %8203 = vmatpush1.bf16.msra.mxu1 %v11571_v62  ;;  %v1161_v44 = vpop.f32.mrb[32].mxu0  ;;  %v1224_v6 = vpop.f32.mrb[32].mxu1  ;;  %v11591_v50 = vld [vmem:[#allocation7 + $0x2ec] ss:$16 sps:$4 sm:$0xff]  }
 0x1e5   :  { %v1357_v11 = vmax.f32 %v14036_v5, %v1305_v16  ;;  %v1442_v33 = vmax.f32 %v1418_v61, 0.0  ;;  %v1444_v46 = vmax.f32 %v1420_v43, 0.0  ;;  %v1365_v34 = vmax.f32 %v13609_v12, %v1310_v9  ;;  %v1163_v56 = vpop.f32.mrb[33].mxu0  ;;  %v1226_v47 = vpop.f32.mrb[33].mxu1  ;;  %7559 = vmatprep.subr.bf16.mxu0 %v11576_v60  ;;  %8204 = vmatprep.subr.bf16.mxu1 %v11579_v54  ;;  %v11580_v54 = vld [vmem:[#allocation7 + $0x2c0] ss:$16 sps:$4 sm:$0xff]  }
 0x1e6   :  { %v13672_v28 = vadd.f32 %v13461_v53, %v1356_v26  ;;  %v1259_v25 = vmax.f32 %v13490_v19, %v1161_v44  ;;  %v1438_v59 = vmax.f32 %v13675_v40, 0.0  ;;  %v1261_v32 = vmax.f32 %v13530_v27, %v1224_v6  ;;  %v1165_v36 = vpop.f32.mrb[34].mxu0  ;;  %v1228_v62 = vpop.f32.mrb[34].mxu1  ;;  %v14038_v5 = vld [vmem:[#allocation24_spill] sm:$0xff]  ;;  %v14039_v6 = vld [vmem:[#allocation23_spill] sm:$0xff] }
 0x1e7   :  { %v1443_v26 = vmax.f32 %v13678_v49, 0.0  ;;  %v13690_v0 = vadd.f32 %v13468_v3, %v1365_v34  ;;  %v1260_v19 = vmax.f32 %v13492_v21, %v1163_v56  ;;  %v13694_v12 = vmax.f32 %v13532_v42, %v1226_v47  ;;  %7560 = vmatpush1.bf16.msra.mxu0 %v11574_v10  ;;  %v1167_v9 = vpop.f32.mrb[35].mxu0  ;;  %v1230_v60 = vpop.f32.mrb[35].mxu1  ;;  %v11583_v21 = vld [vmem:[#allocation7 + $0x2c8] ss:$16 sps:$4 sm:$0xff]  }
 0x1e8   :  { %v1436_v24 = vmax.f32 %v13672_v28, 0.0  ;;  %v13702_v27 = vpack.c.bf16 %v1444_v46, %v1438_v59  ;;  %v1318_v16 = vrot.slane %v1259_v25, 4  ;;  %v1265_v29 = vmax.f32 %v13494_v23, %v1165_v36  ;;  %8205 = vmatpush1.bf16.msra.mxu1 %v11577_v37  ;;  %7561 = vmatprep.subr.bf16.mxu0 %v11582_v1  ;;  %v11588_v42 = vld [vmem:[#allocation7 + $0x2e4] ss:$16 sps:$4 sm:$0xff]   ;;  %v14040_v46 = vld [vmem:[#allocation25_spill] sm:$0xff] }
 0x1e9   :  { %v1324_v61 = vrot.slane %v1261_v32, 4  ;;  %v1321_v43 = vrot.slane %v1260_v19, 4  ;;  %v1267_v4 = vmax.f32 %v14038_v5, %v1228_v62  ;;  %8206 = vmatprep.subr.bf16.mxu1 %v11585_v45  ;;  %v1268_v34 = vmax.f32 %v14040_v46, %v1230_v60  ;;  %v11586_v56 = vld [vmem:[#allocation7 + $0x2e0] ss:$16 sps:$4 sm:$0xff]   ;;  %v11589_v47 = vld [vmem:[#allocation7 + $0x2e8] ss:$16 sps:$4 sm:$0xff]  }
 0x1ea   :  { %v13698_v8 = vpack.c.bf16 %v1442_v33, %v1436_v24  ;;  %v1319_v44 = vrot.slane %v1265_v29, 4  ;;  %v1266_v33 = vmax.f32 %v14039_v6, %v1167_v9  ;;  %v13710_v23 = vadd.f32 %v13617_v58, %v1357_v11  ;;  %v11594_v36 = vld [vmem:[#allocation7 + $0x304] ss:$16 sps:$4 sm:$0xff]   ;;  %v11609_v28 = vld [vmem:[#allocation7 + $0x34c] ss:$16 sps:$4 sm:$0xff]  }
 0x1eb   :  { %v1327_v37 = vrot.slane %v13694_v12, 4  ;;  %v1325_v1 = vrot.slane %v1267_v4, 4  ;;  %7562 = vmatpush1.bf16.msra.mxu0 %v11580_v54  ;;  %v13714_v10 = vadd.f32 %v13468_v3, %v1359_v22  ;;  %v1328_v60 = vrot.slane %v1268_v34, 4  ;;  %v11592_v4 = vld [vmem:[#allocation7 + $0x300] ss:$16 sps:$4 sm:$0xff]  }
 0x1ec   :  { %v1487_v45 = vshll.u32 %v13698_v8, 16  ;;  %v1320_v62 = vsel %vm1293_vm2, %v1318_v16, %v1319_v44  ;;  %v1374_v9 = vmax.f32 %v1259_v25, %v1319_v44  ;;  %v1322_v29 = vrot.slane %v1266_v33, 4  ;;  %8207 = vmatpush1.bf16.msra.mxu1 %v11583_v21  ;;  %7563 = vmatprep.subr.bf16.mxu0 %v11588_v42  ;;  %v11597_v22 = vld [vmem:[#allocation7 + $0x30c] ss:$16 sps:$4 sm:$0xff]   ;;  %v11595_v42 = vld [vmem:[#allocation7 + $0x308] ss:$16 sps:$4 sm:$0xff]  }
 0x1ed   :  { %v1368_v11 = vmax.f32 %v1253_v35, %v1320_v62  ;;  %v1326_v5 = vsel %vm1293_vm2, %v1324_v61, %v1325_v1  ;;  %v1376_v54 = vmax.f32 %v1261_v32, %v1325_v1  ;;  %8208 = vmatprep.subr.bf16.mxu1 %v11591_v50  ;;  %v1437_v6 = vmax.f32 %v13710_v23, 0.0  ;;  %v11598_v33 = vld [vmem:[#allocation7 + $0x320] ss:$16 sps:$4 sm:$0xff]   ;;  %v11601_v34 = vld [vmem:[#allocation7 + $0x328] ss:$16 sps:$4 sm:$0xff]  }
 0x1ee   :  { %v1430_v46 = vadd.f32 %v13461_v53, %v1374_v9  ;;  %v1370_v25 = vmax.f32 %v1255_v13, %v1326_v5  ;;  %v1323_v16 = vsel %vm1293_vm2, %v1321_v43, %v1322_v29  ;;  %v1375_v21 = vmax.f32 %v1260_v19, %v1322_v29  ;;  %v11606_v1 = vld [vmem:[#allocation7 + $0x344] ss:$16 sps:$4 sm:$0xff]  }
 0x1ef   :  { %v1424_v14 = vadd.f32 %v13461_v53, %v1368_v11  ;;  %v1432_v35 = vadd.f32 %v13464_v2, %v1376_v54  ;;  %v1369_v32 = vmax.f32 %v1254_v38, %v1323_v16  ;;  %v1329_v61 = vsel %vm1293_vm2, %v1327_v37, %v1328_v60  ;;  %7564 = vmatpush1.bf16.msra.mxu0 %v11586_v56  ;;  %v11612_v40 = vld [vmem:[#allocation7 + $0x364] ss:$16 sps:$4 sm:$0xff]   ;;  %v11615_v54 = vld [vmem:[#allocation7 + $0x36c] ss:$16 sps:$4 sm:$0xff]  }
 0x1f0   :  { %v1454_v50 = vmax.f32 %v1430_v46, 0.0  ;;  %v1426_v52 = vadd.f32 %v13464_v2, %v1370_v25  ;;  %v1431_v63 = vadd.f32 %v13617_v58, %v1375_v21  ;;  %v1371_v13 = vmax.f32 %v1256_v51, %v1329_v61  ;;  %8209 = vmatpush1.bf16.msra.mxu1 %v11589_v47  ;;  %7565 = vmatprep.subr.bf16.mxu0 %v11594_v36  ;;  %v11607_v36 = vld [vmem:[#allocation7 + $0x348] ss:$16 sps:$4 sm:$0xff]   ;;  %v11610_v46 = vld [vmem:[#allocation7 + $0x360] ss:$16 sps:$4 sm:$0xff]  }
 0x1f1   :  { %v1448_v53 = vmax.f32 %v1424_v14, 0.0  ;;  %v1456_v19 = vmax.f32 %v1432_v35, 0.0  ;;  %v1377_v43 = vmax.f32 %v13694_v12, %v1328_v60  ;;  %8210 = vmatprep.subr.bf16.mxu1 %v11597_v22  ;;  %v1425_v17 = vadd.f32 %v13617_v58, %v1369_v32 }
 0x1f2   :  { %v1450_v38 = vmax.f32 %v1426_v52, 0.0  ;;  %v1455_v44 = vmax.f32 %v1431_v63, 0.0  ;;  %v13743_v2 = vpack.c.bf16 %v1443_v26, %v1437_v6  ;;  %v1427_v30 = vadd.f32 %v13468_v3, %v1371_v13  ;;  %v11618_v13 = vld [vmem:[#allocation7 + $0x384] ss:$16 sps:$4 sm:$0xff]  }
 0x1f3   :  { %v13746_v48 = vpack.c.bf16 %v1454_v50, %v1448_v53  ;;  %v1433_v51 = vadd.f32 %v13468_v3, %v1377_v43  ;;  %7566 = vmatpush1.bf16.msra.mxu0 %v11592_v4  ;;  %v1449_v12 = vmax.f32 %v1425_v17, 0.0  ;;  %v13751_v58 = vpack.c.bf16 %v1448_v53, %v1436_v24  ;;  %v11604_v24 = vld [vmem:[#allocation7 + $0x340] ss:$16 sps:$4 sm:$0xff]   ;;  %v11621_v53 = vld [vmem:[#allocation7 + $0x38c] ss:$16 sps:$4 sm:$0xff]  }
 0x1f4   :  { %v13753_v56 = vpack.c.bf16 %v1456_v19, %v1450_v38  ;;  %8211 = vmatpush1.bf16.msra.mxu1 %v11595_v42  ;;  %7567 = vmatprep.subr.bf16.mxu0 %v11600_v15  ;;  %v1439_v49 = vmax.f32 %v13714_v10, 0.0  ;;  %v1451_v26 = vmax.f32 %v1427_v30, 0.0  ;;  %v13758_v47 = vpack.c.bf16 %v1450_v38, %v1438_v59  ;;  %v11613_v15 = vld [vmem:[#allocation7 + $0x368] ss:$16 sps:$4 sm:$0xff]   ;;  %v11616_v43 = vld [vmem:[#allocation7 + $0x380] ss:$16 sps:$4 sm:$0xff]  }
 0x1f5   :  { %v1457_v23 = vmax.f32 %v1433_v51, 0.0  ;;  %v13760_v37 = vpack.c.bf16 %v1455_v44, %v1449_v12  ;;  %v11011_v3 = vpack.c.bf16 %v1449_v12, %v1437_v6  ;;  %8212 = vmatprep.subr.bf16.mxu1 %v11603_v57  ;;  %v14041_v62 = vmax.f32 %v13690_v0, 0.0  ;;  %v11619_v17 = vld [vmem:[#allocation7 + $0x388] ss:$16 sps:$4 sm:$0xff]  }
 0x1f6   :  { %v13766_v29 = vpack.c.bf16 %v1451_v26, %v1439_v49  ;;  %v1494_v10 = vshll.u32 %v13743_v2, 16  ;;  %v1489_v11 = vrot.slane %v1487_v45, 1  ;;  %v1529_v5 = vshll.u32 %v13746_v48, 16 }
 0x1f7   :  { %v13764_v9 = vpack.c.bf16 %v14041_v62, %v1439_v49  ;;  %7581 = vmatprep.mubr.bf16.mxu0 %v11011_v3  ;;  %8226 = vmatprep.mubr.bf16.mxu1 %v11011_v3  ;;  %v13769_v59 = vpack.c.bf16 %v1457_v23, %v1451_v26  ;;  %v1536_v60 = vshll.u32 %v13760_v37, 16  ;;  %v1492_v4 = vshrl.u32 %v13743_v2, 16 }
 0x1f8   :  { %7568 = vmatpush1.bf16.msra.mxu0 %v11598_v33  ;;  %8213 = vmatpush1.bf16.msra.mxu1 %v11601_v34  ;;  %v1496_v0 = vrot.slane %v1494_v10, 1  ;;  %v1534_v22 = vshrl.u32 %v13760_v37, 16  ;;  %v1485_v6 = vshrl.u32 %v13698_v8, 16  ;;  %v1527_v16 = vshrl.u32 %v13746_v48, 16  ;;  %v11624_v34 = vld [vmem:[#allocation7 + $0x3a4] ss:$16 sps:$4 sm:$0xff]  }
 0x1f9   :  { %7569 = vmatprep.subr.bf16.mxu0 %v11606_v1  ;;  %8214 = vmatprep.subr.bf16.mxu1 %v11609_v28  ;;  %v1538_v25 = vrot.slane %v1536_v60, 1  ;;  %v1531_v21 = vrot.slane %v1529_v5, 1  ;;  %v1508_v42 = vshll.u32 %v13764_v9, 16  ;;  %v1550_v35 = vshll.u32 %v13769_v59, 16  ;;  %v11627_v28 = vld [vmem:[#allocation7 + $0x3ac] ss:$16 sps:$4 sm:$0xff]  }
 0x1fa   :  { %v1490_v14 = vor.u32 %v1489_v11, %v1485_v6  ;;  %v1501_v32 = vshll.u32 %v13702_v27, 16  ;;  %v1497_v61 = vor.u32 %v1496_v0, %v1492_v4  ;;  %v1506_v19 = vshrl.u32 %v13764_v9, 16  ;;  %v11622_v11 = vld [vmem:[#allocation7 + $0x3a0] ss:$16 sps:$4 sm:$0xff]   ;;  %v11625_v0 = vld [vmem:[#allocation7 + $0x3a8] ss:$16 sps:$4 sm:$0xff]  }
 0x1fb   :  { %v1539_v50 = vor.u32 %v1538_v25, %v1534_v22  ;;  %v1532_v52 = vor.u32 %v1531_v21, %v1527_v16  ;;  %v1510_v63 = vrot.slane %v1508_v42, 1  ;;  %v1548_v44 = vshrl.u32 %v13769_v59, 16 }
 0x1fc   :  { %7570 = vmatpush1.bf16.msra.mxu0 %v11604_v24  ;;  %8215 = vmatpush1.bf16.msra.mxu1 %v11607_v36  ;;  %v1552_v33 = vrot.slane %v1550_v35, 1  ;;  %v1503_v30 = vrot.slane %v1501_v32, 1  ;;  %v1543_v51 = vshll.u32 %v13753_v56, 16  ;;  %v1569_v12 = vrot.slane %v13743_v2, 1 }
 0x1fd   :  { %7571 = vmatprep.subr.bf16.mxu0 %v11612_v40  ;;  %8216 = vmatprep.subr.bf16.mxu1 %v11615_v54  ;;  %v13795_v57 = vcombine.low %v1497_v61, %v1539_v50  ;;  %v13797_v38 = vcombine.low %v1490_v14, %v1532_v52  ;;  %v1575_v49 = vrot.slane %v13760_v37, 1  ;;  %v1511_v26 = vor.u32 %v1510_v63, %v1506_v19 }
 0x1fe   :  { %v1553_v23 = vor.u32 %v1552_v33, %v1548_v44  ;;  %v1568_v3 = vrot.slane %v13698_v8, 1  ;;  %v1574_v1 = vrot.slane %v13746_v48, 1  ;;  %v1499_v24 = vshrl.u32 %v13702_v27, 16  ;;  %v11630_v33 = vld [vmem:[#allocation7 + $0x3c4] ss:$16 sps:$4 sm:$0xff]  }
 0x1ff   :  { %v1541_v36 = vshrl.u32 %v13753_v56, 16  ;;  %v13811_v62 = vcombine.low %v1569_v12, %v1575_v49  ;;  %v1571_v40 = vrot.slane %v13764_v9, 1  ;;  %v1577_v21 = vrot.slane %v13769_v59, 1  ;;  %v11633_v12 = vld [vmem:[#allocation7 + $0x3cc] ss:$16 sps:$4 sm:$0xff]  }
 0x200   :  { %7572 = vmatpush1.bf16.msra.mxu0 %v11610_v46  ;;  %8217 = vmatpush1.bf16.msra.mxu1 %v11613_v15  ;;  %v13814_v54 = vcombine.low %v1511_v26, %v1553_v23  ;;  %v1545_v46 = vrot.slane %v1543_v51, 1  ;;  %v13818_v25 = vcombine.low %v1568_v3, %v1574_v1  ;;  %v1504_v15 = vor.u32 %v1503_v30, %v1499_v24  ;;  %v11628_v30 = vld [vmem:[#allocation7 + $0x3c0] ss:$16 sps:$4 sm:$0xff]   ;;  %v11631_v26 = vld [vmem:[#allocation7 + $0x3c8] ss:$16 sps:$4 sm:$0xff]  }
 0x201   :  { %7573 = vmatprep.subr.bf16.mxu0 %v11618_v13  ;;  %8218 = vmatprep.subr.bf16.mxu1 %v11621_v53  ;;  %v1570_v14 = vrot.slane %v13702_v27, 1  ;;  %v1576_v61 = vrot.slane %v13753_v56, 1  ;;  %v1587_v50 = vrot.slane %v1492_v4, 1  ;;  %v13823_v63 = vcombine.low %v1571_v40, %v1577_v21  ;;  %v11639_v40 = vld [vmem:[#allocation7 + $0x3ec] ss:$16 sps:$4 sm:$0xff]  }
 0x202   :  { %v1546_v52 = vor.u32 %v1545_v46, %v1541_v36  ;;  %v1588_v13 = vrot.slane %v1494_v10, 2  ;;  %v1605_v53 = vrot.slane %v1534_v22, 1  ;;  %v1585_v10 = vrot.slane %v1487_v45, 2  ;;  %v11634_v21 = vld [vmem:[#allocation7 + $0x3e0] ss:$16 sps:$4 sm:$0xff]  }
 0x203   :  { %v13827_v49 = vcombine.low %v1570_v14, %v1576_v61  ;;  %v1602_v22 = vrot.slane %v1527_v16, 1  ;;  %v1593_v1 = vrot.slane %v1506_v19, 1 }
 0x204   :  { %7574 = vmatpush1.bf16.msra.mxu0 %v11616_v43  ;;  %8219 = vmatpush1.bf16.msra.mxu1 %v11619_v17  ;;  %v13829_v23 = vcombine.low %v1504_v15, %v1546_v52  ;;  %v1589_v4 = vor.u32 %v1588_v13, %v1587_v50  ;;  %v1606_v43 = vrot.slane %v1536_v60, 2  ;;  %v1584_v17 = vrot.slane %v1485_v6, 1  ;;  %v11636_v6 = vld [vmem:[#allocation7 + $0x3e4] ss:$16 sps:$4 sm:$0xff]   ;;  %v11637_v15 = vld [vmem:[#allocation7 + $0x3e8] ss:$16 sps:$4 sm:$0xff]  }
 0x205   :  { %7575 = vmatprep.subr.bf16.mxu0 %v11624_v34  ;;  %8220 = vmatprep.subr.bf16.mxu1 %v11627_v28  ;;  %v1603_v34 = vrot.slane %v1529_v5, 2  ;;  %v1594_v28 = vrot.slane %v1508_v42, 2  ;;  %v1611_v60 = vrot.slane %v1548_v44, 1  ;;  %v1612_v5 = vrot.slane %v1550_v35, 2  ;;  %v11642_v35 = vld [vmem:[#allocation7 + $0x404] ss:$16 sps:$4 sm:$0xff]  }
 0x206   :  { %v1607_v3 = vor.u32 %v1606_v43, %v1605_v53  ;;  %v1586_v46 = vor.u32 %v1585_v10, %v1584_v17  ;;  %v1591_v42 = vrot.slane %v1501_v32, 2  ;;  %v1608_v44 = vrot.slane %v1541_v36, 1  ;;  %v11640_v32 = vld [vmem:[#allocation7 + $0x400] ss:$16 sps:$4 sm:$0xff]   ;;  %v11651_v17 = vld [vmem:[#allocation7 + $0x42c] ss:$16 sps:$4 sm:$0xff]  }
 0x207   :  { %v1604_v45 = vor.u32 %v1603_v34, %v1602_v22  ;;  %v1595_v14 = vor.u32 %v1594_v28, %v1593_v1  ;;  %v1613_v61 = vor.u32 %v1612_v5, %v1611_v60  ;;  %v1617_v50 = vrot.slane %v13743_v2, 2  ;;  %v11643_v2 = vld [vmem:[#allocation7 + $0x408] ss:$16 sps:$4 sm:$0xff]   ;;  %v11657_v22 = vld [vmem:[#allocation7 + $0x44c] ss:$16 sps:$4 sm:$0xff]  }
 0x208   :  { %7576 = vmatpush1.bf16.msra.mxu0 %v11622_v11  ;;  %8221 = vmatpush1.bf16.msra.mxu1 %v11625_v0  ;;  %v13843_v16 = vcombine.low %v1589_v4, %v1607_v3  ;;  %v1590_v11 = vrot.slane %v1499_v24, 1  ;;  %v1609_v0 = vrot.slane %v1543_v51, 2  ;;  %v1623_v52 = vrot.slane %v13760_v37, 2  ;;  %v11645_v24 = vld [vmem:[#allocation7 + $0x40c] ss:$16 sps:$4 sm:$0xff]  }
 0x209   :  { %7577 = vmatprep.subr.bf16.mxu0 %v11630_v33  ;;  %8222 = vmatprep.subr.bf16.mxu1 %v11633_v12  ;;  %v13847_v19 = vcombine.low %v1586_v46, %v1604_v45  ;;  %v1616_v33 = vrot.slane %v13698_v8, 2  ;;  %v13856_v36 = vcombine.low %v1595_v14, %v1613_v61  ;;  %v1622_v51 = vrot.slane %v13746_v48, 2  ;;  %v11648_v8 = vld [vmem:[#allocation7 + $0x424] ss:$16 sps:$4 sm:$0xff]   ;;  %v11652_v34 = vld [vmem:[#allocation7 + $0x440] ss:$16 sps:$4 sm:$0xff]  }
 0x20a   :  { %v1592_v13 = vor.u32 %v1591_v42, %v1590_v11  ;;  %v1610_v53 = vor.u32 %v1609_v0, %v1608_v44  ;;  %v13858_v12 = vcombine.low %v1617_v50, %v1623_v52  ;;  %v1625_v37 = vrot.slane %v13769_v59, 2  ;;  %v11646_v59 = vld [vmem:[#allocation7 + $0x420] ss:$16 sps:$4 sm:$0xff]   ;;  %v11655_v3 = vld [vmem:[#allocation7 + $0x448] ss:$16 sps:$4 sm:$0xff]  }
 0x20b   :  { %v1618_v4 = vrot.slane %v13702_v27, 2  ;;  %v1624_v43 = vrot.slane %v13753_v56, 2  ;;  %v13867_v10 = vcombine.low %v1616_v33, %v1622_v51  ;;  %v11649_v27 = vld [vmem:[#allocation7 + $0x428] ss:$16 sps:$4 sm:$0xff]   ;;  %v11654_v56 = vld [vmem:[#allocation7 + $0x444] ss:$16 sps:$4 sm:$0xff]  }
 0x20c   :  { %7578 = vmatpush1.bf16.msra.mxu0 %v11628_v30  ;;  %8223 = vmatpush1.bf16.msra.mxu1 %v11631_v26  ;;  %v1619_v30 = vrot.slane %v13764_v9, 2  ;;  %v13862_v26 = vcombine.low %v1592_v13, %v1610_v53  ;;  %v11660_v1 = vld [vmem:[#allocation7 + $0x464] ss:$16 sps:$4 sm:$0xff]   ;;  %v11663_v28 = vld [vmem:[#allocation7 + $0x46c] ss:$16 sps:$4 sm:$0xff]  }
 0x20d   :  { %7579 = vmatprep.subr.bf16.mxu0 %v11636_v6  ;;  %8224 = vmatprep.subr.bf16.mxu1 %v11639_v40  ;;  %v13871_v9 = vcombine.low %v1618_v4, %v1624_v43  ;;  %v11661_v60 = vld [vmem:[#allocation7 + $0x468] ss:$16 sps:$4 sm:$0xff]   ;;  %v11666_v6 = vld [vmem:[#allocation7 + $0x484] ss:$16 sps:$4 sm:$0xff]   ;;  %v11664_v40 = vld [vmem:[#allocation7 + $0x480] ss:$16 sps:$4 sm:$0xff]  }
 0x20e   :  { %v13869_v48 = vcombine.low %v1619_v30, %v1625_v37  ;;  %v11667_v46 = vld [vmem:[#allocation7 + $0x488] ss:$16 sps:$4 sm:$0xff]   ;;  %v11672_v45 = vld [vmem:[#allocation7 + $0x4a4] ss:$16 sps:$4 sm:$0xff]   ;;  %v11676_v11 = vld [vmem:[#allocation7 + $0x4c0] ss:$16 sps:$4 sm:$0xff]  }
 0x20f   :  { %v11673_v14 = vld [vmem:[#allocation7 + $0x4a8] ss:$16 sps:$4 sm:$0xff]   ;;  %v11678_v5 = vld [vmem:[#allocation7 + $0x4c4] ss:$16 sps:$4 sm:$0xff]   ;;  %v11681_v42 = vld [vmem:[#allocation7 + $0x4cc] ss:$16 sps:$4 sm:$0xff]  }
 0x210   :  { %7580 = vmatpush1.bf16.msra.mxu0 %v11634_v21  ;;  %8225 = vmatpush1.bf16.msra.mxu1 %v11637_v15  ;;  %v11670_v21 = vld [vmem:[#allocation7 + $0x4a0] ss:$16 sps:$4 sm:$0xff]   ;;  %v11675_v15 = vld [vmem:[#allocation7 + $0x4ac] ss:$16 sps:$4 sm:$0xff]   ;;  %v11679_v44 = vld [vmem:[#allocation7 + $0x4c8] ss:$16 sps:$4 sm:$0xff]  }
 0x211   :  { %7592 = vmatprep.subr.bf16.mxu0 %v11642_v35  ;;  %8237 = vmatprep.subr.bf16.mxu1 %v11645_v24  ;;  %v11684_v0 = vld [vmem:[#allocation7 + $0x4e4] ss:$16 sps:$4 sm:$0xff]   ;;  %v11682_v61 = vld [vmem:[#allocation7 + $0x4e0] ss:$16 sps:$4 sm:$0xff]   ;;  %v11687_v50 = vld [vmem:[#allocation7 + $0x4ec] ss:$16 sps:$4 sm:$0xff]  }
 0x212   :  { %v11685_v52 = vld [vmem:[#allocation7 + $0x4e8] ss:$16 sps:$4 sm:$0xff]   ;;  %v11690_v35 = vld [vmem:[#allocation7 + $0x504] ss:$16 sps:$4 sm:$0xff]   ;;  %v11688_v24 = vld [vmem:[#allocation7 + $0x500] ss:$16 sps:$4 sm:$0xff]  }
 0x213   :  { %7582 = vmatmul.mubr.bf16.vlgmr.msra.gmra.mrb[36].mxu0 %v13751_v58  ;;  %8227 = vmatmul.mubr.bf16.vlgmr.msra.gmra.mrb[36].mxu1 %v13751_v58  ;;  %v11658_v58 = vld [vmem:[#allocation7 + $0x460] ss:$16 sps:$4 sm:$0xff]   ;;  %v11693_v13 = vld [vmem:[#allocation7 + $0x50c] ss:$16 sps:$4 sm:$0xff]   ;;  %v11691_v53 = vld [vmem:[#allocation7 + $0x508] ss:$16 sps:$4 sm:$0xff]  }
 0x214   :  { %7593 = vmatpush1.bf16.msra.mxu0 %v11640_v32  ;;  %7624 = vmatprep.mubr.bf16.mxu0 %v13766_v29  ;;  %v11696_v33 = vld [vmem:[#allocation7 + $0x524] ss:$16 sps:$4 sm:$0xff]   ;;  %v11694_v32 = vld [vmem:[#allocation7 + $0x520] ss:$16 sps:$4 sm:$0xff]   ;;  %v11699_v51 = vld [vmem:[#allocation7 + $0x52c] ss:$16 sps:$4 sm:$0xff]  }
 0x215   :  { %8238 = vmatpush1.bf16.msra.mxu1 %v11643_v2  ;;  %8269 = vmatprep.mubr.bf16.mxu1 %v13766_v29  ;;  %v11669_v29 = vld [vmem:[#allocation7 + $0x48c] ss:$16 sps:$4 sm:$0xff]   ;;  %v11697_v30 = vld [vmem:[#allocation7 + $0x528] ss:$16 sps:$4 sm:$0xff]   ;;  %v11702_v2 = vld [vmem:[#allocation7 + $0x544] ss:$16 sps:$4 sm:$0xff]  }
 0x216   :  { %7594 = vmatprep.subr.bf16.mxu0 %v11648_v8  ;;  %8239 = vmatprep.subr.bf16.mxu1 %v11651_v17  ;;  %v11700_v37 = vld [vmem:[#allocation7 + $0x540] ss:$16 sps:$4 sm:$0xff]   ;;  %v11705_v4 = vld [vmem:[#allocation7 + $0x54c] ss:$16 sps:$4 sm:$0xff]   ;;  %v11703_v43 = vld [vmem:[#allocation7 + $0x548] ss:$16 sps:$4 sm:$0xff]  }
 0x217   :  { %v11708_v8 = vld [vmem:[#allocation7 + $0x564] ss:$16 sps:$4 sm:$0xff]   ;;  %v11706_v17 = vld [vmem:[#allocation7 + $0x560] ss:$16 sps:$4 sm:$0xff]  }
 0x218   :  { %7595 = vmatpush1.bf16.msra.mxu0 %v11646_v59  ;;  %v11711_v59 = vld [vmem:[#allocation7 + $0x56c] ss:$16 sps:$4 sm:$0xff]  }
 0x219   :  { %8240 = vmatpush1.bf16.msra.mxu1 %v11649_v27  ;;  %7596 = vmatprep.subr.bf16.mxu0 %v11654_v56  ;;  %v11709_v27 = vld [vmem:[#allocation7 + $0x568] ss:$16 sps:$4 sm:$0xff]   ;;  %v11714_v56 = vld [vmem:[#allocation7 + $0x584] ss:$16 sps:$4 sm:$0xff]  }
 0x21a   :  { %8241 = vmatprep.subr.bf16.mxu1 %v11657_v22  ;;  %v11712_v22 = vld [vmem:[#allocation7 + $0x580] ss:$16 sps:$4 sm:$0xff]  }
 0x21c   :  { %7597 = vmatpush1.bf16.msra.mxu0 %v11652_v34  ;;  %v11717_v34 = vld [vmem:[#allocation7 + $0x58c] ss:$16 sps:$4 sm:$0xff]  }
 0x21d   :  { %8242 = vmatpush1.bf16.msra.mxu1 %v11655_v3  ;;  %7598 = vmatprep.subr.bf16.mxu0 %v11660_v1  ;;  %v11715_v3 = vld [vmem:[#allocation7 + $0x588] ss:$16 sps:$4 sm:$0xff]   ;;  %v11720_v1 = vld [vmem:[#allocation7 + $0x5a4] ss:$16 sps:$4 sm:$0xff]  }
 0x21e   :  { %8243 = vmatprep.subr.bf16.mxu1 %v11663_v28  ;;  %v11723_v28 = vld [vmem:[#allocation7 + $0x5ac] ss:$16 sps:$4 sm:$0xff]  }
 0x220   :  { %7599 = vmatpush1.bf16.msra.mxu0 %v11658_v58  ;;  %v11718_v58 = vld [vmem:[#allocation7 + $0x5a0] ss:$16 sps:$4 sm:$0xff]  }
 0x221   :  { %8244 = vmatpush1.bf16.msra.mxu1 %v11661_v60  ;;  %7600 = vmatprep.subr.bf16.mxu0 %v11666_v6  ;;  %v11721_v60 = vld [vmem:[#allocation7 + $0x5a8] ss:$16 sps:$4 sm:$0xff]   ;;  %v11726_v6 = vld [vmem:[#allocation7 + $0x5c4] ss:$16 sps:$4 sm:$0xff]  }
 0x222   :  { %8245 = vmatprep.subr.bf16.mxu1 %v11669_v29  ;;  %v11729_v29 = vld [vmem:[#allocation7 + $0x5cc] ss:$16 sps:$4 sm:$0xff]  }
 0x224   :  { %7601 = vmatpush1.bf16.msra.mxu0 %v11664_v40  ;;  %v11724_v40 = vld [vmem:[#allocation7 + $0x5c0] ss:$16 sps:$4 sm:$0xff]  }
 0x225   :  { %8246 = vmatpush1.bf16.msra.mxu1 %v11667_v46  ;;  %7602 = vmatprep.subr.bf16.mxu0 %v11672_v45  ;;  %v11727_v46 = vld [vmem:[#allocation7 + $0x5c8] ss:$16 sps:$4 sm:$0xff]   ;;  %v11732_v45 = vld [vmem:[#allocation7 + $0x5e4] ss:$16 sps:$4 sm:$0xff]  }
 0x226   :  { %8247 = vmatprep.subr.bf16.mxu1 %v11675_v15  ;;  %v11735_v15 = vld [vmem:[#allocation7 + $0x5ec] ss:$16 sps:$4 sm:$0xff]  }
 0x228   :  { %7603 = vmatpush1.bf16.msra.mxu0 %v11670_v21  ;;  %v11730_v21 = vld [vmem:[#allocation7 + $0x5e0] ss:$16 sps:$4 sm:$0xff]  }
 0x229   :  { %8248 = vmatpush1.bf16.msra.mxu1 %v11673_v14  ;;  %7604 = vmatprep.subr.bf16.mxu0 %v11678_v5  ;;  %v11733_v14 = vld [vmem:[#allocation7 + $0x5e8] ss:$16 sps:$4 sm:$0xff]   ;;  %v11738_v5 = vld [vmem:[#allocation7 + $0x604] ss:$16 sps:$4 sm:$0xff]  }
 0x22a   :  { %8249 = vmatprep.subr.bf16.mxu1 %v11681_v42  ;;  %v11741_v42 = vld [vmem:[#allocation7 + $0x60c] ss:$16 sps:$4 sm:$0xff]  }
 0x22c   :  { %7605 = vmatpush1.bf16.msra.mxu0 %v11676_v11  ;;  %v11736_v11 = vld [vmem:[#allocation7 + $0x600] ss:$16 sps:$4 sm:$0xff]  }
 0x22d   :  { %8250 = vmatpush1.bf16.msra.mxu1 %v11679_v44  ;;  %7606 = vmatprep.subr.bf16.mxu0 %v11684_v0  ;;  %v11739_v44 = vld [vmem:[#allocation7 + $0x608] ss:$16 sps:$4 sm:$0xff]   ;;  %v11744_v0 = vld [vmem:[#allocation7 + $0x624] ss:$16 sps:$4 sm:$0xff]  }
 0x22e   :  { %8251 = vmatprep.subr.bf16.mxu1 %v11687_v50  ;;  %v11747_v50 = vld [vmem:[#allocation7 + $0x62c] ss:$16 sps:$4 sm:$0xff]  }
 0x230   :  { %7607 = vmatpush1.bf16.msra.mxu0 %v11682_v61  ;;  %v11742_v61 = vld [vmem:[#allocation7 + $0x620] ss:$16 sps:$4 sm:$0xff]  }
 0x231   :  { %8252 = vmatpush1.bf16.msra.mxu1 %v11685_v52  ;;  %7608 = vmatprep.subr.bf16.mxu0 %v11690_v35  ;;  %v11745_v52 = vld [vmem:[#allocation7 + $0x628] ss:$16 sps:$4 sm:$0xff]   ;;  %v11750_v35 = vld [vmem:[#allocation7 + $0x644] ss:$16 sps:$4 sm:$0xff]  }
 0x232   :  { %8253 = vmatprep.subr.bf16.mxu1 %v11693_v13  ;;  %v11748_v13 = vld [vmem:[#allocation7 + $0x640] ss:$16 sps:$4 sm:$0xff]  }
 0x234   :  { %7609 = vmatpush1.bf16.msra.mxu0 %v11688_v24  ;;  %v11753_v24 = vld [vmem:[#allocation7 + $0x64c] ss:$16 sps:$4 sm:$0xff]  }
 0x235   :  { %8254 = vmatpush1.bf16.msra.mxu1 %v11691_v53  ;;  %7610 = vmatprep.subr.bf16.mxu0 %v11696_v33  ;;  %v11751_v53 = vld [vmem:[#allocation7 + $0x648] ss:$16 sps:$4 sm:$0xff]   ;;  %v11756_v33 = vld [vmem:[#allocation7 + $0x664] ss:$16 sps:$4 sm:$0xff]  }
 0x236   :  { %8255 = vmatprep.subr.bf16.mxu1 %v11699_v51  ;;  %v11757_v51 = vld [vmem:[#allocation7 + $0x668] ss:$16 sps:$4 sm:$0xff]  }
 0x238   :  { %7611 = vmatpush1.bf16.msra.mxu0 %v11694_v32  ;;  %v11754_v32 = vld [vmem:[#allocation7 + $0x660] ss:$16 sps:$4 sm:$0xff]  }
 0x239   :  { %8256 = vmatpush1.bf16.msra.mxu1 %v11697_v30  ;;  %7612 = vmatprep.subr.bf16.mxu0 %v11702_v2  ;;  %v11762_v30 = vld [vmem:[#allocation7 + $0x684] ss:$16 sps:$4 sm:$0xff]   ;;  %v11760_v2 = vld [vmem:[#allocation7 + $0x680] ss:$16 sps:$4 sm:$0xff]  }
 0x23a   :  { %8257 = vmatprep.subr.bf16.mxu1 %v11705_v4  ;;  %v11768_v4 = vld [vmem:[#allocation7 + $0x6a4] ss:$16 sps:$4 sm:$0xff]  }
 0x23c   :  { %7613 = vmatpush1.bf16.msra.mxu0 %v11700_v37  ;;  %v11763_v37 = vld [vmem:[#allocation7 + $0x688] ss:$16 sps:$4 sm:$0xff]  }
 0x23d   :  { %8258 = vmatpush1.bf16.msra.mxu1 %v11703_v43  ;;  %7614 = vmatprep.subr.bf16.mxu0 %v11708_v8  ;;  %v11766_v43 = vld [vmem:[#allocation7 + $0x6a0] ss:$16 sps:$4 sm:$0xff]   ;;  %v11771_v8 = vld [vmem:[#allocation7 + $0x6ac] ss:$16 sps:$4 sm:$0xff]  }
 0x23e   :  { %8259 = vmatprep.subr.bf16.mxu1 %v11711_v59  ;;  %v11774_v59 = vld [vmem:[#allocation7 + $0x6c4] ss:$16 sps:$4 sm:$0xff]  }
 0x240   :  { %7615 = vmatpush1.bf16.msra.mxu0 %v11706_v17  ;;  %v11769_v17 = vld [vmem:[#allocation7 + $0x6a8] ss:$16 sps:$4 sm:$0xff]  }
 0x241   :  { %8260 = vmatpush1.bf16.msra.mxu1 %v11709_v27  ;;  %7616 = vmatprep.subr.bf16.mxu0 %v11714_v56  ;;  %v11772_v27 = vld [vmem:[#allocation7 + $0x6c0] ss:$16 sps:$4 sm:$0xff]   ;;  %v11777_v56 = vld [vmem:[#allocation7 + $0x6cc] ss:$16 sps:$4 sm:$0xff]  }
 0x242   :  { %8261 = vmatprep.subr.bf16.mxu1 %v11717_v34  ;;  %v11780_v34 = vld [vmem:[#allocation7 + $0x6e4] ss:$16 sps:$4 sm:$0xff]  }
 0x244   :  { %7617 = vmatpush1.bf16.msra.mxu0 %v11712_v22  ;;  %v11775_v22 = vld [vmem:[#allocation7 + $0x6c8] ss:$16 sps:$4 sm:$0xff]  }
 0x245   :  { %8262 = vmatpush1.bf16.msra.mxu1 %v11715_v3  ;;  %7618 = vmatprep.subr.bf16.mxu0 %v11720_v1  ;;  %v11778_v3 = vld [vmem:[#allocation7 + $0x6e0] ss:$16 sps:$4 sm:$0xff]   ;;  %v11783_v1 = vld [vmem:[#allocation7 + $0x6ec] ss:$16 sps:$4 sm:$0xff]  }
 0x246   :  { %8263 = vmatprep.subr.bf16.mxu1 %v11723_v28  ;;  %v11786_v28 = vld [vmem:[#allocation7 + $0x704] ss:$16 sps:$4 sm:$0xff]  }
 0x248   :  { %7619 = vmatpush1.bf16.msra.mxu0 %v11718_v58  ;;  %v11781_v58 = vld [vmem:[#allocation7 + $0x6e8] ss:$16 sps:$4 sm:$0xff]  }
 0x249   :  { %8264 = vmatpush1.bf16.msra.mxu1 %v11721_v60  ;;  %7620 = vmatprep.subr.bf16.mxu0 %v11726_v6  ;;  %v11784_v60 = vld [vmem:[#allocation7 + $0x700] ss:$16 sps:$4 sm:$0xff]   ;;  %v11789_v6 = vld [vmem:[#allocation7 + $0x70c] ss:$16 sps:$4 sm:$0xff]  }
 0x24a   :  { %8265 = vmatprep.subr.bf16.mxu1 %v11729_v29  ;;  %v11792_v29 = vld [vmem:[#allocation7 + $0x724] ss:$16 sps:$4 sm:$0xff]  }
 0x24c   :  { %7621 = vmatpush1.bf16.msra.mxu0 %v11724_v40  ;;  %v11787_v40 = vld [vmem:[#allocation7 + $0x708] ss:$16 sps:$4 sm:$0xff]  }
 0x24d   :  { %8266 = vmatpush1.bf16.msra.mxu1 %v11727_v46  ;;  %7622 = vmatprep.subr.bf16.mxu0 %v11732_v45  ;;  %v11790_v46 = vld [vmem:[#allocation7 + $0x720] ss:$16 sps:$4 sm:$0xff]   ;;  %v11795_v45 = vld [vmem:[#allocation7 + $0x72c] ss:$16 sps:$4 sm:$0xff]  }
 0x24e   :  { %8267 = vmatprep.subr.bf16.mxu1 %v11735_v15  ;;  %v11798_v15 = vld [vmem:[#allocation7 + $0x744] ss:$16 sps:$4 sm:$0xff]  }
 0x250   :  { %7623 = vmatpush1.bf16.msra.mxu0 %v11730_v21  ;;  %v11793_v21 = vld [vmem:[#allocation7 + $0x728] ss:$16 sps:$4 sm:$0xff]  }
 0x251   :  { %8268 = vmatpush1.bf16.msra.mxu1 %v11733_v14  ;;  %7635 = vmatprep.subr.bf16.mxu0 %v11738_v5  ;;  %v11796_v14 = vld [vmem:[#allocation7 + $0x740] ss:$16 sps:$4 sm:$0xff]   ;;  %v11801_v5 = vld [vmem:[#allocation7 + $0x74c] ss:$16 sps:$4 sm:$0xff]  }
 0x252   :  { %8280 = vmatprep.subr.bf16.mxu1 %v11741_v42  ;;  %v11804_v42 = vld [vmem:[#allocation7 + $0x764] ss:$16 sps:$4 sm:$0xff]  }
 0x253   :  { %7625 = vmatmul.mubr.bf16.vlgmr.msra.gmra.mrb[36].mxu0 %v13758_v47 }
 0x254   :  { %8270 = vmatmul.mubr.bf16.vlgmr.msra.gmra.mrb[36].mxu1 %v13758_v47  ;;  %7636 = vmatpush1.bf16.msra.mxu0 %v11736_v11  ;;  %v11759_v47 = vld [vmem:[#allocation7 + $0x66c] ss:$16 sps:$4 sm:$0xff]   ;;  %v11799_v11 = vld [vmem:[#allocation7 + $0x748] ss:$16 sps:$4 sm:$0xff]  }
 0x255   :  { %7667 = vmatprep.mubr.bf16.mxu0 %v13603_v20  ;;  %8281 = vmatpush1.bf16.msra.mxu1 %v11739_v44  ;;  %v11802_v44 = vld [vmem:[#allocation7 + $0x760] ss:$16 sps:$4 sm:$0xff]  }
 0x256   :  { %8312 = vmatprep.mubr.bf16.mxu1 %v13603_v20  ;;  %7637 = vmatprep.subr.bf16.mxu0 %v11744_v0  ;;  %v11765_v20 = vld [vmem:[#allocation7 + $0x68c] ss:$16 sps:$4 sm:$0xff]  }
 0x257   :  { %8282 = vmatprep.subr.bf16.mxu1 %v11747_v50  ;;  %v11807_v0 = vld [vmem:[#allocation7 + $0x76c] ss:$16 sps:$4 sm:$0xff]   ;;  %v11810_v50 = vld [vmem:[#allocation7 + $0x784] ss:$16 sps:$4 sm:$0xff]  }
 0x258   :  { %7638 = vmatpush1.bf16.msra.mxu0 %v11742_v61  ;;  %v11805_v61 = vld [vmem:[#allocation7 + $0x768] ss:$16 sps:$4 sm:$0xff]  }
 0x259   :  { %8283 = vmatpush1.bf16.msra.mxu1 %v11745_v52  ;;  %7639 = vmatprep.subr.bf16.mxu0 %v11750_v35  ;;  %v11808_v52 = vld [vmem:[#allocation7 + $0x780] ss:$16 sps:$4 sm:$0xff]   ;;  %v11813_v35 = vld [vmem:[#allocation7 + $0x78c] ss:$16 sps:$4 sm:$0xff]  }
 0x25a   :  { %8284 = vmatprep.subr.bf16.mxu1 %v11753_v24  ;;  %v11811_v24 = vld [vmem:[#allocation7 + $0x788] ss:$16 sps:$4 sm:$0xff]  }
 0x25c   :  { %7640 = vmatpush1.bf16.msra.mxu0 %v11748_v13  ;;  %v11816_v13 = vld [vmem:[#allocation7 + $0x7a4] ss:$16 sps:$4 sm:$0xff]  }
 0x25d   :  { %8285 = vmatpush1.bf16.msra.mxu1 %v11751_v53  ;;  %7641 = vmatprep.subr.bf16.mxu0 %v11756_v33  ;;  %v11814_v53 = vld [vmem:[#allocation7 + $0x7a0] ss:$16 sps:$4 sm:$0xff]   ;;  %v11819_v33 = vld [vmem:[#allocation7 + $0x7ac] ss:$16 sps:$4 sm:$0xff]  }
 0x25e   :  { %8286 = vmatprep.subr.bf16.mxu1 %v11759_v47  ;;  %v11822_v47 = vld [vmem:[#allocation7 + $0x7c4] ss:$16 sps:$4 sm:$0xff]  }
 0x260   :  { %7642 = vmatpush1.bf16.msra.mxu0 %v11754_v32  ;;  %v11817_v32 = vld [vmem:[#allocation7 + $0x7a8] ss:$16 sps:$4 sm:$0xff]  }
 0x261   :  { %8287 = vmatpush1.bf16.msra.mxu1 %v11757_v51  ;;  %7643 = vmatprep.subr.bf16.mxu0 %v11762_v30  ;;  %v11820_v51 = vld [vmem:[#allocation7 + $0x7c0] ss:$16 sps:$4 sm:$0xff]   ;;  %v11825_v30 = vld [vmem:[#allocation7 + $0x7cc] ss:$16 sps:$4 sm:$0xff]  }
 0x262   :  { %8288 = vmatprep.subr.bf16.mxu1 %v11765_v20  ;;  %v11828_v20 = vld [vmem:[#allocation7 + $0x7e4] ss:$16 sps:$4 sm:$0xff]  }
 0x264   :  { %7644 = vmatpush1.bf16.msra.mxu0 %v11760_v2  ;;  %v11823_v2 = vld [vmem:[#allocation7 + $0x7c8] ss:$16 sps:$4 sm:$0xff]  }
 0x265   :  { %8289 = vmatpush1.bf16.msra.mxu1 %v11763_v37  ;;  %7645 = vmatprep.subr.bf16.mxu0 %v11768_v4  ;;  %v11826_v37 = vld [vmem:[#allocation7 + $0x7e0] ss:$16 sps:$4 sm:$0xff]   ;;  %v11831_v4 = vld [vmem:[#allocation7 + $0x7ec] ss:$16 sps:$4 sm:$0xff]  }
 0x266   :  { %8290 = vmatprep.subr.bf16.mxu1 %v11771_v8  ;;  %v11834_v8 = vld [vmem:[#allocation7 + $0x804] ss:$16 sps:$4 sm:$0xff]  }
 0x268   :  { %7646 = vmatpush1.bf16.msra.mxu0 %v11766_v43  ;;  %v11829_v43 = vld [vmem:[#allocation7 + $0x7e8] ss:$16 sps:$4 sm:$0xff]  }
 0x269   :  { %8291 = vmatpush1.bf16.msra.mxu1 %v11769_v17  ;;  %7647 = vmatprep.subr.bf16.mxu0 %v11774_v59  ;;  %v11832_v17 = vld [vmem:[#allocation7 + $0x800] ss:$16 sps:$4 sm:$0xff]   ;;  %v11837_v59 = vld [vmem:[#allocation7 + $0x80c] ss:$16 sps:$4 sm:$0xff]  }
 0x26a   :  { %8292 = vmatprep.subr.bf16.mxu1 %v11777_v56  ;;  %v11840_v56 = vld [vmem:[#allocation7 + $0x824] ss:$16 sps:$4 sm:$0xff]  }
 0x26c   :  { %7648 = vmatpush1.bf16.msra.mxu0 %v11772_v27  ;;  %v11835_v27 = vld [vmem:[#allocation7 + $0x808] ss:$16 sps:$4 sm:$0xff]  }
 0x26d   :  { %8293 = vmatpush1.bf16.msra.mxu1 %v11775_v22  ;;  %7649 = vmatprep.subr.bf16.mxu0 %v11780_v34  ;;  %v11838_v22 = vld [vmem:[#allocation7 + $0x820] ss:$16 sps:$4 sm:$0xff]   ;;  %v11843_v34 = vld [vmem:[#allocation7 + $0x82c] ss:$16 sps:$4 sm:$0xff]  }
 0x26e   :  { %8294 = vmatprep.subr.bf16.mxu1 %v11783_v1  ;;  %v11846_v1 = vld [vmem:[#allocation7 + $0x844] ss:$16 sps:$4 sm:$0xff]  }
 0x270   :  { %7650 = vmatpush1.bf16.msra.mxu0 %v11778_v3  ;;  %v11841_v3 = vld [vmem:[#allocation7 + $0x828] ss:$16 sps:$4 sm:$0xff]  }
 0x271   :  { %8295 = vmatpush1.bf16.msra.mxu1 %v11781_v58  ;;  %7651 = vmatprep.subr.bf16.mxu0 %v11786_v28  ;;  %v11849_v58 = vld [vmem:[#allocation7 + $0x84c] ss:$16 sps:$4 sm:$0xff]   ;;  %v11844_v28 = vld [vmem:[#allocation7 + $0x840] ss:$16 sps:$4 sm:$0xff]  }
 0x272   :  { %8296 = vmatprep.subr.bf16.mxu1 %v11789_v6  ;;  %v11852_v6 = vld [vmem:[#allocation7 + $0x864] ss:$16 sps:$4 sm:$0xff]  }
 0x274   :  { %7652 = vmatpush1.bf16.msra.mxu0 %v11784_v60  ;;  %v11847_v60 = vld [vmem:[#allocation7 + $0x848] ss:$16 sps:$4 sm:$0xff]  }
 0x275   :  { %8297 = vmatpush1.bf16.msra.mxu1 %v11787_v40  ;;  %7653 = vmatprep.subr.bf16.mxu0 %v11792_v29  ;;  %v11850_v40 = vld [vmem:[#allocation7 + $0x860] ss:$16 sps:$4 sm:$0xff]   ;;  %v11853_v29 = vld [vmem:[#allocation7 + $0x868] ss:$16 sps:$4 sm:$0xff]  }
 0x276   :  { %8298 = vmatprep.subr.bf16.mxu1 %v11795_v45  ;;  %v11856_v45 = vld [vmem:[#allocation7 + $0x880] ss:$16 sps:$4 sm:$0xff]  }
 0x278   :  { %7654 = vmatpush1.bf16.msra.mxu0 %v11790_v46  ;;  %v11858_v46 = vld [vmem:[#allocation7 + $0x884] ss:$16 sps:$4 sm:$0xff]  }
 0x279   :  { %8299 = vmatpush1.bf16.msra.mxu1 %v11793_v21  ;;  %7655 = vmatprep.subr.bf16.mxu0 %v11798_v15  ;;  %v11859_v21 = vld [vmem:[#allocation7 + $0x888] ss:$16 sps:$4 sm:$0xff]   ;;  %v11864_v15 = vld [vmem:[#allocation7 + $0x8a4] ss:$16 sps:$4 sm:$0xff]  }
 0x27a   :  { %8300 = vmatprep.subr.bf16.mxu1 %v11801_v5  ;;  %v11867_v5 = vld [vmem:[#allocation7 + $0x8ac] ss:$16 sps:$4 sm:$0xff]  }
 0x27c   :  { %7656 = vmatpush1.bf16.msra.mxu0 %v11796_v14  ;;  %v11862_v14 = vld [vmem:[#allocation7 + $0x8a0] ss:$16 sps:$4 sm:$0xff]  }
 0x27d   :  { %8301 = vmatpush1.bf16.msra.mxu1 %v11799_v11  ;;  %7657 = vmatprep.subr.bf16.mxu0 %v11804_v42  ;;  %v11865_v11 = vld [vmem:[#allocation7 + $0x8a8] ss:$16 sps:$4 sm:$0xff]   ;;  %v11870_v42 = vld [vmem:[#allocation7 + $0x8c4] ss:$16 sps:$4 sm:$0xff]  }
 0x27e   :  { %8302 = vmatprep.subr.bf16.mxu1 %v11807_v0  ;;  %v11873_v0 = vld [vmem:[#allocation7 + $0x8cc] ss:$16 sps:$4 sm:$0xff]  }
 0x280   :  { %7658 = vmatpush1.bf16.msra.mxu0 %v11802_v44  ;;  %v11868_v44 = vld [vmem:[#allocation7 + $0x8c0] ss:$16 sps:$4 sm:$0xff]  }
 0x281   :  { %8303 = vmatpush1.bf16.msra.mxu1 %v11805_v61  ;;  %7659 = vmatprep.subr.bf16.mxu0 %v11810_v50  ;;  %v11871_v61 = vld [vmem:[#allocation7 + $0x8c8] ss:$16 sps:$4 sm:$0xff]   ;;  %v11876_v50 = vld [vmem:[#allocation7 + $0x8e4] ss:$16 sps:$4 sm:$0xff]  }
 0x282   :  { %8304 = vmatprep.subr.bf16.mxu1 %v11813_v35  ;;  %v11879_v35 = vld [vmem:[#allocation7 + $0x8ec] ss:$16 sps:$4 sm:$0xff]  }
 0x284   :  { %7660 = vmatpush1.bf16.msra.mxu0 %v11808_v52  ;;  %v11874_v52 = vld [vmem:[#allocation7 + $0x8e0] ss:$16 sps:$4 sm:$0xff]  }
 0x285   :  { %8305 = vmatpush1.bf16.msra.mxu1 %v11811_v24  ;;  %7661 = vmatprep.subr.bf16.mxu0 %v11816_v13  ;;  %v11877_v24 = vld [vmem:[#allocation7 + $0x8e8] ss:$16 sps:$4 sm:$0xff]   ;;  %v11882_v13 = vld [vmem:[#allocation7 + $0x904] ss:$16 sps:$4 sm:$0xff]  }
 0x286   :  { %8306 = vmatprep.subr.bf16.mxu1 %v11819_v33  ;;  %v11885_v33 = vld [vmem:[#allocation7 + $0x90c] ss:$16 sps:$4 sm:$0xff]  }
 0x288   :  { %7662 = vmatpush1.bf16.msra.mxu0 %v11814_v53  ;;  %v11880_v53 = vld [vmem:[#allocation7 + $0x900] ss:$16 sps:$4 sm:$0xff]  }
 0x289   :  { %8307 = vmatpush1.bf16.msra.mxu1 %v11817_v32  ;;  %7663 = vmatprep.subr.bf16.mxu0 %v11822_v47  ;;  %v11883_v32 = vld [vmem:[#allocation7 + $0x908] ss:$16 sps:$4 sm:$0xff]   ;;  %v11888_v47 = vld [vmem:[#allocation7 + $0x924] ss:$16 sps:$4 sm:$0xff]  }
 0x28a   :  { %8308 = vmatprep.subr.bf16.mxu1 %v11825_v30  ;;  %v11891_v30 = vld [vmem:[#allocation7 + $0x92c] ss:$16 sps:$4 sm:$0xff]  }
 0x28c   :  { %7664 = vmatpush1.bf16.msra.mxu0 %v11820_v51  ;;  %v11886_v51 = vld [vmem:[#allocation7 + $0x920] ss:$16 sps:$4 sm:$0xff]  }
 0x28d   :  { %8309 = vmatpush1.bf16.msra.mxu1 %v11823_v2  ;;  %7665 = vmatprep.subr.bf16.mxu0 %v11828_v20  ;;  %v11889_v2 = vld [vmem:[#allocation7 + $0x928] ss:$16 sps:$4 sm:$0xff]   ;;  %v11894_v20 = vld [vmem:[#allocation7 + $0x944] ss:$16 sps:$4 sm:$0xff]  }
 0x28e   :  { %8310 = vmatprep.subr.bf16.mxu1 %v11831_v4  ;;  %v11897_v4 = vld [vmem:[#allocation7 + $0x94c] ss:$16 sps:$4 sm:$0xff]  }
 0x290   :  { %7666 = vmatpush1.bf16.msra.mxu0 %v11826_v37  ;;  %v11892_v37 = vld [vmem:[#allocation7 + $0x940] ss:$16 sps:$4 sm:$0xff]  }
 0x291   :  { %8311 = vmatpush1.bf16.msra.mxu1 %v11829_v43  ;;  %7678 = vmatprep.subr.bf16.mxu0 %v11834_v8  ;;  %v11895_v43 = vld [vmem:[#allocation7 + $0x948] ss:$16 sps:$4 sm:$0xff]   ;;  %v11900_v8 = vld [vmem:[#allocation7 + $0x964] ss:$16 sps:$4 sm:$0xff]  }
 0x292   :  { %8323 = vmatprep.subr.bf16.mxu1 %v11837_v59  ;;  %v11903_v59 = vld [vmem:[#allocation7 + $0x96c] ss:$16 sps:$4 sm:$0xff]  }
 0x293   :  { %7668 = vmatmul.mubr.bf16.vlgmr.msra.gmra.mrb[36].mxu0 %v13594_v39 }
 0x294   :  { %8313 = vmatmul.mubr.bf16.vlgmr.msra.gmra.mrb[36].mxu1 %v13594_v39  ;;  %7679 = vmatpush1.bf16.msra.mxu0 %v11832_v17  ;;  %v11855_v39 = vld [vmem:[#allocation7 + $0x86c] ss:$16 sps:$4 sm:$0xff]   ;;  %v11898_v17 = vld [vmem:[#allocation7 + $0x960] ss:$16 sps:$4 sm:$0xff]  }
 0x295   :  { %7710 = vmatprep.mubr.bf16.mxu0 %v13795_v57  ;;  %8324 = vmatpush1.bf16.msra.mxu1 %v11835_v27  ;;  %v11901_v27 = vld [vmem:[#allocation7 + $0x968] ss:$16 sps:$4 sm:$0xff]  }
 0x296   :  { %8355 = vmatprep.mubr.bf16.mxu1 %v13795_v57  ;;  %7680 = vmatprep.subr.bf16.mxu0 %v11840_v56  ;;  %v11861_v57 = vld [vmem:[#allocation7 + $0x88c] ss:$16 sps:$4 sm:$0xff]   ;;  %v11906_v56 = vld [vmem:[#allocation7 + $0x984] ss:$16 sps:$4 sm:$0xff]  }
 0x297   :  { %8325 = vmatprep.subr.bf16.mxu1 %v11843_v34  ;;  %v11909_v34 = vld [vmem:[#allocation7 + $0x98c] ss:$16 sps:$4 sm:$0xff]  }
 0x298   :  { %7681 = vmatpush1.bf16.msra.mxu0 %v11838_v22  ;;  %v11904_v22 = vld [vmem:[#allocation7 + $0x980] ss:$16 sps:$4 sm:$0xff]  }
 0x299   :  { %8326 = vmatpush1.bf16.msra.mxu1 %v11841_v3  ;;  %7682 = vmatprep.subr.bf16.mxu0 %v11846_v1  ;;  %v11907_v3 = vld [vmem:[#allocation7 + $0x988] ss:$16 sps:$4 sm:$0xff]   ;;  %v11912_v1 = vld [vmem:[#allocation7 + $0x9a4] ss:$16 sps:$4 sm:$0xff]  }
 0x29a   :  { %8327 = vmatprep.subr.bf16.mxu1 %v11849_v58  ;;  %v11910_v58 = vld [vmem:[#allocation7 + $0x9a0] ss:$16 sps:$4 sm:$0xff]  }
 0x29c   :  { %7683 = vmatpush1.bf16.msra.mxu0 %v11844_v28  ;;  %v11915_v28 = vld [vmem:[#allocation7 + $0x9ac] ss:$16 sps:$4 sm:$0xff]  }
 0x29d   :  { %8328 = vmatpush1.bf16.msra.mxu1 %v11847_v60  ;;  %7684 = vmatprep.subr.bf16.mxu0 %v11852_v6  ;;  %v11913_v60 = vld [vmem:[#allocation7 + $0x9a8] ss:$16 sps:$4 sm:$0xff]   ;;  %v11918_v6 = vld [vmem:[#allocation7 + $0x9c4] ss:$16 sps:$4 sm:$0xff]  }
 0x29e   :  { %8329 = vmatprep.subr.bf16.mxu1 %v11855_v39  ;;  %v11921_v39 = vld [vmem:[#allocation7 + $0x9cc] ss:$16 sps:$4 sm:$0xff]  }
 0x2a0   :  { %7685 = vmatpush1.bf16.msra.mxu0 %v11850_v40  ;;  %v11916_v40 = vld [vmem:[#allocation7 + $0x9c0] ss:$16 sps:$4 sm:$0xff]  }
 0x2a1   :  { %8330 = vmatpush1.bf16.msra.mxu1 %v11853_v29  ;;  %7686 = vmatprep.subr.bf16.mxu0 %v11858_v46  ;;  %v11919_v29 = vld [vmem:[#allocation7 + $0x9c8] ss:$16 sps:$4 sm:$0xff]   ;;  %v11924_v46 = vld [vmem:[#allocation7 + $0x9e4] ss:$16 sps:$4 sm:$0xff]  }
 0x2a2   :  { %8331 = vmatprep.subr.bf16.mxu1 %v11861_v57  ;;  %v11927_v57 = vld [vmem:[#allocation7 + $0x9ec] ss:$16 sps:$4 sm:$0xff]  }
 0x2a4   :  { %7687 = vmatpush1.bf16.msra.mxu0 %v11856_v45  ;;  %v11922_v45 = vld [vmem:[#allocation7 + $0x9e0] ss:$16 sps:$4 sm:$0xff]  }
 0x2a5   :  { %8332 = vmatpush1.bf16.msra.mxu1 %v11859_v21  ;;  %7688 = vmatprep.subr.bf16.mxu0 %v11864_v15  ;;  %v11925_v21 = vld [vmem:[#allocation7 + $0x9e8] ss:$16 sps:$4 sm:$0xff]   ;;  %v11930_v15 = vld [vmem:[#allocation7 + $0xa04] ss:$16 sps:$4 sm:$0xff]  }
 0x2a6   :  { %8333 = vmatprep.subr.bf16.mxu1 %v11867_v5  ;;  %v11933_v5 = vld [vmem:[#allocation7 + $0xa0c] ss:$16 sps:$4 sm:$0xff]  }
 0x2a8   :  { %7689 = vmatpush1.bf16.msra.mxu0 %v11862_v14  ;;  %v11928_v14 = vld [vmem:[#allocation7 + $0xa00] ss:$16 sps:$4 sm:$0xff]  }
 0x2a9   :  { %8334 = vmatpush1.bf16.msra.mxu1 %v11865_v11  ;;  %7690 = vmatprep.subr.bf16.mxu0 %v11870_v42  ;;  %v11931_v11 = vld [vmem:[#allocation7 + $0xa08] ss:$16 sps:$4 sm:$0xff]   ;;  %v11936_v42 = vld [vmem:[#allocation7 + $0xa24] ss:$16 sps:$4 sm:$0xff]  }
 0x2aa   :  { %8335 = vmatprep.subr.bf16.mxu1 %v11873_v0  ;;  %v11939_v0 = vld [vmem:[#allocation7 + $0xa2c] ss:$16 sps:$4 sm:$0xff]  }
 0x2ac   :  { %7691 = vmatpush1.bf16.msra.mxu0 %v11868_v44  ;;  %v11934_v44 = vld [vmem:[#allocation7 + $0xa20] ss:$16 sps:$4 sm:$0xff]  }
 0x2ad   :  { %8336 = vmatpush1.bf16.msra.mxu1 %v11871_v61  ;;  %7692 = vmatprep.subr.bf16.mxu0 %v11876_v50  ;;  %v11937_v61 = vld [vmem:[#allocation7 + $0xa28] ss:$16 sps:$4 sm:$0xff]   ;;  %v11942_v50 = vld [vmem:[#allocation7 + $0xa44] ss:$16 sps:$4 sm:$0xff]  }
 0x2ae   :  { %8337 = vmatprep.subr.bf16.mxu1 %v11879_v35  ;;  %v11940_v35 = vld [vmem:[#allocation7 + $0xa40] ss:$16 sps:$4 sm:$0xff]  }
 0x2b0   :  { %7693 = vmatpush1.bf16.msra.mxu0 %v11874_v52  ;;  %v11945_v52 = vld [vmem:[#allocation7 + $0xa4c] ss:$16 sps:$4 sm:$0xff]  }
 0x2b1   :  { %8338 = vmatpush1.bf16.msra.mxu1 %v11877_v24  ;;  %7694 = vmatprep.subr.bf16.mxu0 %v11882_v13  ;;  %v11943_v24 = vld [vmem:[#allocation7 + $0xa48] ss:$16 sps:$4 sm:$0xff]   ;;  %v11948_v13 = vld [vmem:[#allocation7 + $0xa64] ss:$16 sps:$4 sm:$0xff]  }
 0x2b2   :  { %8339 = vmatprep.subr.bf16.mxu1 %v11885_v33  ;;  %v11949_v33 = vld [vmem:[#allocation7 + $0xa68] ss:$16 sps:$4 sm:$0xff]  }
 0x2b4   :  { %7695 = vmatpush1.bf16.msra.mxu0 %v11880_v53  ;;  %v11946_v53 = vld [vmem:[#allocation7 + $0xa60] ss:$16 sps:$4 sm:$0xff]  }
 0x2b5   :  { %8340 = vmatpush1.bf16.msra.mxu1 %v11883_v32  ;;  %7696 = vmatprep.subr.bf16.mxu0 %v11888_v47  ;;  %v11954_v32 = vld [vmem:[#allocation7 + $0xa84] ss:$16 sps:$4 sm:$0xff]   ;;  %v11952_v47 = vld [vmem:[#allocation7 + $0xa80] ss:$16 sps:$4 sm:$0xff]  }
 0x2b6   :  { %8341 = vmatprep.subr.bf16.mxu1 %v11891_v30  ;;  %v11960_v30 = vld [vmem:[#allocation7 + $0xaa4] ss:$16 sps:$4 sm:$0xff]  }
 0x2b8   :  { %7697 = vmatpush1.bf16.msra.mxu0 %v11886_v51  ;;  %v11955_v51 = vld [vmem:[#allocation7 + $0xa88] ss:$16 sps:$4 sm:$0xff]  }
 0x2b9   :  { %8342 = vmatpush1.bf16.msra.mxu1 %v11889_v2  ;;  %7698 = vmatprep.subr.bf16.mxu0 %v11894_v20  ;;  %v11958_v2 = vld [vmem:[#allocation7 + $0xaa0] ss:$16 sps:$4 sm:$0xff]   ;;  %v11963_v20 = vld [vmem:[#allocation7 + $0xaac] ss:$16 sps:$4 sm:$0xff]  }
 0x2ba   :  { %8343 = vmatprep.subr.bf16.mxu1 %v11897_v4  ;;  %v11966_v4 = vld [vmem:[#allocation7 + $0xac4] ss:$16 sps:$4 sm:$0xff]  }
 0x2bc   :  { %7699 = vmatpush1.bf16.msra.mxu0 %v11892_v37  ;;  %v11961_v37 = vld [vmem:[#allocation7 + $0xaa8] ss:$16 sps:$4 sm:$0xff]  }
 0x2bd   :  { %8344 = vmatpush1.bf16.msra.mxu1 %v11895_v43  ;;  %7700 = vmatprep.subr.bf16.mxu0 %v11900_v8  ;;  %v11964_v43 = vld [vmem:[#allocation7 + $0xac0] ss:$16 sps:$4 sm:$0xff]   ;;  %v11969_v8 = vld [vmem:[#allocation7 + $0xacc] ss:$16 sps:$4 sm:$0xff]  }
 0x2be   :  { %8345 = vmatprep.subr.bf16.mxu1 %v11903_v59  ;;  %v11972_v59 = vld [vmem:[#allocation7 + $0xae4] ss:$16 sps:$4 sm:$0xff]  }
 0x2c0   :  { %7701 = vmatpush1.bf16.msra.mxu0 %v11898_v17  ;;  %v11967_v17 = vld [vmem:[#allocation7 + $0xac8] ss:$16 sps:$4 sm:$0xff]  }
 0x2c1   :  { %8346 = vmatpush1.bf16.msra.mxu1 %v11901_v27  ;;  %7702 = vmatprep.subr.bf16.mxu0 %v11906_v56  ;;  %v11970_v27 = vld [vmem:[#allocation7 + $0xae0] ss:$16 sps:$4 sm:$0xff]   ;;  %v11975_v56 = vld [vmem:[#allocation7 + $0xaec] ss:$16 sps:$4 sm:$0xff]  }
 0x2c2   :  { %8347 = vmatprep.subr.bf16.mxu1 %v11909_v34  ;;  %v11978_v34 = vld [vmem:[#allocation7 + $0xb04] ss:$16 sps:$4 sm:$0xff]  }
 0x2c4   :  { %7703 = vmatpush1.bf16.msra.mxu0 %v11904_v22  ;;  %v11973_v22 = vld [vmem:[#allocation7 + $0xae8] ss:$16 sps:$4 sm:$0xff]  }
 0x2c5   :  { %8348 = vmatpush1.bf16.msra.mxu1 %v11907_v3  ;;  %7704 = vmatprep.subr.bf16.mxu0 %v11912_v1  ;;  %v11976_v3 = vld [vmem:[#allocation7 + $0xb00] ss:$16 sps:$4 sm:$0xff]   ;;  %v11981_v1 = vld [vmem:[#allocation7 + $0xb0c] ss:$16 sps:$4 sm:$0xff]  }
 0x2c6   :  { %8349 = vmatprep.subr.bf16.mxu1 %v11915_v28  ;;  %v11984_v28 = vld [vmem:[#allocation7 + $0xb24] ss:$16 sps:$4 sm:$0xff]  }
 0x2c8   :  { %7705 = vmatpush1.bf16.msra.mxu0 %v11910_v58  ;;  %v11979_v58 = vld [vmem:[#allocation7 + $0xb08] ss:$16 sps:$4 sm:$0xff]  }
 0x2c9   :  { %8350 = vmatpush1.bf16.msra.mxu1 %v11913_v60  ;;  %7706 = vmatprep.subr.bf16.mxu0 %v11918_v6  ;;  %v11982_v60 = vld [vmem:[#allocation7 + $0xb20] ss:$16 sps:$4 sm:$0xff]   ;;  %v11987_v6 = vld [vmem:[#allocation7 + $0xb2c] ss:$16 sps:$4 sm:$0xff]  }
 0x2ca   :  { %8351 = vmatprep.subr.bf16.mxu1 %v11921_v39  ;;  %v11990_v39 = vld [vmem:[#allocation7 + $0xb44] ss:$16 sps:$4 sm:$0xff]  }
 0x2cc   :  { %7707 = vmatpush1.bf16.msra.mxu0 %v11916_v40  ;;  %v11985_v40 = vld [vmem:[#allocation7 + $0xb28] ss:$16 sps:$4 sm:$0xff]  }
 0x2cd   :  { %8352 = vmatpush1.bf16.msra.mxu1 %v11919_v29  ;;  %7708 = vmatprep.subr.bf16.mxu0 %v11924_v46  ;;  %v11988_v29 = vld [vmem:[#allocation7 + $0xb40] ss:$16 sps:$4 sm:$0xff]   ;;  %v11993_v46 = vld [vmem:[#allocation7 + $0xb4c] ss:$16 sps:$4 sm:$0xff]  }
 0x2ce   :  { %8353 = vmatprep.subr.bf16.mxu1 %v11927_v57  ;;  %v11996_v57 = vld [vmem:[#allocation7 + $0xb64] ss:$16 sps:$4 sm:$0xff]  }
 0x2d0   :  { %7709 = vmatpush1.bf16.msra.mxu0 %v11922_v45  ;;  %v11991_v45 = vld [vmem:[#allocation7 + $0xb48] ss:$16 sps:$4 sm:$0xff]  }
 0x2d1   :  { %8354 = vmatpush1.bf16.msra.mxu1 %v11925_v21  ;;  %7721 = vmatprep.subr.bf16.mxu0 %v11930_v15  ;;  %v11994_v21 = vld [vmem:[#allocation7 + $0xb60] ss:$16 sps:$4 sm:$0xff]   ;;  %v11999_v15 = vld [vmem:[#allocation7 + $0xb6c] ss:$16 sps:$4 sm:$0xff]  }
 0x2d2   :  { %8366 = vmatprep.subr.bf16.mxu1 %v11933_v5  ;;  %v12002_v5 = vld [vmem:[#allocation7 + $0xb84] ss:$16 sps:$4 sm:$0xff]  }
 0x2d3   :  { %7711 = vmatmul.mubr.bf16.vlgmr.msra.gmra.mrb[36].mxu0 %v13797_v38 }
 0x2d4   :  { %8356 = vmatmul.mubr.bf16.vlgmr.msra.gmra.mrb[36].mxu1 %v13797_v38  ;;  %7722 = vmatpush1.bf16.msra.mxu0 %v11928_v14  ;;  %v11951_v38 = vld [vmem:[#allocation7 + $0xa6c] ss:$16 sps:$4 sm:$0xff]   ;;  %v11997_v14 = vld [vmem:[#allocation7 + $0xb68] ss:$16 sps:$4 sm:$0xff]  }
 0x2d5   :  { %7753 = vmatprep.mubr.bf16.mxu0 %v13814_v54  ;;  %8367 = vmatpush1.bf16.msra.mxu1 %v11931_v11  ;;  %v12000_v11 = vld [vmem:[#allocation7 + $0xb80] ss:$16 sps:$4 sm:$0xff]  }
 0x2d6   :  { %8398 = vmatprep.mubr.bf16.mxu1 %v13814_v54  ;;  %7723 = vmatprep.subr.bf16.mxu0 %v11936_v42  ;;  %v11957_v54 = vld [vmem:[#allocation7 + $0xa8c] ss:$16 sps:$4 sm:$0xff]  }
 0x2d7   :  { %8368 = vmatprep.subr.bf16.mxu1 %v11939_v0  ;;  %v12005_v42 = vld [vmem:[#allocation7 + $0xb8c] ss:$16 sps:$4 sm:$0xff]   ;;  %v12008_v0 = vld [vmem:[#allocation7 + $0xba4] ss:$16 sps:$4 sm:$0xff]  }
 0x2d8   :  { %7724 = vmatpush1.bf16.msra.mxu0 %v11934_v44  ;;  %v12003_v44 = vld [vmem:[#allocation7 + $0xb88] ss:$16 sps:$4 sm:$0xff]  }
 0x2d9   :  { %8369 = vmatpush1.bf16.msra.mxu1 %v11937_v61  ;;  %7725 = vmatprep.subr.bf16.mxu0 %v11942_v50  ;;  %v12006_v61 = vld [vmem:[#allocation7 + $0xba0] ss:$16 sps:$4 sm:$0xff]   ;;  %v12011_v50 = vld [vmem:[#allocation7 + $0xbac] ss:$16 sps:$4 sm:$0xff]  }
 0x2da   :  { %8370 = vmatprep.subr.bf16.mxu1 %v11945_v52  ;;  %v12009_v52 = vld [vmem:[#allocation7 + $0xba8] ss:$16 sps:$4 sm:$0xff]  }
 0x2dc   :  { %7726 = vmatpush1.bf16.msra.mxu0 %v11940_v35  ;;  %v12014_v35 = vld [vmem:[#allocation7 + $0xbc4] ss:$16 sps:$4 sm:$0xff]  }
 0x2dd   :  { %8371 = vmatpush1.bf16.msra.mxu1 %v11943_v24  ;;  %7727 = vmatprep.subr.bf16.mxu0 %v11948_v13  ;;  %v12017_v24 = vld [vmem:[#allocation7 + $0xbcc] ss:$16 sps:$4 sm:$0xff]   ;;  %v12012_v13 = vld [vmem:[#allocation7 + $0xbc0] ss:$16 sps:$4 sm:$0xff]  }
 0x2de   :  { %8372 = vmatprep.subr.bf16.mxu1 %v11951_v38  ;;  %v12020_v38 = vld [vmem:[#allocation7 + $0xbe4] ss:$16 sps:$4 sm:$0xff]  }
 0x2e0   :  { %7728 = vmatpush1.bf16.msra.mxu0 %v11946_v53  ;;  %v12015_v53 = vld [vmem:[#allocation7 + $0xbc8] ss:$16 sps:$4 sm:$0xff]  }
 0x2e1   :  { %8373 = vmatpush1.bf16.msra.mxu1 %v11949_v33  ;;  %7729 = vmatprep.subr.bf16.mxu0 %v11954_v32  ;;  %v12023_v33 = vld [vmem:[#allocation7 + $0xbec] ss:$16 sps:$4 sm:$0xff]   ;;  %v12018_v32 = vld [vmem:[#allocation7 + $0xbe0] ss:$16 sps:$4 sm:$0xff]  }
 0x2e2   :  { %8374 = vmatprep.subr.bf16.mxu1 %v11957_v54  ;;  %v12026_v54 = vld [vmem:[#allocation7 + $0xc04] ss:$16 sps:$4 sm:$0xff]  }
 0x2e4   :  { %7730 = vmatpush1.bf16.msra.mxu0 %v11952_v47  ;;  %v12021_v47 = vld [vmem:[#allocation7 + $0xbe8] ss:$16 sps:$4 sm:$0xff]  }
 0x2e5   :  { %8375 = vmatpush1.bf16.msra.mxu1 %v11955_v51  ;;  %7731 = vmatprep.subr.bf16.mxu0 %v11960_v30  ;;  %v12029_v51 = vld [vmem:[#allocation7 + $0xc0c] ss:$16 sps:$4 sm:$0xff]   ;;  %v12024_v30 = vld [vmem:[#allocation7 + $0xc00] ss:$16 sps:$4 sm:$0xff]  }
 0x2e6   :  { %8376 = vmatprep.subr.bf16.mxu1 %v11963_v20  ;;  %v12032_v20 = vld [vmem:[#allocation7 + $0xc24] ss:$16 sps:$4 sm:$0xff]  }
 0x2e8   :  { %7732 = vmatpush1.bf16.msra.mxu0 %v11958_v2  ;;  %v12027_v2 = vld [vmem:[#allocation7 + $0xc08] ss:$16 sps:$4 sm:$0xff]  }
 0x2e9   :  { %8377 = vmatpush1.bf16.msra.mxu1 %v11961_v37  ;;  %7733 = vmatprep.subr.bf16.mxu0 %v11966_v4  ;;  %v12035_v37 = vld [vmem:[#allocation7 + $0xc2c] ss:$16 sps:$4 sm:$0xff]   ;;  %v12030_v4 = vld [vmem:[#allocation7 + $0xc20] ss:$16 sps:$4 sm:$0xff]  }
 0x2ea   :  { %8378 = vmatprep.subr.bf16.mxu1 %v11969_v8  ;;  %v12033_v8 = vld [vmem:[#allocation7 + $0xc28] ss:$16 sps:$4 sm:$0xff]  }
 0x2ec   :  { %7734 = vmatpush1.bf16.msra.mxu0 %v11964_v43  ;;  %v14042_v43 = vld [vmem:[#allocation27_spill] sm:$0xff] }
 0x2ed   :  { %8379 = vmatpush1.bf16.msra.mxu1 %v11967_v17  ;;  %7735 = vmatprep.subr.bf16.mxu0 %v11972_v59  ;;  %v12038_v17 = vld [vmem:[#allocation7 + $0xc44] ss:$16 sps:$4 sm:$0xff]   ;;  %v12041_v59 = vld [vmem:[#allocation7 + $0xc4c] ss:$16 sps:$4 sm:$0xff]  }
 0x2ee   :  { %8380 = vmatprep.subr.bf16.mxu1 %v11975_v56  ;;  %v12039_v56 = vld [vmem:[#allocation7 + $0xc48] ss:$16 sps:$4 sm:$0xff]  }
 0x2f0   :  { %7736 = vmatpush1.bf16.msra.mxu0 %v11970_v27  ;;  %v12036_v27 = vld [vmem:[#allocation7 + $0xc40] ss:$16 sps:$4 sm:$0xff]  }
 0x2f1   :  { %8381 = vmatpush1.bf16.msra.mxu1 %v11973_v22  ;;  %7737 = vmatprep.subr.bf16.mxu0 %v11978_v34  ;;  %v12044_v22 = vld [vmem:[#allocation7 + $0xc64] ss:$16 sps:$4 sm:$0xff]   ;;  %v12042_v34 = vld [vmem:[#allocation7 + $0xc60] ss:$16 sps:$4 sm:$0xff]  }
 0x2f2   :  { %8382 = vmatprep.subr.bf16.mxu1 %v11981_v1  ;;  %v12050_v1 = vld [vmem:[#allocation7 + $0xc84] ss:$16 sps:$4 sm:$0xff]  }
 0x2f4   :  { %7738 = vmatpush1.bf16.msra.mxu0 %v11976_v3  ;;  %v12045_v3 = vld [vmem:[#allocation7 + $0xc68] ss:$16 sps:$4 sm:$0xff]  }
 0x2f5   :  { %8383 = vmatpush1.bf16.msra.mxu1 %v11979_v58  ;;  %7739 = vmatprep.subr.bf16.mxu0 %v11984_v28  ;;  %v12053_v58 = vld [vmem:[#allocation7 + $0xc8c] ss:$16 sps:$4 sm:$0xff]   ;;  %v12048_v28 = vld [vmem:[#allocation7 + $0xc80] ss:$16 sps:$4 sm:$0xff]  }
 0x2f6   :  { %8384 = vmatprep.subr.bf16.mxu1 %v11987_v6  ;;  %v12056_v6 = vld [vmem:[#allocation7 + $0xca4] ss:$16 sps:$4 sm:$0xff]  }
 0x2f8   :  { %7740 = vmatpush1.bf16.msra.mxu0 %v11982_v60  ;;  %v12051_v60 = vld [vmem:[#allocation7 + $0xc88] ss:$16 sps:$4 sm:$0xff]  }
 0x2f9   :  { %8385 = vmatpush1.bf16.msra.mxu1 %v11985_v40  ;;  %7741 = vmatprep.subr.bf16.mxu0 %v11990_v39  ;;  %v12059_v40 = vld [vmem:[#allocation7 + $0xcac] ss:$16 sps:$4 sm:$0xff]   ;;  %v12054_v39 = vld [vmem:[#allocation7 + $0xca0] ss:$16 sps:$4 sm:$0xff]  }
 0x2fa   :  { %8386 = vmatprep.subr.bf16.mxu1 %v11993_v46  ;;  %v12062_v46 = vld [vmem:[#allocation7 + $0xcc4] ss:$16 sps:$4 sm:$0xff]  }
 0x2fc   :  { %7742 = vmatpush1.bf16.msra.mxu0 %v11988_v29  ;;  %v12057_v29 = vld [vmem:[#allocation7 + $0xca8] ss:$16 sps:$4 sm:$0xff]  }
 0x2fd   :  { %8387 = vmatpush1.bf16.msra.mxu1 %v11991_v45  ;;  %7743 = vmatprep.subr.bf16.mxu0 %v11996_v57  ;;  %v12065_v45 = vld [vmem:[#allocation7 + $0xccc] ss:$16 sps:$4 sm:$0xff]   ;;  %v12060_v57 = vld [vmem:[#allocation7 + $0xcc0] ss:$16 sps:$4 sm:$0xff]  }
 0x2fe   :  { %8388 = vmatprep.subr.bf16.mxu1 %v11999_v15  ;;  %v12068_v15 = vld [vmem:[#allocation7 + $0xce4] ss:$16 sps:$4 sm:$0xff]  }
 0x300   :  { %7744 = vmatpush1.bf16.msra.mxu0 %v11994_v21  ;;  %v12063_v21 = vld [vmem:[#allocation7 + $0xcc8] ss:$16 sps:$4 sm:$0xff]  }
 0x301   :  { %8389 = vmatpush1.bf16.msra.mxu1 %v11997_v14  ;;  %7745 = vmatprep.subr.bf16.mxu0 %v12002_v5  ;;  %v12071_v14 = vld [vmem:[#allocation7 + $0xcec] ss:$16 sps:$4 sm:$0xff]   ;;  %v12066_v5 = vld [vmem:[#allocation7 + $0xce0] ss:$16 sps:$4 sm:$0xff]  }
 0x302   :  { %8390 = vmatprep.subr.bf16.mxu1 %v12005_v42  ;;  %v12074_v42 = vld [vmem:[#allocation7 + $0xd04] ss:$16 sps:$4 sm:$0xff]  }
 0x304   :  { %7746 = vmatpush1.bf16.msra.mxu0 %v12000_v11  ;;  %v12069_v11 = vld [vmem:[#allocation7 + $0xce8] ss:$16 sps:$4 sm:$0xff]  }
 0x305   :  { %8391 = vmatpush1.bf16.msra.mxu1 %v12003_v44  ;;  %7747 = vmatprep.subr.bf16.mxu0 %v12008_v0  ;;  %v12077_v44 = vld [vmem:[#allocation7 + $0xd0c] ss:$16 sps:$4 sm:$0xff]   ;;  %v12072_v0 = vld [vmem:[#allocation7 + $0xd00] ss:$16 sps:$4 sm:$0xff]  }
 0x306   :  { %8392 = vmatprep.subr.bf16.mxu1 %v12011_v50  ;;  %v12080_v50 = vld [vmem:[#allocation7 + $0xd24] ss:$16 sps:$4 sm:$0xff]  }
 0x308   :  { %7748 = vmatpush1.bf16.msra.mxu0 %v12006_v61  ;;  %v12075_v61 = vld [vmem:[#allocation7 + $0xd08] ss:$16 sps:$4 sm:$0xff]  }
 0x309   :  { %8393 = vmatpush1.bf16.msra.mxu1 %v12009_v52  ;;  %7749 = vmatprep.subr.bf16.mxu0 %v12014_v35  ;;  %v12083_v52 = vld [vmem:[#allocation7 + $0xd2c] ss:$16 sps:$4 sm:$0xff]   ;;  %v12078_v35 = vld [vmem:[#allocation7 + $0xd20] ss:$16 sps:$4 sm:$0xff]  }
 0x30a   :  { %8394 = vmatprep.subr.bf16.mxu1 %v12017_v24  ;;  %v12081_v24 = vld [vmem:[#allocation7 + $0xd28] ss:$16 sps:$4 sm:$0xff]  }
 0x30c   :  { %7750 = vmatpush1.bf16.msra.mxu0 %v12012_v13  ;;  %v12086_v13 = vld [vmem:[#allocation7 + $0xd44] ss:$16 sps:$4 sm:$0xff]  }
 0x30d   :  { %8395 = vmatpush1.bf16.msra.mxu1 %v12015_v53  ;;  %7751 = vmatprep.subr.bf16.mxu0 %v12020_v38  ;;  %v12089_v53 = vld [vmem:[#allocation7 + $0xd4c] ss:$16 sps:$4 sm:$0xff]   ;;  %v12084_v38 = vld [vmem:[#allocation7 + $0xd40] ss:$16 sps:$4 sm:$0xff]  }
 0x30e   :  { %8396 = vmatprep.subr.bf16.mxu1 %v12023_v33  ;;  %v12087_v33 = vld [vmem:[#allocation7 + $0xd48] ss:$16 sps:$4 sm:$0xff]  }
 0x310   :  { %7752 = vmatpush1.bf16.msra.mxu0 %v12018_v32  ;;  %v12092_v32 = vld [vmem:[#allocation7 + $0xd64] ss:$16 sps:$4 sm:$0xff]  }
 0x311   :  { %8397 = vmatpush1.bf16.msra.mxu1 %v12021_v47  ;;  %7764 = vmatprep.subr.bf16.mxu0 %v12026_v54  ;;  %v12095_v47 = vld [vmem:[#allocation7 + $0xd6c] ss:$16 sps:$4 sm:$0xff]   ;;  %v12090_v54 = vld [vmem:[#allocation7 + $0xd60] ss:$16 sps:$4 sm:$0xff]  }
 0x312   :  { %8409 = vmatprep.subr.bf16.mxu1 %v12029_v51  ;;  %v12093_v51 = vld [vmem:[#allocation7 + $0xd68] ss:$16 sps:$4 sm:$0xff]  }
 0x313   :  { %7754 = vmatmul.mubr.bf16.vlgmr.msra.gmra.mrb[36].mxu0 %v13829_v23 }
 0x314   :  { %8399 = vmatmul.mubr.bf16.vlgmr.msra.gmra.mrb[36].mxu1 %v13829_v23  ;;  %7765 = vmatpush1.bf16.msra.mxu0 %v12024_v30  ;;  %v12047_v23 = vld [vmem:[#allocation7 + $0xc6c] ss:$16 sps:$4 sm:$0xff]   ;;  %v12098_v30 = vld [vmem:[#allocation7 + $0xd84] ss:$16 sps:$4 sm:$0xff]  }
 0x315   :  { %7796 = vmatprep.mubr.bf16.mxu0 %v14042_v43  ;;  %8410 = vmatpush1.bf16.msra.mxu1 %v12027_v2  ;;  %v12101_v2 = vld [vmem:[#allocation7 + $0xd8c] ss:$16 sps:$4 sm:$0xff]  }
 0x316   :  { %8441 = vmatprep.mubr.bf16.mxu1 %v14042_v43  ;;  %7766 = vmatprep.subr.bf16.mxu0 %v12032_v20  ;;  %v12096_v20 = vld [vmem:[#allocation7 + $0xd80] ss:$16 sps:$4 sm:$0xff]   ;;  %v12107_v43 = vld [vmem:[#allocation7 + $0xdac] ss:$16 sps:$4 sm:$0xff]  }
 0x317   :  { %8411 = vmatprep.subr.bf16.mxu1 %v12035_v37  ;;  %v12099_v37 = vld [vmem:[#allocation7 + $0xd88] ss:$16 sps:$4 sm:$0xff]  }
 0x318   :  { %7767 = vmatpush1.bf16.msra.mxu0 %v12030_v4  ;;  %v12104_v4 = vld [vmem:[#allocation7 + $0xda4] ss:$16 sps:$4 sm:$0xff]  }
 0x319   :  { %8412 = vmatpush1.bf16.msra.mxu1 %v12033_v8  ;;  %7768 = vmatprep.subr.bf16.mxu0 %v12038_v17  ;;  %v12102_v8 = vld [vmem:[#allocation7 + $0xda0] ss:$16 sps:$4 sm:$0xff]   ;;  %v12105_v17 = vld [vmem:[#allocation7 + $0xda8] ss:$16 sps:$4 sm:$0xff]  }
 0x31a   :  { %8413 = vmatprep.subr.bf16.mxu1 %v12041_v59  ;;  %v12110_v59 = vld [vmem:[#allocation7 + $0xdc4] ss:$16 sps:$4 sm:$0xff]  }
 0x31c   :  { %7769 = vmatpush1.bf16.msra.mxu0 %v12036_v27  ;;  %v12113_v27 = vld [vmem:[#allocation7 + $0xdcc] ss:$16 sps:$4 sm:$0xff]  }
 0x31d   :  { %8414 = vmatpush1.bf16.msra.mxu1 %v12039_v56  ;;  %7770 = vmatprep.subr.bf16.mxu0 %v12044_v22  ;;  %v12108_v56 = vld [vmem:[#allocation7 + $0xdc0] ss:$16 sps:$4 sm:$0xff]   ;;  %v12111_v22 = vld [vmem:[#allocation7 + $0xdc8] ss:$16 sps:$4 sm:$0xff]  }
 0x31e   :  { %8415 = vmatprep.subr.bf16.mxu1 %v12047_v23  ;;  %v12116_v23 = vld [vmem:[#allocation7 + $0xde4] ss:$16 sps:$4 sm:$0xff]  }
 0x320   :  { %7771 = vmatpush1.bf16.msra.mxu0 %v12042_v34  ;;  %v12119_v34 = vld [vmem:[#allocation7 + $0xdec] ss:$16 sps:$4 sm:$0xff]  }
 0x321   :  { %8416 = vmatpush1.bf16.msra.mxu1 %v12045_v3  ;;  %7772 = vmatprep.subr.bf16.mxu0 %v12050_v1  ;;  %v12114_v3 = vld [vmem:[#allocation7 + $0xde0] ss:$16 sps:$4 sm:$0xff]   ;;  %v12117_v1 = vld [vmem:[#allocation7 + $0xde8] ss:$16 sps:$4 sm:$0xff]  }
 0x322   :  { %8417 = vmatprep.subr.bf16.mxu1 %v12053_v58  ;;  %v12122_v58 = vld [vmem:[#allocation7 + $0xe04] ss:$16 sps:$4 sm:$0xff]  }
 0x324   :  { %7773 = vmatpush1.bf16.msra.mxu0 %v12048_v28  ;;  %v12125_v28 = vld [vmem:[#allocation7 + $0xe0c] ss:$16 sps:$4 sm:$0xff]  }
 0x325   :  { %8418 = vmatpush1.bf16.msra.mxu1 %v12051_v60  ;;  %7774 = vmatprep.subr.bf16.mxu0 %v12056_v6  ;;  %v12120_v60 = vld [vmem:[#allocation7 + $0xe00] ss:$16 sps:$4 sm:$0xff]   ;;  %v12123_v6 = vld [vmem:[#allocation7 + $0xe08] ss:$16 sps:$4 sm:$0xff]  }
 0x326   :  { %8419 = vmatprep.subr.bf16.mxu1 %v12059_v40  ;;  %v12128_v40 = vld [vmem:[#allocation7 + $0xe24] ss:$16 sps:$4 sm:$0xff]  }
 0x328   :  { %7775 = vmatpush1.bf16.msra.mxu0 %v12054_v39  ;;  %v14043_v39 = vld [vmem:[#allocation26_spill] sm:$0xff] }
 0x329   :  { %8420 = vmatpush1.bf16.msra.mxu1 %v12057_v29  ;;  %7776 = vmatprep.subr.bf16.mxu0 %v12062_v46  ;;  %v12131_v29 = vld [vmem:[#allocation7 + $0xe2c] ss:$16 sps:$4 sm:$0xff]   ;;  %v12126_v46 = vld [vmem:[#allocation7 + $0xe20] ss:$16 sps:$4 sm:$0xff]  }
 0x32a   :  { %8421 = vmatprep.subr.bf16.mxu1 %v12065_v45  ;;  %v12129_v45 = vld [vmem:[#allocation7 + $0xe28] ss:$16 sps:$4 sm:$0xff]  }
 0x32c   :  { %7777 = vmatpush1.bf16.msra.mxu0 %v12060_v57  ;;  %v12134_v57 = vld [vmem:[#allocation7 + $0xe44] ss:$16 sps:$4 sm:$0xff]  }
 0x32d   :  { %8422 = vmatpush1.bf16.msra.mxu1 %v12063_v21  ;;  %7778 = vmatprep.subr.bf16.mxu0 %v12068_v15  ;;  %v12137_v21 = vld [vmem:[#allocation7 + $0xe4c] ss:$16 sps:$4 sm:$0xff]   ;;  %v12132_v15 = vld [vmem:[#allocation7 + $0xe40] ss:$16 sps:$4 sm:$0xff]  }
 0x32e   :  { %8423 = vmatprep.subr.bf16.mxu1 %v12071_v14  ;;  %v12135_v14 = vld [vmem:[#allocation7 + $0xe48] ss:$16 sps:$4 sm:$0xff]  }
 0x330   :  { %7779 = vmatpush1.bf16.msra.mxu0 %v12066_v5  ;;  %v12140_v5 = vld [vmem:[#allocation7 + $0xe64] ss:$16 sps:$4 sm:$0xff]  }
 0x331   :  { %8424 = vmatpush1.bf16.msra.mxu1 %v12069_v11  ;;  %7780 = vmatprep.subr.bf16.mxu0 %v12074_v42  ;;  %v12143_v11 = vld [vmem:[#allocation7 + $0xe6c] ss:$16 sps:$4 sm:$0xff]   ;;  %v12138_v42 = vld [vmem:[#allocation7 + $0xe60] ss:$16 sps:$4 sm:$0xff]  }
 0x332   :  { %8425 = vmatprep.subr.bf16.mxu1 %v12077_v44  ;;  %v12141_v44 = vld [vmem:[#allocation7 + $0xe68] ss:$16 sps:$4 sm:$0xff]  }
 0x334   :  { %7781 = vmatpush1.bf16.msra.mxu0 %v12072_v0  ;;  %v12146_v0 = vld [vmem:[#allocation7 + $0xe84] ss:$16 sps:$4 sm:$0xff]  }
 0x335   :  { %8426 = vmatpush1.bf16.msra.mxu1 %v12075_v61  ;;  %7782 = vmatprep.subr.bf16.mxu0 %v12080_v50  ;;  %v12149_v61 = vld [vmem:[#allocation7 + $0xe8c] ss:$16 sps:$4 sm:$0xff]   ;;  %v12147_v50 = vld [vmem:[#allocation7 + $0xe88] ss:$16 sps:$4 sm:$0xff]  }
 0x336   :  { %8427 = vmatprep.subr.bf16.mxu1 %v12083_v52  ;;  %v12152_v52 = vld [vmem:[#allocation7 + $0xea4] ss:$16 sps:$4 sm:$0xff]  }
 0x338   :  { %7783 = vmatpush1.bf16.msra.mxu0 %v12078_v35  ;;  %v12155_v35 = vld [vmem:[#allocation7 + $0xeac] ss:$16 sps:$4 sm:$0xff]  }
 0x339   :  { %8428 = vmatpush1.bf16.msra.mxu1 %v12081_v24  ;;  %7784 = vmatprep.subr.bf16.mxu0 %v12086_v13  ;;  %v12150_v24 = vld [vmem:[#allocation7 + $0xea0] ss:$16 sps:$4 sm:$0xff]   ;;  %v12153_v13 = vld [vmem:[#allocation7 + $0xea8] ss:$16 sps:$4 sm:$0xff]  }
 0x33a   :  { %8429 = vmatprep.subr.bf16.mxu1 %v12089_v53  ;;  %v12158_v53 = vld [vmem:[#allocation7 + $0xec4] ss:$16 sps:$4 sm:$0xff]  }
 0x33c   :  { %7785 = vmatpush1.bf16.msra.mxu0 %v12084_v38  ;;  %v12161_v38 = vld [vmem:[#allocation7 + $0xecc] ss:$16 sps:$4 sm:$0xff]  }
 0x33d   :  { %8430 = vmatpush1.bf16.msra.mxu1 %v12087_v33  ;;  %7786 = vmatprep.subr.bf16.mxu0 %v12092_v32  ;;  %v12156_v33 = vld [vmem:[#allocation7 + $0xec0] ss:$16 sps:$4 sm:$0xff]   ;;  %v12159_v32 = vld [vmem:[#allocation7 + $0xec8] ss:$16 sps:$4 sm:$0xff]  }
 0x33e   :  { %8431 = vmatprep.subr.bf16.mxu1 %v12095_v47  ;;  %v12164_v47 = vld [vmem:[#allocation7 + $0xee4] ss:$16 sps:$4 sm:$0xff]  }
 0x340   :  { %7787 = vmatpush1.bf16.msra.mxu0 %v12090_v54  ;;  %v12167_v54 = vld [vmem:[#allocation7 + $0xeec] ss:$16 sps:$4 sm:$0xff]  }
 0x341   :  { %8432 = vmatpush1.bf16.msra.mxu1 %v12093_v51  ;;  %7788 = vmatprep.subr.bf16.mxu0 %v12098_v30  ;;  %v12162_v51 = vld [vmem:[#allocation7 + $0xee0] ss:$16 sps:$4 sm:$0xff]   ;;  %v12165_v30 = vld [vmem:[#allocation7 + $0xee8] ss:$16 sps:$4 sm:$0xff]  }
 0x342   :  { %8433 = vmatprep.subr.bf16.mxu1 %v12101_v2  ;;  %v12170_v2 = vld [vmem:[#allocation7 + $0xf04] ss:$16 sps:$4 sm:$0xff]  }
 0x344   :  { %7789 = vmatpush1.bf16.msra.mxu0 %v12096_v20  ;;  %v12173_v20 = vld [vmem:[#allocation7 + $0xf0c] ss:$16 sps:$4 sm:$0xff]  }
 0x345   :  { %8434 = vmatpush1.bf16.msra.mxu1 %v12099_v37  ;;  %7790 = vmatprep.subr.bf16.mxu0 %v12104_v4  ;;  %v12168_v37 = vld [vmem:[#allocation7 + $0xf00] ss:$16 sps:$4 sm:$0xff]   ;;  %v12171_v4 = vld [vmem:[#allocation7 + $0xf08] ss:$16 sps:$4 sm:$0xff]  }
 0x346   :  { %8435 = vmatprep.subr.bf16.mxu1 %v12107_v43  ;;  %v12176_v43 = vld [vmem:[#allocation7 + $0xf24] ss:$16 sps:$4 sm:$0xff]  }
 0x348   :  { %7791 = vmatpush1.bf16.msra.mxu0 %v12102_v8  ;;  %v12179_v8 = vld [vmem:[#allocation7 + $0xf2c] ss:$16 sps:$4 sm:$0xff]  }
 0x349   :  { %8436 = vmatpush1.bf16.msra.mxu1 %v12105_v17  ;;  %7792 = vmatprep.subr.bf16.mxu0 %v12110_v59  ;;  %v12174_v17 = vld [vmem:[#allocation7 + $0xf20] ss:$16 sps:$4 sm:$0xff]   ;;  %v12177_v59 = vld [vmem:[#allocation7 + $0xf28] ss:$16 sps:$4 sm:$0xff]  }
 0x34a   :  { %8437 = vmatprep.subr.bf16.mxu1 %v12113_v27  ;;  %v12182_v27 = vld [vmem:[#allocation7 + $0xf44] ss:$16 sps:$4 sm:$0xff]  }
 0x34c   :  { %7793 = vmatpush1.bf16.msra.mxu0 %v12108_v56  ;;  %v12185_v56 = vld [vmem:[#allocation7 + $0xf4c] ss:$16 sps:$4 sm:$0xff]  }
 0x34d   :  { %8438 = vmatpush1.bf16.msra.mxu1 %v12111_v22  ;;  %7794 = vmatprep.subr.bf16.mxu0 %v12116_v23  ;;  %v12180_v22 = vld [vmem:[#allocation7 + $0xf40] ss:$16 sps:$4 sm:$0xff]   ;;  %v12183_v23 = vld [vmem:[#allocation7 + $0xf48] ss:$16 sps:$4 sm:$0xff]  }
 0x34e   :  { %8439 = vmatprep.subr.bf16.mxu1 %v12119_v34  ;;  %v12188_v34 = vld [vmem:[#allocation7 + $0xf64] ss:$16 sps:$4 sm:$0xff]  }
 0x350   :  { %7795 = vmatpush1.bf16.msra.mxu0 %v12114_v3  ;;  %v12191_v3 = vld [vmem:[#allocation7 + $0xf6c] ss:$16 sps:$4 sm:$0xff]  }
 0x351   :  { %8440 = vmatpush1.bf16.msra.mxu1 %v12117_v1  ;;  %7807 = vmatprep.subr.bf16.mxu0 %v12122_v58  ;;  %v12186_v1 = vld [vmem:[#allocation7 + $0xf60] ss:$16 sps:$4 sm:$0xff]   ;;  %v12189_v58 = vld [vmem:[#allocation7 + $0xf68] ss:$16 sps:$4 sm:$0xff]  }
 0x352   :  { %8452 = vmatprep.subr.bf16.mxu1 %v12125_v28  ;;  %v12194_v28 = vld [vmem:[#allocation7 + $0xf84] ss:$16 sps:$4 sm:$0xff]  }
 0x353   :  { %7797 = vmatmul.mubr.bf16.vlgmr.msra.gmra.mrb[36].mxu0 %v14043_v39 }
 0x354   :  { %8442 = vmatmul.mubr.bf16.vlgmr.msra.gmra.mrb[36].mxu1 %v14043_v39  ;;  %7808 = vmatpush1.bf16.msra.mxu0 %v12120_v60  ;;  %v12197_v60 = vld [vmem:[#allocation7 + $0xf8c] ss:$16 sps:$4 sm:$0xff]   ;;  %v12200_v39 = vld [vmem:[#allocation7 + $0xfa4] ss:$16 sps:$4 sm:$0xff]  }
 0x355   :  { %7839 = vmatprep.mubr.bf16.mxu0 %v13811_v62  ;;  %8453 = vmatpush1.bf16.msra.mxu1 %v12123_v6  ;;  %v12192_v6 = vld [vmem:[#allocation7 + $0xf80] ss:$16 sps:$4 sm:$0xff]  }
 0x356   :  { %8484 = vmatprep.mubr.bf16.mxu1 %v13811_v62  ;;  %7809 = vmatprep.subr.bf16.mxu0 %v12128_v40  ;;  %v12144_v62 = vld [vmem:[#allocation7 + $0xe80] ss:$16 sps:$4 sm:$0xff]   ;;  %v12195_v40 = vld [vmem:[#allocation7 + $0xf88] ss:$16 sps:$4 sm:$0xff]  }
 0x357   :  { %8454 = vmatprep.subr.bf16.mxu1 %v12131_v29  ;;  %v12203_v29 = vld [vmem:[#allocation7 + $0xfac] ss:$16 sps:$4 sm:$0xff]  }
 0x358   :  { %7810 = vmatpush1.bf16.msra.mxu0 %v12126_v46  ;;  %v12198_v46 = vld [vmem:[#allocation7 + $0xfa0] ss:$16 sps:$4 sm:$0xff]  }
 0x359   :  { %8455 = vmatpush1.bf16.msra.mxu1 %v12129_v45  ;;  %7811 = vmatprep.subr.bf16.mxu0 %v12134_v57  ;;  %v12201_v45 = vld [vmem:[#allocation7 + $0xfa8] ss:$16 sps:$4 sm:$0xff]   ;;  %v12206_v57 = vld [vmem:[#allocation7 + $0xfc4] ss:$16 sps:$4 sm:$0xff]  }
 0x35a   :  { %8456 = vmatprep.subr.bf16.mxu1 %v12137_v21  ;;  %v12209_v21 = vld [vmem:[#allocation7 + $0xfcc] ss:$16 sps:$4 sm:$0xff]  }
 0x35c   :  { %7812 = vmatpush1.bf16.msra.mxu0 %v12132_v15  ;;  %v12204_v15 = vld [vmem:[#allocation7 + $0xfc0] ss:$16 sps:$4 sm:$0xff]  }
 0x35d   :  { %8457 = vmatpush1.bf16.msra.mxu1 %v12135_v14  ;;  %7813 = vmatprep.subr.bf16.mxu0 %v12140_v5  ;;  %v12207_v14 = vld [vmem:[#allocation7 + $0xfc8] ss:$16 sps:$4 sm:$0xff]   ;;  %v12212_v5 = vld [vmem:[#allocation7 + $0xfe4] ss:$16 sps:$4 sm:$0xff]  }
 0x35e   :  { %8458 = vmatprep.subr.bf16.mxu1 %v12143_v11  ;;  %v12215_v11 = vld [vmem:[#allocation7 + $0xfec] ss:$16 sps:$4 sm:$0xff]  }
 0x360   :  { %7814 = vmatpush1.bf16.msra.mxu0 %v12138_v42  ;;  %v12210_v42 = vld [vmem:[#allocation7 + $0xfe0] ss:$16 sps:$4 sm:$0xff]  }
 0x361   :  { %8459 = vmatpush1.bf16.msra.mxu1 %v12141_v44  ;;  %7815 = vmatprep.subr.bf16.mxu0 %v12146_v0  ;;  %v12213_v44 = vld [vmem:[#allocation7 + $0xfe8] ss:$16 sps:$4 sm:$0xff]   ;;  %v12218_v0 = vld [vmem:[#allocation7 + $0x1004] ss:$16 sps:$4 sm:$0xff]  }
 0x362   :  { %8460 = vmatprep.subr.bf16.mxu1 %v12149_v61  ;;  %v12221_v61 = vld [vmem:[#allocation7 + $0x100c] ss:$16 sps:$4 sm:$0xff]  }
 0x364   :  { %7816 = vmatpush1.bf16.msra.mxu0 %v12144_v62  ;;  %v12216_v62 = vld [vmem:[#allocation7 + $0x1000] ss:$16 sps:$4 sm:$0xff]  }
 0x365   :  { %8461 = vmatpush1.bf16.msra.mxu1 %v12147_v50  ;;  %7817 = vmatprep.subr.bf16.mxu0 %v12152_v52  ;;  %v12219_v50 = vld [vmem:[#allocation7 + $0x1008] ss:$16 sps:$4 sm:$0xff]   ;;  %v12224_v52 = vld [vmem:[#allocation7 + $0x1024] ss:$16 sps:$4 sm:$0xff]  }
 0x366   :  { %8462 = vmatprep.subr.bf16.mxu1 %v12155_v35  ;;  %v12227_v35 = vld [vmem:[#allocation7 + $0x102c] ss:$16 sps:$4 sm:$0xff]  }
 0x368   :  { %7818 = vmatpush1.bf16.msra.mxu0 %v12150_v24  ;;  %v12222_v24 = vld [vmem:[#allocation7 + $0x1020] ss:$16 sps:$4 sm:$0xff]  }
 0x369   :  { %8463 = vmatpush1.bf16.msra.mxu1 %v12153_v13  ;;  %7819 = vmatprep.subr.bf16.mxu0 %v12158_v53  ;;  %v12225_v13 = vld [vmem:[#allocation7 + $0x1028] ss:$16 sps:$4 sm:$0xff]   ;;  %v12230_v53 = vld [vmem:[#allocation7 + $0x1044] ss:$16 sps:$4 sm:$0xff]  }
 0x36a   :  { %8464 = vmatprep.subr.bf16.mxu1 %v12161_v38  ;;  %v12233_v38 = vld [vmem:[#allocation7 + $0x104c] ss:$16 sps:$4 sm:$0xff]  }
 0x36c   :  { %7820 = vmatpush1.bf16.msra.mxu0 %v12156_v33  ;;  %v12228_v33 = vld [vmem:[#allocation7 + $0x1040] ss:$16 sps:$4 sm:$0xff]  }
 0x36d   :  { %8465 = vmatpush1.bf16.msra.mxu1 %v12159_v32  ;;  %7821 = vmatprep.subr.bf16.mxu0 %v12164_v47  ;;  %v12231_v32 = vld [vmem:[#allocation7 + $0x1048] ss:$16 sps:$4 sm:$0xff]   ;;  %v12236_v47 = vld [vmem:[#allocation7 + $0x1064] ss:$16 sps:$4 sm:$0xff]  }
 0x36e   :  { %8466 = vmatprep.subr.bf16.mxu1 %v12167_v54  ;;  %v12234_v54 = vld [vmem:[#allocation7 + $0x1060] ss:$16 sps:$4 sm:$0xff]  }
 0x370   :  { %7822 = vmatpush1.bf16.msra.mxu0 %v12162_v51  ;;  %v12237_v51 = vld [vmem:[#allocation7 + $0x1068] ss:$16 sps:$4 sm:$0xff]  }
 0x371   :  { %8467 = vmatpush1.bf16.msra.mxu1 %v12165_v30  ;;  %7823 = vmatprep.subr.bf16.mxu0 %v12170_v2  ;;  %v12242_v30 = vld [vmem:[#allocation7 + $0x1084] ss:$16 sps:$4 sm:$0xff]   ;;  %v12245_v2 = vld [vmem:[#allocation7 + $0x108c] ss:$16 sps:$4 sm:$0xff]  }
 0x372   :  { %8468 = vmatprep.subr.bf16.mxu1 %v12173_v20  ;;  %v12243_v20 = vld [vmem:[#allocation7 + $0x1088] ss:$16 sps:$4 sm:$0xff]  }
 0x374   :  { %7824 = vmatpush1.bf16.msra.mxu0 %v12168_v37  ;;  %v12248_v37 = vld [vmem:[#allocation7 + $0x10a4] ss:$16 sps:$4 sm:$0xff]  }
 0x375   :  { %8469 = vmatpush1.bf16.msra.mxu1 %v12171_v4  ;;  %7825 = vmatprep.subr.bf16.mxu0 %v12176_v43  ;;  %v12251_v4 = vld [vmem:[#allocation7 + $0x10ac] ss:$16 sps:$4 sm:$0xff]   ;;  %v12246_v43 = vld [vmem:[#allocation7 + $0x10a0] ss:$16 sps:$4 sm:$0xff]  }
 0x376   :  { %8470 = vmatprep.subr.bf16.mxu1 %v12179_v8  ;;  %v12249_v8 = vld [vmem:[#allocation7 + $0x10a8] ss:$16 sps:$4 sm:$0xff]  }
 0x378   :  { %7826 = vmatpush1.bf16.msra.mxu0 %v12174_v17  ;;  %v12254_v17 = vld [vmem:[#allocation7 + $0x10c4] ss:$16 sps:$4 sm:$0xff]  }
 0x379   :  { %8471 = vmatpush1.bf16.msra.mxu1 %v12177_v59  ;;  %7827 = vmatprep.subr.bf16.mxu0 %v12182_v27  ;;  %v12257_v59 = vld [vmem:[#allocation7 + $0x10cc] ss:$16 sps:$4 sm:$0xff]   ;;  %v12252_v27 = vld [vmem:[#allocation7 + $0x10c0] ss:$16 sps:$4 sm:$0xff]  }
 0x37a   :  { %8472 = vmatprep.subr.bf16.mxu1 %v12185_v56  ;;  %v12255_v56 = vld [vmem:[#allocation7 + $0x10c8] ss:$16 sps:$4 sm:$0xff]  }
 0x37c   :  { %7828 = vmatpush1.bf16.msra.mxu0 %v12180_v22  ;;  %v12260_v22 = vld [vmem:[#allocation7 + $0x10e4] ss:$16 sps:$4 sm:$0xff]  }
 0x37d   :  { %8473 = vmatpush1.bf16.msra.mxu1 %v12183_v23  ;;  %7829 = vmatprep.subr.bf16.mxu0 %v12188_v34  ;;  %v12263_v23 = vld [vmem:[#allocation7 + $0x10ec] ss:$16 sps:$4 sm:$0xff]   ;;  %v12258_v34 = vld [vmem:[#allocation7 + $0x10e0] ss:$16 sps:$4 sm:$0xff]  }
 0x37e   :  { %8474 = vmatprep.subr.bf16.mxu1 %v12191_v3  ;;  %v12261_v3 = vld [vmem:[#allocation7 + $0x10e8] ss:$16 sps:$4 sm:$0xff]  }
 0x380   :  { %7830 = vmatpush1.bf16.msra.mxu0 %v12186_v1  ;;  %v12266_v1 = vld [vmem:[#allocation7 + $0x1104] ss:$16 sps:$4 sm:$0xff]  }
 0x381   :  { %8475 = vmatpush1.bf16.msra.mxu1 %v12189_v58  ;;  %7831 = vmatprep.subr.bf16.mxu0 %v12194_v28  ;;  %v12269_v58 = vld [vmem:[#allocation7 + $0x110c] ss:$16 sps:$4 sm:$0xff]   ;;  %v12264_v28 = vld [vmem:[#allocation7 + $0x1100] ss:$16 sps:$4 sm:$0xff]  }
 0x382   :  { %8476 = vmatprep.subr.bf16.mxu1 %v12197_v60  ;;  %v12267_v60 = vld [vmem:[#allocation7 + $0x1108] ss:$16 sps:$4 sm:$0xff]  }
 0x384   :  { %7832 = vmatpush1.bf16.msra.mxu0 %v12192_v6  ;;  %v12272_v6 = vld [vmem:[#allocation7 + $0x1124] ss:$16 sps:$4 sm:$0xff]  }
 0x385   :  { %8477 = vmatpush1.bf16.msra.mxu1 %v12195_v40  ;;  %7833 = vmatprep.subr.bf16.mxu0 %v12200_v39  ;;  %v12275_v40 = vld [vmem:[#allocation7 + $0x112c] ss:$16 sps:$4 sm:$0xff]   ;;  %v12270_v39 = vld [vmem:[#allocation7 + $0x1120] ss:$16 sps:$4 sm:$0xff]  }
 0x386   :  { %8478 = vmatprep.subr.bf16.mxu1 %v12203_v29  ;;  %v12273_v29 = vld [vmem:[#allocation7 + $0x1128] ss:$16 sps:$4 sm:$0xff]  }
 0x388   :  { %7834 = vmatpush1.bf16.msra.mxu0 %v12198_v46  ;;  %v12278_v46 = vld [vmem:[#allocation7 + $0x1144] ss:$16 sps:$4 sm:$0xff]  }
 0x389   :  { %8479 = vmatpush1.bf16.msra.mxu1 %v12201_v45  ;;  %7835 = vmatprep.subr.bf16.mxu0 %v12206_v57  ;;  %v12281_v45 = vld [vmem:[#allocation7 + $0x114c] ss:$16 sps:$4 sm:$0xff]   ;;  %v12276_v57 = vld [vmem:[#allocation7 + $0x1140] ss:$16 sps:$4 sm:$0xff]  }
 0x38a   :  { %8480 = vmatprep.subr.bf16.mxu1 %v12209_v21  ;;  %v12279_v21 = vld [vmem:[#allocation7 + $0x1148] ss:$16 sps:$4 sm:$0xff]  }
 0x38c   :  { %7836 = vmatpush1.bf16.msra.mxu0 %v12204_v15  ;;  %v12284_v15 = vld [vmem:[#allocation7 + $0x1164] ss:$16 sps:$4 sm:$0xff]  }
 0x38d   :  { %8481 = vmatpush1.bf16.msra.mxu1 %v12207_v14  ;;  %7837 = vmatprep.subr.bf16.mxu0 %v12212_v5  ;;  %v12287_v14 = vld [vmem:[#allocation7 + $0x116c] ss:$16 sps:$4 sm:$0xff]   ;;  %v12282_v5 = vld [vmem:[#allocation7 + $0x1160] ss:$16 sps:$4 sm:$0xff]  }
 0x38e   :  { %8482 = vmatprep.subr.bf16.mxu1 %v12215_v11  ;;  %v12285_v11 = vld [vmem:[#allocation7 + $0x1168] ss:$16 sps:$4 sm:$0xff]  }
 0x390   :  { %7838 = vmatpush1.bf16.msra.mxu0 %v12210_v42  ;;  %v12290_v42 = vld [vmem:[#allocation7 + $0x1184] ss:$16 sps:$4 sm:$0xff]  }
 0x391   :  { %8483 = vmatpush1.bf16.msra.mxu1 %v12213_v44  ;;  %7850 = vmatprep.subr.bf16.mxu0 %v12218_v0  ;;  %v12293_v44 = vld [vmem:[#allocation7 + $0x118c] ss:$16 sps:$4 sm:$0xff]   ;;  %v12288_v0 = vld [vmem:[#allocation7 + $0x1180] ss:$16 sps:$4 sm:$0xff]  }
 0x392   :  { %8495 = vmatprep.subr.bf16.mxu1 %v12221_v61  ;;  %v12291_v61 = vld [vmem:[#allocation7 + $0x1188] ss:$16 sps:$4 sm:$0xff]  }
 0x393   :  { %7840 = vmatmul.mubr.bf16.vlgmr.msra.gmra.mrb[36].mxu0 %v13818_v25 }
 0x394   :  { %8485 = vmatmul.mubr.bf16.vlgmr.msra.gmra.mrb[36].mxu1 %v13818_v25  ;;  %7851 = vmatpush1.bf16.msra.mxu0 %v12216_v62  ;;  %v12239_v25 = vld [vmem:[#allocation7 + $0x106c] ss:$16 sps:$4 sm:$0xff]   ;;  %v12296_v62 = vld [vmem:[#allocation7 + $0x11a4] ss:$16 sps:$4 sm:$0xff]  }
 0x395   :  { %7882 = vmatprep.mubr.bf16.mxu0 %v13823_v63  ;;  %8496 = vmatpush1.bf16.msra.mxu1 %v12219_v50  ;;  %v12299_v50 = vld [vmem:[#allocation7 + $0x11ac] ss:$16 sps:$4 sm:$0xff]  }
 0x396   :  { %8527 = vmatprep.mubr.bf16.mxu1 %v13823_v63  ;;  %7852 = vmatprep.subr.bf16.mxu0 %v12224_v52  ;;  %v12240_v63 = vld [vmem:[#allocation7 + $0x1080] ss:$16 sps:$4 sm:$0xff]  }
 0x397   :  { %8497 = vmatprep.subr.bf16.mxu1 %v12227_v35  ;;  %v12294_v52 = vld [vmem:[#allocation7 + $0x11a0] ss:$16 sps:$4 sm:$0xff]   ;;  %v12297_v35 = vld [vmem:[#allocation7 + $0x11a8] ss:$16 sps:$4 sm:$0xff]  }
 0x398   :  { %7853 = vmatpush1.bf16.msra.mxu0 %v12222_v24  ;;  %v12302_v24 = vld [vmem:[#allocation7 + $0x11c4] ss:$16 sps:$4 sm:$0xff]  }
 0x399   :  { %8498 = vmatpush1.bf16.msra.mxu1 %v12225_v13  ;;  %7854 = vmatprep.subr.bf16.mxu0 %v12230_v53  ;;  %v12305_v13 = vld [vmem:[#allocation7 + $0x11cc] ss:$16 sps:$4 sm:$0xff]   ;;  %v12300_v53 = vld [vmem:[#allocation7 + $0x11c0] ss:$16 sps:$4 sm:$0xff]  }
 0x39a   :  { %8499 = vmatprep.subr.bf16.mxu1 %v12233_v38  ;;  %v12303_v38 = vld [vmem:[#allocation7 + $0x11c8] ss:$16 sps:$4 sm:$0xff]  }
 0x39c   :  { %7855 = vmatpush1.bf16.msra.mxu0 %v12228_v33  ;;  %v12308_v33 = vld [vmem:[#allocation7 + $0x11e4] ss:$16 sps:$4 sm:$0xff]  }
 0x39d   :  { %8500 = vmatpush1.bf16.msra.mxu1 %v12231_v32  ;;  %7856 = vmatprep.subr.bf16.mxu0 %v12236_v47  ;;  %v12311_v32 = vld [vmem:[#allocation7 + $0x11ec] ss:$16 sps:$4 sm:$0xff]   ;;  %v12306_v47 = vld [vmem:[#allocation7 + $0x11e0] ss:$16 sps:$4 sm:$0xff]  }
 0x39e   :  { %8501 = vmatprep.subr.bf16.mxu1 %v12239_v25  ;;  %v12309_v25 = vld [vmem:[#allocation7 + $0x11e8] ss:$16 sps:$4 sm:$0xff]  }
 0x3a0   :  { %7857 = vmatpush1.bf16.msra.mxu0 %v12234_v54  ;;  %v12314_v54 = vld [vmem:[#allocation7 + $0x1204] ss:$16 sps:$4 sm:$0xff]  }
 0x3a1   :  { %8502 = vmatpush1.bf16.msra.mxu1 %v12237_v51  ;;  %7858 = vmatprep.subr.bf16.mxu0 %v12242_v30  ;;  %v12317_v51 = vld [vmem:[#allocation7 + $0x120c] ss:$16 sps:$4 sm:$0xff]   ;;  %v12312_v30 = vld [vmem:[#allocation7 + $0x1200] ss:$16 sps:$4 sm:$0xff]  }
 0x3a2   :  { %8503 = vmatprep.subr.bf16.mxu1 %v12245_v2  ;;  %v12315_v2 = vld [vmem:[#allocation7 + $0x1208] ss:$16 sps:$4 sm:$0xff]  }
 0x3a4   :  { %7859 = vmatpush1.bf16.msra.mxu0 %v12240_v63  ;;  %v12320_v63 = vld [vmem:[#allocation7 + $0x1224] ss:$16 sps:$4 sm:$0xff]  }
 0x3a5   :  { %8504 = vmatpush1.bf16.msra.mxu1 %v12243_v20  ;;  %7860 = vmatprep.subr.bf16.mxu0 %v12248_v37  ;;  %v12323_v20 = vld [vmem:[#allocation7 + $0x122c] ss:$16 sps:$4 sm:$0xff]   ;;  %v12318_v37 = vld [vmem:[#allocation7 + $0x1220] ss:$16 sps:$4 sm:$0xff]  }
 0x3a6   :  { %8505 = vmatprep.subr.bf16.mxu1 %v12251_v4  ;;  %v12321_v4 = vld [vmem:[#allocation7 + $0x1228] ss:$16 sps:$4 sm:$0xff]  }
 0x3a8   :  { %7861 = vmatpush1.bf16.msra.mxu0 %v12246_v43  ;;  %v12326_v43 = vld [vmem:[#allocation7 + $0x1244] ss:$16 sps:$4 sm:$0xff]  }
 0x3a9   :  { %8506 = vmatpush1.bf16.msra.mxu1 %v12249_v8  ;;  %7862 = vmatprep.subr.bf16.mxu0 %v12254_v17  ;;  %v12329_v8 = vld [vmem:[#allocation7 + $0x124c] ss:$16 sps:$4 sm:$0xff]   ;;  %v12324_v17 = vld [vmem:[#allocation7 + $0x1240] ss:$16 sps:$4 sm:$0xff]  }
 0x3aa   :  { %8507 = vmatprep.subr.bf16.mxu1 %v12257_v59  ;;  %v12327_v59 = vld [vmem:[#allocation7 + $0x1248] ss:$16 sps:$4 sm:$0xff]  }
 0x3ac   :  { %7863 = vmatpush1.bf16.msra.mxu0 %v12252_v27  ;;  %v12332_v27 = vld [vmem:[#allocation7 + $0x1264] ss:$16 sps:$4 sm:$0xff]  }
 0x3ad   :  { %8508 = vmatpush1.bf16.msra.mxu1 %v12255_v56  ;;  %7864 = vmatprep.subr.bf16.mxu0 %v12260_v22  ;;  %v12330_v56 = vld [vmem:[#allocation7 + $0x1260] ss:$16 sps:$4 sm:$0xff]   ;;  %v12333_v22 = vld [vmem:[#allocation7 + $0x1268] ss:$16 sps:$4 sm:$0xff]  }
 0x3ae   :  { %8509 = vmatprep.subr.bf16.mxu1 %v12263_v23  ;;  %v12338_v23 = vld [vmem:[#allocation7 + $0x1284] ss:$16 sps:$4 sm:$0xff]  }
 0x3b0   :  { %7865 = vmatpush1.bf16.msra.mxu0 %v12258_v34  ;;  %v12341_v34 = vld [vmem:[#allocation7 + $0x128c] ss:$16 sps:$4 sm:$0xff]  }
 0x3b1   :  { %8510 = vmatpush1.bf16.msra.mxu1 %v12261_v3  ;;  %7866 = vmatprep.subr.bf16.mxu0 %v12266_v1  ;;  %v12339_v3 = vld [vmem:[#allocation7 + $0x1288] ss:$16 sps:$4 sm:$0xff]   ;;  %v12344_v1 = vld [vmem:[#allocation7 + $0x12a4] ss:$16 sps:$4 sm:$0xff]  }
 0x3b2   :  { %8511 = vmatprep.subr.bf16.mxu1 %v12269_v58  ;;  %v12347_v58 = vld [vmem:[#allocation7 + $0x12ac] ss:$16 sps:$4 sm:$0xff]  }
 0x3b4   :  { %7867 = vmatpush1.bf16.msra.mxu0 %v12264_v28  ;;  %v12342_v28 = vld [vmem:[#allocation7 + $0x12a0] ss:$16 sps:$4 sm:$0xff]  }
 0x3b5   :  { %8512 = vmatpush1.bf16.msra.mxu1 %v12267_v60  ;;  %7868 = vmatprep.subr.bf16.mxu0 %v12272_v6  ;;  %v12345_v60 = vld [vmem:[#allocation7 + $0x12a8] ss:$16 sps:$4 sm:$0xff]   ;;  %v12350_v6 = vld [vmem:[#allocation7 + $0x12c4] ss:$16 sps:$4 sm:$0xff]  }
 0x3b6   :  { %8513 = vmatprep.subr.bf16.mxu1 %v12275_v40  ;;  %v12353_v40 = vld [vmem:[#allocation7 + $0x12cc] ss:$16 sps:$4 sm:$0xff]  }
 0x3b8   :  { %7869 = vmatpush1.bf16.msra.mxu0 %v12270_v39  ;;  %v12348_v39 = vld [vmem:[#allocation7 + $0x12c0] ss:$16 sps:$4 sm:$0xff]  }
 0x3b9   :  { %8514 = vmatpush1.bf16.msra.mxu1 %v12273_v29  ;;  %7870 = vmatprep.subr.bf16.mxu0 %v12278_v46  ;;  %v12351_v29 = vld [vmem:[#allocation7 + $0x12c8] ss:$16 sps:$4 sm:$0xff]   ;;  %v12356_v46 = vld [vmem:[#allocation7 + $0x12e4] ss:$16 sps:$4 sm:$0xff]  }
 0x3ba   :  { %8515 = vmatprep.subr.bf16.mxu1 %v12281_v45  ;;  %v12359_v45 = vld [vmem:[#allocation7 + $0x12ec] ss:$16 sps:$4 sm:$0xff]  }
 0x3bc   :  { %7871 = vmatpush1.bf16.msra.mxu0 %v12276_v57  ;;  %v12354_v57 = vld [vmem:[#allocation7 + $0x12e0] ss:$16 sps:$4 sm:$0xff]  }
 0x3bd   :  { %8516 = vmatpush1.bf16.msra.mxu1 %v12279_v21  ;;  %7872 = vmatprep.subr.bf16.mxu0 %v12284_v15  ;;  %v12357_v21 = vld [vmem:[#allocation7 + $0x12e8] ss:$16 sps:$4 sm:$0xff]   ;;  %v12362_v15 = vld [vmem:[#allocation7 + $0x1304] ss:$16 sps:$4 sm:$0xff]  }
 0x3be   :  { %8517 = vmatprep.subr.bf16.mxu1 %v12287_v14  ;;  %v12365_v14 = vld [vmem:[#allocation7 + $0x130c] ss:$16 sps:$4 sm:$0xff]  }
 0x3c0   :  { %7873 = vmatpush1.bf16.msra.mxu0 %v12282_v5  ;;  %v12360_v5 = vld [vmem:[#allocation7 + $0x1300] ss:$16 sps:$4 sm:$0xff]  }
 0x3c1   :  { %8518 = vmatpush1.bf16.msra.mxu1 %v12285_v11  ;;  %7874 = vmatprep.subr.bf16.mxu0 %v12290_v42  ;;  %v12363_v11 = vld [vmem:[#allocation7 + $0x1308] ss:$16 sps:$4 sm:$0xff]   ;;  %v12368_v42 = vld [vmem:[#allocation7 + $0x1324] ss:$16 sps:$4 sm:$0xff]  }
 0x3c2   :  { %8519 = vmatprep.subr.bf16.mxu1 %v12293_v44  ;;  %v12371_v44 = vld [vmem:[#allocation7 + $0x132c] ss:$16 sps:$4 sm:$0xff]  }
 0x3c4   :  { %7875 = vmatpush1.bf16.msra.mxu0 %v12288_v0  ;;  %v12366_v0 = vld [vmem:[#allocation7 + $0x1320] ss:$16 sps:$4 sm:$0xff]  }
 0x3c5   :  { %8520 = vmatpush1.bf16.msra.mxu1 %v12291_v61  ;;  %7876 = vmatprep.subr.bf16.mxu0 %v12296_v62  ;;  %v12369_v61 = vld [vmem:[#allocation7 + $0x1328] ss:$16 sps:$4 sm:$0xff]   ;;  %v12374_v62 = vld [vmem:[#allocation7 + $0x1344] ss:$16 sps:$4 sm:$0xff]  }
 0x3c6   :  { %8521 = vmatprep.subr.bf16.mxu1 %v12299_v50  ;;  %v12377_v50 = vld [vmem:[#allocation7 + $0x134c] ss:$16 sps:$4 sm:$0xff]  }
 0x3c8   :  { %7877 = vmatpush1.bf16.msra.mxu0 %v12294_v52  ;;  %v12372_v52 = vld [vmem:[#allocation7 + $0x1340] ss:$16 sps:$4 sm:$0xff]  }
 0x3c9   :  { %8522 = vmatpush1.bf16.msra.mxu1 %v12297_v35  ;;  %7878 = vmatprep.subr.bf16.mxu0 %v12302_v24  ;;  %v12375_v35 = vld [vmem:[#allocation7 + $0x1348] ss:$16 sps:$4 sm:$0xff]   ;;  %v12380_v24 = vld [vmem:[#allocation7 + $0x1364] ss:$16 sps:$4 sm:$0xff]  }
 0x3ca   :  { %8523 = vmatprep.subr.bf16.mxu1 %v12305_v13  ;;  %v12383_v13 = vld [vmem:[#allocation7 + $0x136c] ss:$16 sps:$4 sm:$0xff]  }
 0x3cc   :  { %7879 = vmatpush1.bf16.msra.mxu0 %v12300_v53  ;;  %v12378_v53 = vld [vmem:[#allocation7 + $0x1360] ss:$16 sps:$4 sm:$0xff]  }
 0x3cd   :  { %8524 = vmatpush1.bf16.msra.mxu1 %v12303_v38  ;;  %7880 = vmatprep.subr.bf16.mxu0 %v12308_v33  ;;  %v12381_v38 = vld [vmem:[#allocation7 + $0x1368] ss:$16 sps:$4 sm:$0xff]   ;;  %v12386_v33 = vld [vmem:[#allocation7 + $0x1384] ss:$16 sps:$4 sm:$0xff]  }
 0x3ce   :  { %8525 = vmatprep.subr.bf16.mxu1 %v12311_v32  ;;  %v12389_v32 = vld [vmem:[#allocation7 + $0x138c] ss:$16 sps:$4 sm:$0xff]  }
 0x3d0   :  { %7881 = vmatpush1.bf16.msra.mxu0 %v12306_v47  ;;  %v12384_v47 = vld [vmem:[#allocation7 + $0x1380] ss:$16 sps:$4 sm:$0xff]  }
 0x3d1   :  { %8526 = vmatpush1.bf16.msra.mxu1 %v12309_v25  ;;  %7893 = vmatprep.subr.bf16.mxu0 %v12314_v54  ;;  %v12387_v25 = vld [vmem:[#allocation7 + $0x1388] ss:$16 sps:$4 sm:$0xff]   ;;  %v12392_v54 = vld [vmem:[#allocation7 + $0x13a4] ss:$16 sps:$4 sm:$0xff]  }
 0x3d2   :  { %8538 = vmatprep.subr.bf16.mxu1 %v12317_v51  ;;  %v12395_v51 = vld [vmem:[#allocation7 + $0x13ac] ss:$16 sps:$4 sm:$0xff]  }
 0x3d3   :  { %7883 = vmatmul.mubr.bf16.vlgmr.msra.gmra.mrb[36].mxu0 %v13827_v49 }
 0x3d4   :  { %8528 = vmatmul.mubr.bf16.vlgmr.msra.gmra.mrb[36].mxu1 %v13827_v49  ;;  %7894 = vmatpush1.bf16.msra.mxu0 %v12312_v30  ;;  %v12335_v49 = vld [vmem:[#allocation7 + $0x126c] ss:$16 sps:$4 sm:$0xff]   ;;  %v12390_v30 = vld [vmem:[#allocation7 + $0x13a0] ss:$16 sps:$4 sm:$0xff]  }
 0x3d5   :  { %7925 = vmatprep.mubr.bf16.mxu0 %v13622_v31  ;;  %8539 = vmatpush1.bf16.msra.mxu1 %v12315_v2  ;;  %v12393_v2 = vld [vmem:[#allocation7 + $0x13a8] ss:$16 sps:$4 sm:$0xff]  }
 0x3d6   :  { %8570 = vmatprep.mubr.bf16.mxu1 %v13622_v31  ;;  %7895 = vmatprep.subr.bf16.mxu0 %v12320_v63  ;;  %v12336_v31 = vld [vmem:[#allocation7 + $0x1280] ss:$16 sps:$4 sm:$0xff]   ;;  %v12398_v63 = vld [vmem:[#allocation7 + $0x13c4] ss:$16 sps:$4 sm:$0xff]  }
 0x3d7   :  { %8540 = vmatprep.subr.bf16.mxu1 %v12323_v20  ;;  %v12401_v20 = vld [vmem:[#allocation7 + $0x13cc] ss:$16 sps:$4 sm:$0xff]  }
 0x3d8   :  { %7896 = vmatpush1.bf16.msra.mxu0 %v12318_v37  ;;  %v12396_v37 = vld [vmem:[#allocation7 + $0x13c0] ss:$16 sps:$4 sm:$0xff]  }
 0x3d9   :  { %8541 = vmatpush1.bf16.msra.mxu1 %v12321_v4  ;;  %7897 = vmatprep.subr.bf16.mxu0 %v12326_v43  ;;  %v12399_v4 = vld [vmem:[#allocation7 + $0x13c8] ss:$16 sps:$4 sm:$0xff]   ;;  %v12404_v43 = vld [vmem:[#allocation7 + $0x13e4] ss:$16 sps:$4 sm:$0xff]  }
 0x3da   :  { %8542 = vmatprep.subr.bf16.mxu1 %v12329_v8  ;;  %v12407_v8 = vld [vmem:[#allocation7 + $0x13ec] ss:$16 sps:$4 sm:$0xff]  }
 0x3dc   :  { %7898 = vmatpush1.bf16.msra.mxu0 %v12324_v17  ;;  %v12402_v17 = vld [vmem:[#allocation7 + $0x13e0] ss:$16 sps:$4 sm:$0xff]  }
 0x3dd   :  { %8543 = vmatpush1.bf16.msra.mxu1 %v12327_v59  ;;  %7899 = vmatprep.subr.bf16.mxu0 %v12332_v27  ;;  %v12405_v59 = vld [vmem:[#allocation7 + $0x13e8] ss:$16 sps:$4 sm:$0xff]   ;;  %v12410_v27 = vld [vmem:[#allocation7 + $0x1404] ss:$16 sps:$4 sm:$0xff]  }
 0x3de   :  { %8544 = vmatprep.subr.bf16.mxu1 %v12335_v49  ;;  %v12413_v49 = vld [vmem:[#allocation7 + $0x140c] ss:$16 sps:$4 sm:$0xff]  }
 0x3e0   :  { %7900 = vmatpush1.bf16.msra.mxu0 %v12330_v56  ;;  %v12408_v56 = vld [vmem:[#allocation7 + $0x1400] ss:$16 sps:$4 sm:$0xff]  }
 0x3e1   :  { %8545 = vmatpush1.bf16.msra.mxu1 %v12333_v22  ;;  %7901 = vmatprep.subr.bf16.mxu0 %v12338_v23  ;;  %v12411_v22 = vld [vmem:[#allocation7 + $0x1408] ss:$16 sps:$4 sm:$0xff]   ;;  %v12416_v23 = vld [vmem:[#allocation7 + $0x1424] ss:$16 sps:$4 sm:$0xff]  }
 0x3e2   :  { %8546 = vmatprep.subr.bf16.mxu1 %v12341_v34  ;;  %v12419_v34 = vld [vmem:[#allocation7 + $0x142c] ss:$16 sps:$4 sm:$0xff]  }
 0x3e4   :  { %7902 = vmatpush1.bf16.msra.mxu0 %v12336_v31  ;;  %v12414_v31 = vld [vmem:[#allocation7 + $0x1420] ss:$16 sps:$4 sm:$0xff]  }
 0x3e5   :  { %8547 = vmatpush1.bf16.msra.mxu1 %v12339_v3  ;;  %7903 = vmatprep.subr.bf16.mxu0 %v12344_v1  ;;  %v12417_v3 = vld [vmem:[#allocation7 + $0x1428] ss:$16 sps:$4 sm:$0xff]   ;;  %v12422_v1 = vld [vmem:[#allocation7 + $0x1444] ss:$16 sps:$4 sm:$0xff]  }
 0x3e6   :  { %8548 = vmatprep.subr.bf16.mxu1 %v12347_v58  ;;  %v12425_v58 = vld [vmem:[#allocation7 + $0x144c] ss:$16 sps:$4 sm:$0xff]  }
 0x3e8   :  { %7904 = vmatpush1.bf16.msra.mxu0 %v12342_v28  ;;  %v12420_v28 = vld [vmem:[#allocation7 + $0x1440] ss:$16 sps:$4 sm:$0xff]  }
 0x3e9   :  { %8549 = vmatpush1.bf16.msra.mxu1 %v12345_v60  ;;  %7905 = vmatprep.subr.bf16.mxu0 %v12350_v6  ;;  %v12423_v60 = vld [vmem:[#allocation7 + $0x1448] ss:$16 sps:$4 sm:$0xff]   ;;  %v12428_v6 = vld [vmem:[#allocation7 + $0x1464] ss:$16 sps:$4 sm:$0xff]  }
 0x3ea   :  { %8550 = vmatprep.subr.bf16.mxu1 %v12353_v40  ;;  %v12426_v40 = vld [vmem:[#allocation7 + $0x1460] ss:$16 sps:$4 sm:$0xff]  }
 0x3ec   :  { %7906 = vmatpush1.bf16.msra.mxu0 %v12348_v39  ;;  %v12429_v39 = vld [vmem:[#allocation7 + $0x1468] ss:$16 sps:$4 sm:$0xff]  }
 0x3ed   :  { %8551 = vmatpush1.bf16.msra.mxu1 %v12351_v29  ;;  %7907 = vmatprep.subr.bf16.mxu0 %v12356_v46  ;;  %v12434_v29 = vld [vmem:[#allocation7 + $0x1484] ss:$16 sps:$4 sm:$0xff]   ;;  %v12437_v46 = vld [vmem:[#allocation7 + $0x148c] ss:$16 sps:$4 sm:$0xff]  }
 0x3ee   :  { %8552 = vmatprep.subr.bf16.mxu1 %v12359_v45  ;;  %v12435_v45 = vld [vmem:[#allocation7 + $0x1488] ss:$16 sps:$4 sm:$0xff]  }
 0x3f0   :  { %7908 = vmatpush1.bf16.msra.mxu0 %v12354_v57  ;;  %v12440_v57 = vld [vmem:[#allocation7 + $0x14a4] ss:$16 sps:$4 sm:$0xff]  }
 0x3f1   :  { %8553 = vmatpush1.bf16.msra.mxu1 %v12357_v21  ;;  %7909 = vmatprep.subr.bf16.mxu0 %v12362_v15  ;;  %v12443_v21 = vld [vmem:[#allocation7 + $0x14ac] ss:$16 sps:$4 sm:$0xff]   ;;  %v12438_v15 = vld [vmem:[#allocation7 + $0x14a0] ss:$16 sps:$4 sm:$0xff]  }
 0x3f2   :  { %8554 = vmatprep.subr.bf16.mxu1 %v12365_v14  ;;  %v12441_v14 = vld [vmem:[#allocation7 + $0x14a8] ss:$16 sps:$4 sm:$0xff]  }
 0x3f4   :  { %7910 = vmatpush1.bf16.msra.mxu0 %v12360_v5  ;;  %v12446_v5 = vld [vmem:[#allocation7 + $0x14c4] ss:$16 sps:$4 sm:$0xff]  }
 0x3f5   :  { %8555 = vmatpush1.bf16.msra.mxu1 %v12363_v11  ;;  %7911 = vmatprep.subr.bf16.mxu0 %v12368_v42  ;;  %v12449_v11 = vld [vmem:[#allocation7 + $0x14cc] ss:$16 sps:$4 sm:$0xff]   ;;  %v12444_v42 = vld [vmem:[#allocation7 + $0x14c0] ss:$16 sps:$4 sm:$0xff]  }
 0x3f6   :  { %8556 = vmatprep.subr.bf16.mxu1 %v12371_v44  ;;  %v12447_v44 = vld [vmem:[#allocation7 + $0x14c8] ss:$16 sps:$4 sm:$0xff]  }
 0x3f8   :  { %7912 = vmatpush1.bf16.msra.mxu0 %v12366_v0  ;;  %v12452_v0 = vld [vmem:[#allocation7 + $0x14e4] ss:$16 sps:$4 sm:$0xff]  }
 0x3f9   :  { %8557 = vmatpush1.bf16.msra.mxu1 %v12369_v61  ;;  %7913 = vmatprep.subr.bf16.mxu0 %v12374_v62  ;;  %v12455_v61 = vld [vmem:[#allocation7 + $0x14ec] ss:$16 sps:$4 sm:$0xff]   ;;  %v12450_v62 = vld [vmem:[#allocation7 + $0x14e0] ss:$16 sps:$4 sm:$0xff]  }
 0x3fa   :  { %8558 = vmatprep.subr.bf16.mxu1 %v12377_v50  ;;  %v12453_v50 = vld [vmem:[#allocation7 + $0x14e8] ss:$16 sps:$4 sm:$0xff]  }
 0x3fc   :  { %7914 = vmatpush1.bf16.msra.mxu0 %v12372_v52  ;;  %v12458_v52 = vld [vmem:[#allocation7 + $0x1504] ss:$16 sps:$4 sm:$0xff]  }
 0x3fd   :  { %8559 = vmatpush1.bf16.msra.mxu1 %v12375_v35  ;;  %7915 = vmatprep.subr.bf16.mxu0 %v12380_v24  ;;  %v12461_v35 = vld [vmem:[#allocation7 + $0x150c] ss:$16 sps:$4 sm:$0xff]   ;;  %v12456_v24 = vld [vmem:[#allocation7 + $0x1500] ss:$16 sps:$4 sm:$0xff]  }
 0x3fe   :  { %8560 = vmatprep.subr.bf16.mxu1 %v12383_v13  ;;  %v12459_v13 = vld [vmem:[#allocation7 + $0x1508] ss:$16 sps:$4 sm:$0xff]  }
 0x400   :  { %7916 = vmatpush1.bf16.msra.mxu0 %v12378_v53  ;;  %v12464_v53 = vld [vmem:[#allocation7 + $0x1524] ss:$16 sps:$4 sm:$0xff]  }
 0x401   :  { %8561 = vmatpush1.bf16.msra.mxu1 %v12381_v38  ;;  %7917 = vmatprep.subr.bf16.mxu0 %v12386_v33  ;;  %v12467_v38 = vld [vmem:[#allocation7 + $0x152c] ss:$16 sps:$4 sm:$0xff]   ;;  %v12462_v33 = vld [vmem:[#allocation7 + $0x1520] ss:$16 sps:$4 sm:$0xff]  }
 0x402   :  { %8562 = vmatprep.subr.bf16.mxu1 %v12389_v32  ;;  %v12465_v32 = vld [vmem:[#allocation7 + $0x1528] ss:$16 sps:$4 sm:$0xff]  }
 0x404   :  { %7918 = vmatpush1.bf16.msra.mxu0 %v12384_v47  ;;  %v12470_v47 = vld [vmem:[#allocation7 + $0x1544] ss:$16 sps:$4 sm:$0xff]  }
 0x405   :  { %8563 = vmatpush1.bf16.msra.mxu1 %v12387_v25  ;;  %7919 = vmatprep.subr.bf16.mxu0 %v12392_v54  ;;  %v12473_v25 = vld [vmem:[#allocation7 + $0x154c] ss:$16 sps:$4 sm:$0xff]   ;;  %v12468_v54 = vld [vmem:[#allocation7 + $0x1540] ss:$16 sps:$4 sm:$0xff]  }
 0x406   :  { %8564 = vmatprep.subr.bf16.mxu1 %v12395_v51  ;;  %v12471_v51 = vld [vmem:[#allocation7 + $0x1548] ss:$16 sps:$4 sm:$0xff]  }
 0x408   :  { %7920 = vmatpush1.bf16.msra.mxu0 %v12390_v30  ;;  %v12476_v30 = vld [vmem:[#allocation7 + $0x1564] ss:$16 sps:$4 sm:$0xff]  }
 0x409   :  { %8565 = vmatpush1.bf16.msra.mxu1 %v12393_v2  ;;  %7921 = vmatprep.subr.bf16.mxu0 %v12398_v63  ;;  %v12479_v2 = vld [vmem:[#allocation7 + $0x156c] ss:$16 sps:$4 sm:$0xff]   ;;  %v12474_v63 = vld [vmem:[#allocation7 + $0x1560] ss:$16 sps:$4 sm:$0xff]  }
 0x40a   :  { %8566 = vmatprep.subr.bf16.mxu1 %v12401_v20  ;;  %v12477_v20 = vld [vmem:[#allocation7 + $0x1568] ss:$16 sps:$4 sm:$0xff]  }
 0x40c   :  { %7922 = vmatpush1.bf16.msra.mxu0 %v12396_v37  ;;  %v12482_v37 = vld [vmem:[#allocation7 + $0x1584] ss:$16 sps:$4 sm:$0xff]  }
 0x40d   :  { %8567 = vmatpush1.bf16.msra.mxu1 %v12399_v4  ;;  %7923 = vmatprep.subr.bf16.mxu0 %v12404_v43  ;;  %v12485_v4 = vld [vmem:[#allocation7 + $0x158c] ss:$16 sps:$4 sm:$0xff]   ;;  %v12480_v43 = vld [vmem:[#allocation7 + $0x1580] ss:$16 sps:$4 sm:$0xff]  }
 0x40e   :  { %8568 = vmatprep.subr.bf16.mxu1 %v12407_v8  ;;  %v12483_v8 = vld [vmem:[#allocation7 + $0x1588] ss:$16 sps:$4 sm:$0xff]  }
 0x410   :  { %7924 = vmatpush1.bf16.msra.mxu0 %v12402_v17  ;;  %v12488_v17 = vld [vmem:[#allocation7 + $0x15a4] ss:$16 sps:$4 sm:$0xff]  }
 0x411   :  { %8569 = vmatpush1.bf16.msra.mxu1 %v12405_v59  ;;  %7936 = vmatprep.subr.bf16.mxu0 %v12410_v27  ;;  %v12491_v59 = vld [vmem:[#allocation7 + $0x15ac] ss:$16 sps:$4 sm:$0xff]   ;;  %v12486_v27 = vld [vmem:[#allocation7 + $0x15a0] ss:$16 sps:$4 sm:$0xff]  }
 0x412   :  { %8581 = vmatprep.subr.bf16.mxu1 %v12413_v49  ;;  %v12489_v49 = vld [vmem:[#allocation7 + $0x15a8] ss:$16 sps:$4 sm:$0xff]  }
 0x413   :  { %7926 = vmatmul.mubr.bf16.vlgmr.msra.gmra.mrb[36].mxu0 %v13624_v55 }
 0x414   :  { %8571 = vmatmul.mubr.bf16.vlgmr.msra.gmra.mrb[36].mxu1 %v13624_v55  ;;  %7937 = vmatpush1.bf16.msra.mxu0 %v12408_v56  ;;  %v12431_v55 = vld [vmem:[#allocation7 + $0x146c] ss:$16 sps:$4 sm:$0xff]   ;;  %v12494_v56 = vld [vmem:[#allocation7 + $0x15c4] ss:$16 sps:$4 sm:$0xff]  }
 0x415   :  { %7968 = vmatprep.mubr.bf16.mxu0 %v13843_v16  ;;  %8582 = vmatpush1.bf16.msra.mxu1 %v12411_v22  ;;  %v12497_v22 = vld [vmem:[#allocation7 + $0x15cc] ss:$16 sps:$4 sm:$0xff]  }
 0x416   :  { %8613 = vmatprep.mubr.bf16.mxu1 %v13843_v16  ;;  %7938 = vmatprep.subr.bf16.mxu0 %v12416_v23  ;;  %v12432_v16 = vld [vmem:[#allocation7 + $0x1480] ss:$16 sps:$4 sm:$0xff]  }
 0x417   :  { %8583 = vmatprep.subr.bf16.mxu1 %v12419_v34  ;;  %v12492_v23 = vld [vmem:[#allocation7 + $0x15c0] ss:$16 sps:$4 sm:$0xff]   ;;  %v12495_v34 = vld [vmem:[#allocation7 + $0x15c8] ss:$16 sps:$4 sm:$0xff]  }
 0x418   :  { %7939 = vmatpush1.bf16.msra.mxu0 %v12414_v31  ;;  %v12500_v31 = vld [vmem:[#allocation7 + $0x15e4] ss:$16 sps:$4 sm:$0xff]  }
 0x419   :  { %8584 = vmatpush1.bf16.msra.mxu1 %v12417_v3  ;;  %7940 = vmatprep.subr.bf16.mxu0 %v12422_v1  ;;  %v12503_v3 = vld [vmem:[#allocation7 + $0x15ec] ss:$16 sps:$4 sm:$0xff]   ;;  %v12498_v1 = vld [vmem:[#allocation7 + $0x15e0] ss:$16 sps:$4 sm:$0xff]  }
 0x41a   :  { %8585 = vmatprep.subr.bf16.mxu1 %v12425_v58  ;;  %v12501_v58 = vld [vmem:[#allocation7 + $0x15e8] ss:$16 sps:$4 sm:$0xff]  }
 0x41c   :  { %7941 = vmatpush1.bf16.msra.mxu0 %v12420_v28  ;;  %v12506_v28 = vld [vmem:[#allocation7 + $0x1604] ss:$16 sps:$4 sm:$0xff]  }
 0x41d   :  { %8586 = vmatpush1.bf16.msra.mxu1 %v12423_v60  ;;  %7942 = vmatprep.subr.bf16.mxu0 %v12428_v6  ;;  %v12509_v60 = vld [vmem:[#allocation7 + $0x160c] ss:$16 sps:$4 sm:$0xff]   ;;  %v12504_v6 = vld [vmem:[#allocation7 + $0x1600] ss:$16 sps:$4 sm:$0xff]  }
 0x41e   :  { %8587 = vmatprep.subr.bf16.mxu1 %v12431_v55  ;;  %v12507_v55 = vld [vmem:[#allocation7 + $0x1608] ss:$16 sps:$4 sm:$0xff]  }
 0x420   :  { %7943 = vmatpush1.bf16.msra.mxu0 %v12426_v40  ;;  %v12512_v40 = vld [vmem:[#allocation7 + $0x1624] ss:$16 sps:$4 sm:$0xff]  }
 0x421   :  { %8588 = vmatpush1.bf16.msra.mxu1 %v12429_v39  ;;  %7944 = vmatprep.subr.bf16.mxu0 %v12434_v29  ;;  %v12515_v39 = vld [vmem:[#allocation7 + $0x162c] ss:$16 sps:$4 sm:$0xff]   ;;  %v12510_v29 = vld [vmem:[#allocation7 + $0x1620] ss:$16 sps:$4 sm:$0xff]  }
 0x422   :  { %8589 = vmatprep.subr.bf16.mxu1 %v12437_v46  ;;  %v12513_v46 = vld [vmem:[#allocation7 + $0x1628] ss:$16 sps:$4 sm:$0xff]  }
 0x424   :  { %7945 = vmatpush1.bf16.msra.mxu0 %v12432_v16  ;;  %v12518_v16 = vld [vmem:[#allocation7 + $0x1644] ss:$16 sps:$4 sm:$0xff]  }
 0x425   :  { %8590 = vmatpush1.bf16.msra.mxu1 %v12435_v45  ;;  %7946 = vmatprep.subr.bf16.mxu0 %v12440_v57  ;;  %v12521_v45 = vld [vmem:[#allocation7 + $0x164c] ss:$16 sps:$4 sm:$0xff]   ;;  %v12516_v57 = vld [vmem:[#allocation7 + $0x1640] ss:$16 sps:$4 sm:$0xff]  }
 0x426   :  { %8591 = vmatprep.subr.bf16.mxu1 %v12443_v21  ;;  %v12519_v21 = vld [vmem:[#allocation7 + $0x1648] ss:$16 sps:$4 sm:$0xff]  }
 0x428   :  { %7947 = vmatpush1.bf16.msra.mxu0 %v12438_v15  ;;  %v12524_v15 = vld [vmem:[#allocation7 + $0x1664] ss:$16 sps:$4 sm:$0xff]  }
 0x429   :  { %8592 = vmatpush1.bf16.msra.mxu1 %v12441_v14  ;;  %7948 = vmatprep.subr.bf16.mxu0 %v12446_v5  ;;  %v12522_v14 = vld [vmem:[#allocation7 + $0x1660] ss:$16 sps:$4 sm:$0xff]   ;;  %v12525_v5 = vld [vmem:[#allocation7 + $0x1668] ss:$16 sps:$4 sm:$0xff]  }
 0x42a   :  { %8593 = vmatprep.subr.bf16.mxu1 %v12449_v11  ;;  %v12530_v11 = vld [vmem:[#allocation7 + $0x1684] ss:$16 sps:$4 sm:$0xff]  }
 0x42c   :  { %7949 = vmatpush1.bf16.msra.mxu0 %v12444_v42  ;;  %v12533_v42 = vld [vmem:[#allocation7 + $0x168c] ss:$16 sps:$4 sm:$0xff]  }
 0x42d   :  { %8594 = vmatpush1.bf16.msra.mxu1 %v12447_v44  ;;  %7950 = vmatprep.subr.bf16.mxu0 %v12452_v0  ;;  %v12531_v44 = vld [vmem:[#allocation7 + $0x1688] ss:$16 sps:$4 sm:$0xff]   ;;  %v12536_v0 = vld [vmem:[#allocation7 + $0x16a4] ss:$16 sps:$4 sm:$0xff]  }
 0x42e   :  { %8595 = vmatprep.subr.bf16.mxu1 %v12455_v61  ;;  %v12539_v61 = vld [vmem:[#allocation7 + $0x16ac] ss:$16 sps:$4 sm:$0xff]  }
 0x430   :  { %7951 = vmatpush1.bf16.msra.mxu0 %v12450_v62  ;;  %v12534_v62 = vld [vmem:[#allocation7 + $0x16a0] ss:$16 sps:$4 sm:$0xff]  }
 0x431   :  { %8596 = vmatpush1.bf16.msra.mxu1 %v12453_v50  ;;  %7952 = vmatprep.subr.bf16.mxu0 %v12458_v52  ;;  %v12537_v50 = vld [vmem:[#allocation7 + $0x16a8] ss:$16 sps:$4 sm:$0xff]   ;;  %v12542_v52 = vld [vmem:[#allocation7 + $0x16c4] ss:$16 sps:$4 sm:$0xff]  }
 0x432   :  { %8597 = vmatprep.subr.bf16.mxu1 %v12461_v35  ;;  %v12545_v35 = vld [vmem:[#allocation7 + $0x16cc] ss:$16 sps:$4 sm:$0xff]  }
 0x434   :  { %7953 = vmatpush1.bf16.msra.mxu0 %v12456_v24  ;;  %v12540_v24 = vld [vmem:[#allocation7 + $0x16c0] ss:$16 sps:$4 sm:$0xff]  }
 0x435   :  { %8598 = vmatpush1.bf16.msra.mxu1 %v12459_v13  ;;  %7954 = vmatprep.subr.bf16.mxu0 %v12464_v53  ;;  %v12543_v13 = vld [vmem:[#allocation7 + $0x16c8] ss:$16 sps:$4 sm:$0xff]   ;;  %v12548_v53 = vld [vmem:[#allocation7 + $0x16e4] ss:$16 sps:$4 sm:$0xff]  }
 0x436   :  { %8599 = vmatprep.subr.bf16.mxu1 %v12467_v38  ;;  %v12551_v38 = vld [vmem:[#allocation7 + $0x16ec] ss:$16 sps:$4 sm:$0xff]  }
 0x438   :  { %7955 = vmatpush1.bf16.msra.mxu0 %v12462_v33  ;;  %v12546_v33 = vld [vmem:[#allocation7 + $0x16e0] ss:$16 sps:$4 sm:$0xff]  }
 0x439   :  { %8600 = vmatpush1.bf16.msra.mxu1 %v12465_v32  ;;  %7956 = vmatprep.subr.bf16.mxu0 %v12470_v47  ;;  %v12549_v32 = vld [vmem:[#allocation7 + $0x16e8] ss:$16 sps:$4 sm:$0xff]   ;;  %v12554_v47 = vld [vmem:[#allocation7 + $0x1704] ss:$16 sps:$4 sm:$0xff]  }
 0x43a   :  { %8601 = vmatprep.subr.bf16.mxu1 %v12473_v25  ;;  %v12557_v25 = vld [vmem:[#allocation7 + $0x170c] ss:$16 sps:$4 sm:$0xff]  }
 0x43c   :  { %7957 = vmatpush1.bf16.msra.mxu0 %v12468_v54  ;;  %v12552_v54 = vld [vmem:[#allocation7 + $0x1700] ss:$16 sps:$4 sm:$0xff]  }
 0x43d   :  { %8602 = vmatpush1.bf16.msra.mxu1 %v12471_v51  ;;  %7958 = vmatprep.subr.bf16.mxu0 %v12476_v30  ;;  %v12555_v51 = vld [vmem:[#allocation7 + $0x1708] ss:$16 sps:$4 sm:$0xff]   ;;  %v12560_v30 = vld [vmem:[#allocation7 + $0x1724] ss:$16 sps:$4 sm:$0xff]  }
 0x43e   :  { %8603 = vmatprep.subr.bf16.mxu1 %v12479_v2  ;;  %v12563_v2 = vld [vmem:[#allocation7 + $0x172c] ss:$16 sps:$4 sm:$0xff]  }
 0x440   :  { %7959 = vmatpush1.bf16.msra.mxu0 %v12474_v63  ;;  %v12558_v63 = vld [vmem:[#allocation7 + $0x1720] ss:$16 sps:$4 sm:$0xff]  }
 0x441   :  { %8604 = vmatpush1.bf16.msra.mxu1 %v12477_v20  ;;  %7960 = vmatprep.subr.bf16.mxu0 %v12482_v37  ;;  %v12561_v20 = vld [vmem:[#allocation7 + $0x1728] ss:$16 sps:$4 sm:$0xff]   ;;  %v12566_v37 = vld [vmem:[#allocation7 + $0x1744] ss:$16 sps:$4 sm:$0xff]  }
 0x442   :  { %8605 = vmatprep.subr.bf16.mxu1 %v12485_v4  ;;  %v12569_v4 = vld [vmem:[#allocation7 + $0x174c] ss:$16 sps:$4 sm:$0xff]  }
 0x444   :  { %7961 = vmatpush1.bf16.msra.mxu0 %v12480_v43  ;;  %v12564_v43 = vld [vmem:[#allocation7 + $0x1740] ss:$16 sps:$4 sm:$0xff]  }
 0x445   :  { %8606 = vmatpush1.bf16.msra.mxu1 %v12483_v8  ;;  %7962 = vmatprep.subr.bf16.mxu0 %v12488_v17  ;;  %v12567_v8 = vld [vmem:[#allocation7 + $0x1748] ss:$16 sps:$4 sm:$0xff]   ;;  %v12572_v17 = vld [vmem:[#allocation7 + $0x1764] ss:$16 sps:$4 sm:$0xff]  }
 0x446   :  { %8607 = vmatprep.subr.bf16.mxu1 %v12491_v59  ;;  %v12575_v59 = vld [vmem:[#allocation7 + $0x176c] ss:$16 sps:$4 sm:$0xff]  }
 0x448   :  { %7963 = vmatpush1.bf16.msra.mxu0 %v12486_v27  ;;  %v12570_v27 = vld [vmem:[#allocation7 + $0x1760] ss:$16 sps:$4 sm:$0xff]  }
 0x449   :  { %8608 = vmatpush1.bf16.msra.mxu1 %v12489_v49  ;;  %7964 = vmatprep.subr.bf16.mxu0 %v12494_v56  ;;  %v12573_v49 = vld [vmem:[#allocation7 + $0x1768] ss:$16 sps:$4 sm:$0xff]   ;;  %v12578_v56 = vld [vmem:[#allocation7 + $0x1784] ss:$16 sps:$4 sm:$0xff]  }
 0x44a   :  { %8609 = vmatprep.subr.bf16.mxu1 %v12497_v22  ;;  %v12581_v22 = vld [vmem:[#allocation7 + $0x178c] ss:$16 sps:$4 sm:$0xff]  }
 0x44c   :  { %7965 = vmatpush1.bf16.msra.mxu0 %v12492_v23  ;;  %v12576_v23 = vld [vmem:[#allocation7 + $0x1780] ss:$16 sps:$4 sm:$0xff]  }
 0x44d   :  { %8610 = vmatpush1.bf16.msra.mxu1 %v12495_v34  ;;  %7966 = vmatprep.subr.bf16.mxu0 %v12500_v31  ;;  %v12579_v34 = vld [vmem:[#allocation7 + $0x1788] ss:$16 sps:$4 sm:$0xff]   ;;  %v12584_v31 = vld [vmem:[#allocation7 + $0x17a4] ss:$16 sps:$4 sm:$0xff]  }
 0x44e   :  { %8611 = vmatprep.subr.bf16.mxu1 %v12503_v3  ;;  %v12587_v3 = vld [vmem:[#allocation7 + $0x17ac] ss:$16 sps:$4 sm:$0xff]  }
 0x450   :  { %7967 = vmatpush1.bf16.msra.mxu0 %v12498_v1  ;;  %v12582_v1 = vld [vmem:[#allocation7 + $0x17a0] ss:$16 sps:$4 sm:$0xff]  }
 0x451   :  { %8612 = vmatpush1.bf16.msra.mxu1 %v12501_v58  ;;  %7979 = vmatprep.subr.bf16.mxu0 %v12506_v28  ;;  %v12585_v58 = vld [vmem:[#allocation7 + $0x17a8] ss:$16 sps:$4 sm:$0xff]   ;;  %v12590_v28 = vld [vmem:[#allocation7 + $0x17c4] ss:$16 sps:$4 sm:$0xff]  }
 0x452   :  { %8624 = vmatprep.subr.bf16.mxu1 %v12509_v60  ;;  %v12593_v60 = vld [vmem:[#allocation7 + $0x17cc] ss:$16 sps:$4 sm:$0xff]  }
 0x453   :  { %7969 = vmatmul.mubr.bf16.vlgmr.msra.gmra.mrb[36].mxu0 %v13847_v19 }
 0x454   :  { %8614 = vmatmul.mubr.bf16.vlgmr.msra.gmra.mrb[36].mxu1 %v13847_v19  ;;  %7980 = vmatpush1.bf16.msra.mxu0 %v12504_v6  ;;  %v12527_v19 = vld [vmem:[#allocation7 + $0x166c] ss:$16 sps:$4 sm:$0xff]   ;;  %v12588_v6 = vld [vmem:[#allocation7 + $0x17c0] ss:$16 sps:$4 sm:$0xff]  }
 0x455   :  { %8011 = vmatprep.mubr.bf16.mxu0 %v13856_v36  ;;  %8625 = vmatpush1.bf16.msra.mxu1 %v12507_v55  ;;  %v12591_v55 = vld [vmem:[#allocation7 + $0x17c8] ss:$16 sps:$4 sm:$0xff]  }
 0x456   :  { %8656 = vmatprep.mubr.bf16.mxu1 %v13856_v36  ;;  %7981 = vmatprep.subr.bf16.mxu0 %v12512_v40  ;;  %v12528_v36 = vld [vmem:[#allocation7 + $0x1680] ss:$16 sps:$4 sm:$0xff]   ;;  %v12596_v40 = vld [vmem:[#allocation7 + $0x17e4] ss:$16 sps:$4 sm:$0xff]  }
 0x457   :  { %8626 = vmatprep.subr.bf16.mxu1 %v12515_v39  ;;  %v12599_v39 = vld [vmem:[#allocation7 + $0x17ec] ss:$16 sps:$4 sm:$0xff]  }
 0x458   :  { %7982 = vmatpush1.bf16.msra.mxu0 %v12510_v29  ;;  %v12594_v29 = vld [vmem:[#allocation7 + $0x17e0] ss:$16 sps:$4 sm:$0xff]  }
 0x459   :  { %8627 = vmatpush1.bf16.msra.mxu1 %v12513_v46  ;;  %7983 = vmatprep.subr.bf16.mxu0 %v12518_v16  ;;  %v12597_v46 = vld [vmem:[#allocation7 + $0x17e8] ss:$16 sps:$4 sm:$0xff]   ;;  %v12602_v16 = vld [vmem:[#allocation7 + $0x1804] ss:$16 sps:$4 sm:$0xff]  }
 0x45a   :  { %8628 = vmatprep.subr.bf16.mxu1 %v12521_v45  ;;  %v12605_v45 = vld [vmem:[#allocation7 + $0x180c] ss:$16 sps:$4 sm:$0xff]  }
 0x45c   :  { %7984 = vmatpush1.bf16.msra.mxu0 %v12516_v57  ;;  %v12600_v57 = vld [vmem:[#allocation7 + $0x1800] ss:$16 sps:$4 sm:$0xff]  }
 0x45d   :  { %8629 = vmatpush1.bf16.msra.mxu1 %v12519_v21  ;;  %7985 = vmatprep.subr.bf16.mxu0 %v12524_v15  ;;  %v12603_v21 = vld [vmem:[#allocation7 + $0x1808] ss:$16 sps:$4 sm:$0xff]   ;;  %v12608_v15 = vld [vmem:[#allocation7 + $0x1824] ss:$16 sps:$4 sm:$0xff]  }
 0x45e   :  { %8630 = vmatprep.subr.bf16.mxu1 %v12527_v19  ;;  %v12611_v19 = vld [vmem:[#allocation7 + $0x182c] ss:$16 sps:$4 sm:$0xff]  }
 0x460   :  { %7986 = vmatpush1.bf16.msra.mxu0 %v12522_v14  ;;  %v12606_v14 = vld [vmem:[#allocation7 + $0x1820] ss:$16 sps:$4 sm:$0xff]  }
 0x461   :  { %8631 = vmatpush1.bf16.msra.mxu1 %v12525_v5  ;;  %7987 = vmatprep.subr.bf16.mxu0 %v12530_v11  ;;  %v12609_v5 = vld [vmem:[#allocation7 + $0x1828] ss:$16 sps:$4 sm:$0xff]   ;;  %v12614_v11 = vld [vmem:[#allocation7 + $0x1844] ss:$16 sps:$4 sm:$0xff]  }
 0x462   :  { %8632 = vmatprep.subr.bf16.mxu1 %v12533_v42  ;;  %v12617_v42 = vld [vmem:[#allocation7 + $0x184c] ss:$16 sps:$4 sm:$0xff]  }
 0x464   :  { %7988 = vmatpush1.bf16.msra.mxu0 %v12528_v36  ;;  %v12612_v36 = vld [vmem:[#allocation7 + $0x1840] ss:$16 sps:$4 sm:$0xff]  }
 0x465   :  { %8633 = vmatpush1.bf16.msra.mxu1 %v12531_v44  ;;  %7989 = vmatprep.subr.bf16.mxu0 %v12536_v0  ;;  %v12615_v44 = vld [vmem:[#allocation7 + $0x1848] ss:$16 sps:$4 sm:$0xff]   ;;  %v12620_v0 = vld [vmem:[#allocation7 + $0x1864] ss:$16 sps:$4 sm:$0xff]  }
 0x466   :  { %8634 = vmatprep.subr.bf16.mxu1 %v12539_v61  ;;  %v12618_v61 = vld [vmem:[#allocation7 + $0x1860] ss:$16 sps:$4 sm:$0xff]  }
 0x468   :  { %7990 = vmatpush1.bf16.msra.mxu0 %v12534_v62  ;;  %v12621_v62 = vld [vmem:[#allocation7 + $0x1868] ss:$16 sps:$4 sm:$0xff]  }
 0x469   :  { %8635 = vmatpush1.bf16.msra.mxu1 %v12537_v50  ;;  %7991 = vmatprep.subr.bf16.mxu0 %v12542_v52  ;;  %v12626_v50 = vld [vmem:[#allocation7 + $0x1884] ss:$16 sps:$4 sm:$0xff]   ;;  %v12629_v52 = vld [vmem:[#allocation7 + $0x188c] ss:$16 sps:$4 sm:$0xff]  }
 0x46a   :  { %8636 = vmatprep.subr.bf16.mxu1 %v12545_v35  ;;  %v12627_v35 = vld [vmem:[#allocation7 + $0x1888] ss:$16 sps:$4 sm:$0xff]  }
 0x46c   :  { %7992 = vmatpush1.bf16.msra.mxu0 %v12540_v24  ;;  %v12632_v24 = vld [vmem:[#allocation7 + $0x18a4] ss:$16 sps:$4 sm:$0xff]  }
 0x46d   :  { %8637 = vmatpush1.bf16.msra.mxu1 %v12543_v13  ;;  %7993 = vmatprep.subr.bf16.mxu0 %v12548_v53  ;;  %v12635_v13 = vld [vmem:[#allocation7 + $0x18ac] ss:$16 sps:$4 sm:$0xff]   ;;  %v12630_v53 = vld [vmem:[#allocation7 + $0x18a0] ss:$16 sps:$4 sm:$0xff]  }
 0x46e   :  { %8638 = vmatprep.subr.bf16.mxu1 %v12551_v38  ;;  %v12633_v38 = vld [vmem:[#allocation7 + $0x18a8] ss:$16 sps:$4 sm:$0xff]  }
 0x470   :  { %7994 = vmatpush1.bf16.msra.mxu0 %v12546_v33  ;;  %v12638_v33 = vld [vmem:[#allocation7 + $0x18c4] ss:$16 sps:$4 sm:$0xff]  }
 0x471   :  { %8639 = vmatpush1.bf16.msra.mxu1 %v12549_v32  ;;  %7995 = vmatprep.subr.bf16.mxu0 %v12554_v47  ;;  %v12641_v32 = vld [vmem:[#allocation7 + $0x18cc] ss:$16 sps:$4 sm:$0xff]   ;;  %v12636_v47 = vld [vmem:[#allocation7 + $0x18c0] ss:$16 sps:$4 sm:$0xff]  }
 0x472   :  { %8640 = vmatprep.subr.bf16.mxu1 %v12557_v25  ;;  %v12639_v25 = vld [vmem:[#allocation7 + $0x18c8] ss:$16 sps:$4 sm:$0xff]  }
 0x474   :  { %7996 = vmatpush1.bf16.msra.mxu0 %v12552_v54  ;;  %v12644_v54 = vld [vmem:[#allocation7 + $0x18e4] ss:$16 sps:$4 sm:$0xff]  }
 0x475   :  { %8641 = vmatpush1.bf16.msra.mxu1 %v12555_v51  ;;  %7997 = vmatprep.subr.bf16.mxu0 %v12560_v30  ;;  %v12647_v51 = vld [vmem:[#allocation7 + $0x18ec] ss:$16 sps:$4 sm:$0xff]   ;;  %v12642_v30 = vld [vmem:[#allocation7 + $0x18e0] ss:$16 sps:$4 sm:$0xff]  }
 0x476   :  { %8642 = vmatprep.subr.bf16.mxu1 %v12563_v2  ;;  %v12645_v2 = vld [vmem:[#allocation7 + $0x18e8] ss:$16 sps:$4 sm:$0xff]  }
 0x478   :  { %7998 = vmatpush1.bf16.msra.mxu0 %v12558_v63  ;;  %v12650_v63 = vld [vmem:[#allocation7 + $0x1904] ss:$16 sps:$4 sm:$0xff]  }
 0x479   :  { %8643 = vmatpush1.bf16.msra.mxu1 %v12561_v20  ;;  %7999 = vmatprep.subr.bf16.mxu0 %v12566_v37  ;;  %v12653_v20 = vld [vmem:[#allocation7 + $0x190c] ss:$16 sps:$4 sm:$0xff]   ;;  %v12648_v37 = vld [vmem:[#allocation7 + $0x1900] ss:$16 sps:$4 sm:$0xff]  }
 0x47a   :  { %8644 = vmatprep.subr.bf16.mxu1 %v12569_v4  ;;  %v12651_v4 = vld [vmem:[#allocation7 + $0x1908] ss:$16 sps:$4 sm:$0xff]  }
 0x47c   :  { %8000 = vmatpush1.bf16.msra.mxu0 %v12564_v43  ;;  %v12656_v43 = vld [vmem:[#allocation7 + $0x1924] ss:$16 sps:$4 sm:$0xff]  }
 0x47d   :  { %8645 = vmatpush1.bf16.msra.mxu1 %v12567_v8  ;;  %8001 = vmatprep.subr.bf16.mxu0 %v12572_v17  ;;  %v12659_v8 = vld [vmem:[#allocation7 + $0x192c] ss:$16 sps:$4 sm:$0xff]   ;;  %v12654_v17 = vld [vmem:[#allocation7 + $0x1920] ss:$16 sps:$4 sm:$0xff]  }
 0x47e   :  { %8646 = vmatprep.subr.bf16.mxu1 %v12575_v59  ;;  %v12657_v59 = vld [vmem:[#allocation7 + $0x1928] ss:$16 sps:$4 sm:$0xff]  }
 0x480   :  { %8002 = vmatpush1.bf16.msra.mxu0 %v12570_v27  ;;  %v12662_v27 = vld [vmem:[#allocation7 + $0x1944] ss:$16 sps:$4 sm:$0xff]  }
 0x481   :  { %8647 = vmatpush1.bf16.msra.mxu1 %v12573_v49  ;;  %8003 = vmatprep.subr.bf16.mxu0 %v12578_v56  ;;  %v12665_v49 = vld [vmem:[#allocation7 + $0x194c] ss:$16 sps:$4 sm:$0xff]   ;;  %v12660_v56 = vld [vmem:[#allocation7 + $0x1940] ss:$16 sps:$4 sm:$0xff]  }
 0x482   :  { %8648 = vmatprep.subr.bf16.mxu1 %v12581_v22  ;;  %v12663_v22 = vld [vmem:[#allocation7 + $0x1948] ss:$16 sps:$4 sm:$0xff]  }
 0x484   :  { %8004 = vmatpush1.bf16.msra.mxu0 %v12576_v23  ;;  %v12668_v23 = vld [vmem:[#allocation7 + $0x1964] ss:$16 sps:$4 sm:$0xff]  }
 0x485   :  { %8649 = vmatpush1.bf16.msra.mxu1 %v12579_v34  ;;  %8005 = vmatprep.subr.bf16.mxu0 %v12584_v31  ;;  %v12671_v34 = vld [vmem:[#allocation7 + $0x196c] ss:$16 sps:$4 sm:$0xff]   ;;  %v12666_v31 = vld [vmem:[#allocation7 + $0x1960] ss:$16 sps:$4 sm:$0xff]  }
 0x486   :  { %8650 = vmatprep.subr.bf16.mxu1 %v12587_v3  ;;  %v12669_v3 = vld [vmem:[#allocation7 + $0x1968] ss:$16 sps:$4 sm:$0xff]  }
 0x488   :  { %8006 = vmatpush1.bf16.msra.mxu0 %v12582_v1  ;;  %v12674_v1 = vld [vmem:[#allocation7 + $0x1984] ss:$16 sps:$4 sm:$0xff]  }
 0x489   :  { %8651 = vmatpush1.bf16.msra.mxu1 %v12585_v58  ;;  %8007 = vmatprep.subr.bf16.mxu0 %v12590_v28  ;;  %v12677_v58 = vld [vmem:[#allocation7 + $0x198c] ss:$16 sps:$4 sm:$0xff]   ;;  %v12672_v28 = vld [vmem:[#allocation7 + $0x1980] ss:$16 sps:$4 sm:$0xff]  }
 0x48a   :  { %8652 = vmatprep.subr.bf16.mxu1 %v12593_v60  ;;  %v12675_v60 = vld [vmem:[#allocation7 + $0x1988] ss:$16 sps:$4 sm:$0xff]  }
 0x48c   :  { %8008 = vmatpush1.bf16.msra.mxu0 %v12588_v6  ;;  %v12680_v6 = vld [vmem:[#allocation7 + $0x19a4] ss:$16 sps:$4 sm:$0xff]  }
 0x48d   :  { %8653 = vmatpush1.bf16.msra.mxu1 %v12591_v55  ;;  %8009 = vmatprep.subr.bf16.mxu0 %v12596_v40  ;;  %v12683_v55 = vld [vmem:[#allocation7 + $0x19ac] ss:$16 sps:$4 sm:$0xff]   ;;  %v12678_v40 = vld [vmem:[#allocation7 + $0x19a0] ss:$16 sps:$4 sm:$0xff]  }
 0x48e   :  { %8654 = vmatprep.subr.bf16.mxu1 %v12599_v39  ;;  %v12681_v39 = vld [vmem:[#allocation7 + $0x19a8] ss:$16 sps:$4 sm:$0xff]  }
 0x490   :  { %8010 = vmatpush1.bf16.msra.mxu0 %v12594_v29  ;;  %v12686_v29 = vld [vmem:[#allocation7 + $0x19c4] ss:$16 sps:$4 sm:$0xff]  }
 0x491   :  { %8655 = vmatpush1.bf16.msra.mxu1 %v12597_v46  ;;  %8022 = vmatprep.subr.bf16.mxu0 %v12602_v16  ;;  %v12689_v46 = vld [vmem:[#allocation7 + $0x19cc] ss:$16 sps:$4 sm:$0xff]   ;;  %v12684_v16 = vld [vmem:[#allocation7 + $0x19c0] ss:$16 sps:$4 sm:$0xff]  }
 0x492   :  { %8667 = vmatprep.subr.bf16.mxu1 %v12605_v45  ;;  %v12687_v45 = vld [vmem:[#allocation7 + $0x19c8] ss:$16 sps:$4 sm:$0xff]  }
 0x493   :  { %8012 = vmatmul.mubr.bf16.vlgmr.msra.gmra.mrb[36].mxu0 %v13862_v26 }
 0x494   :  { %8657 = vmatmul.mubr.bf16.vlgmr.msra.gmra.mrb[36].mxu1 %v13862_v26  ;;  %8023 = vmatpush1.bf16.msra.mxu0 %v12600_v57  ;;  %v12623_v26 = vld [vmem:[#allocation7 + $0x186c] ss:$16 sps:$4 sm:$0xff]   ;;  %v12692_v57 = vld [vmem:[#allocation7 + $0x19e4] ss:$16 sps:$4 sm:$0xff]  }
 0x495   :  { %8054 = vmatprep.mubr.bf16.mxu0 %v13630_v18  ;;  %8668 = vmatpush1.bf16.msra.mxu1 %v12603_v21  ;;  %v12695_v21 = vld [vmem:[#allocation7 + $0x19ec] ss:$16 sps:$4 sm:$0xff]  }
 0x496   :  { %8699 = vmatprep.mubr.bf16.mxu1 %v13630_v18  ;;  %8024 = vmatprep.subr.bf16.mxu0 %v12608_v15  ;;  %v12624_v18 = vld [vmem:[#allocation7 + $0x1880] ss:$16 sps:$4 sm:$0xff]  }
 0x497   :  { %8669 = vmatprep.subr.bf16.mxu1 %v12611_v19  ;;  %v12690_v15 = vld [vmem:[#allocation7 + $0x19e0] ss:$16 sps:$4 sm:$0xff]   ;;  %v12693_v19 = vld [vmem:[#allocation7 + $0x19e8] ss:$16 sps:$4 sm:$0xff]  }
 0x498   :  { %8025 = vmatpush1.bf16.msra.mxu0 %v12606_v14  ;;  %v12698_v14 = vld [vmem:[#allocation7 + $0x1a04] ss:$16 sps:$4 sm:$0xff]  }
 0x499   :  { %8670 = vmatpush1.bf16.msra.mxu1 %v12609_v5  ;;  %8026 = vmatprep.subr.bf16.mxu0 %v12614_v11  ;;  %v12701_v5 = vld [vmem:[#allocation7 + $0x1a0c] ss:$16 sps:$4 sm:$0xff]   ;;  %v12696_v11 = vld [vmem:[#allocation7 + $0x1a00] ss:$16 sps:$4 sm:$0xff]  }
 0x49a   :  { %8671 = vmatprep.subr.bf16.mxu1 %v12617_v42  ;;  %v12699_v42 = vld [vmem:[#allocation7 + $0x1a08] ss:$16 sps:$4 sm:$0xff]  }
 0x49c   :  { %8027 = vmatpush1.bf16.msra.mxu0 %v12612_v36  ;;  %v12704_v36 = vld [vmem:[#allocation7 + $0x1a24] ss:$16 sps:$4 sm:$0xff]  }
 0x49d   :  { %8672 = vmatpush1.bf16.msra.mxu1 %v12615_v44  ;;  %8028 = vmatprep.subr.bf16.mxu0 %v12620_v0  ;;  %v12707_v44 = vld [vmem:[#allocation7 + $0x1a2c] ss:$16 sps:$4 sm:$0xff]   ;;  %v12702_v0 = vld [vmem:[#allocation7 + $0x1a20] ss:$16 sps:$4 sm:$0xff]  }
 0x49e   :  { %8673 = vmatprep.subr.bf16.mxu1 %v12623_v26  ;;  %v12705_v26 = vld [vmem:[#allocation7 + $0x1a28] ss:$16 sps:$4 sm:$0xff]  }
 0x4a0   :  { %8029 = vmatpush1.bf16.msra.mxu0 %v12618_v61  ;;  %v12710_v61 = vld [vmem:[#allocation7 + $0x1a44] ss:$16 sps:$4 sm:$0xff]  }
 0x4a1   :  { %8674 = vmatpush1.bf16.msra.mxu1 %v12621_v62  ;;  %8030 = vmatprep.subr.bf16.mxu0 %v12626_v50  ;;  %v12713_v62 = vld [vmem:[#allocation7 + $0x1a4c] ss:$16 sps:$4 sm:$0xff]   ;;  %v12708_v50 = vld [vmem:[#allocation7 + $0x1a40] ss:$16 sps:$4 sm:$0xff]  }
 0x4a2   :  { %8675 = vmatprep.subr.bf16.mxu1 %v12629_v52  ;;  %v12711_v52 = vld [vmem:[#allocation7 + $0x1a48] ss:$16 sps:$4 sm:$0xff]  }
 0x4a4   :  { %8031 = vmatpush1.bf16.msra.mxu0 %v12624_v18  ;;  %v12716_v18 = vld [vmem:[#allocation7 + $0x1a64] ss:$16 sps:$4 sm:$0xff]  }
 0x4a5   :  { %8676 = vmatpush1.bf16.msra.mxu1 %v12627_v35  ;;  %8032 = vmatprep.subr.bf16.mxu0 %v12632_v24  ;;  %v12714_v35 = vld [vmem:[#allocation7 + $0x1a60] ss:$16 sps:$4 sm:$0xff]   ;;  %v12717_v24 = vld [vmem:[#allocation7 + $0x1a68] ss:$16 sps:$4 sm:$0xff]  }
 0x4a6   :  { %8677 = vmatprep.subr.bf16.mxu1 %v12635_v13  ;;  %v12722_v13 = vld [vmem:[#allocation7 + $0x1a84] ss:$16 sps:$4 sm:$0xff]  }
 0x4a8   :  { %8033 = vmatpush1.bf16.msra.mxu0 %v12630_v53  ;;  %v12725_v53 = vld [vmem:[#allocation7 + $0x1a8c] ss:$16 sps:$4 sm:$0xff]  }
 0x4a9   :  { %8678 = vmatpush1.bf16.msra.mxu1 %v12633_v38  ;;  %8034 = vmatprep.subr.bf16.mxu0 %v12638_v33  ;;  %v12723_v38 = vld [vmem:[#allocation7 + $0x1a88] ss:$16 sps:$4 sm:$0xff]   ;;  %v12728_v33 = vld [vmem:[#allocation7 + $0x1aa4] ss:$16 sps:$4 sm:$0xff]  }
 0x4aa   :  { %8679 = vmatprep.subr.bf16.mxu1 %v12641_v32  ;;  %v12731_v32 = vld [vmem:[#allocation7 + $0x1aac] ss:$16 sps:$4 sm:$0xff]  }
 0x4ac   :  { %8035 = vmatpush1.bf16.msra.mxu0 %v12636_v47  ;;  %v12726_v47 = vld [vmem:[#allocation7 + $0x1aa0] ss:$16 sps:$4 sm:$0xff]  }
 0x4ad   :  { %8680 = vmatpush1.bf16.msra.mxu1 %v12639_v25  ;;  %8036 = vmatprep.subr.bf16.mxu0 %v12644_v54  ;;  %v12729_v25 = vld [vmem:[#allocation7 + $0x1aa8] ss:$16 sps:$4 sm:$0xff]   ;;  %v12734_v54 = vld [vmem:[#allocation7 + $0x1ac4] ss:$16 sps:$4 sm:$0xff]  }
 0x4ae   :  { %8681 = vmatprep.subr.bf16.mxu1 %v12647_v51  ;;  %v12737_v51 = vld [vmem:[#allocation7 + $0x1acc] ss:$16 sps:$4 sm:$0xff]  }
 0x4b0   :  { %8037 = vmatpush1.bf16.msra.mxu0 %v12642_v30  ;;  %v12732_v30 = vld [vmem:[#allocation7 + $0x1ac0] ss:$16 sps:$4 sm:$0xff]  }
 0x4b1   :  { %8682 = vmatpush1.bf16.msra.mxu1 %v12645_v2  ;;  %8038 = vmatprep.subr.bf16.mxu0 %v12650_v63  ;;  %v12735_v2 = vld [vmem:[#allocation7 + $0x1ac8] ss:$16 sps:$4 sm:$0xff]   ;;  %v12740_v63 = vld [vmem:[#allocation7 + $0x1ae4] ss:$16 sps:$4 sm:$0xff]  }
 0x4b2   :  { %8683 = vmatprep.subr.bf16.mxu1 %v12653_v20  ;;  %v12743_v20 = vld [vmem:[#allocation7 + $0x1aec] ss:$16 sps:$4 sm:$0xff]  }
 0x4b4   :  { %8039 = vmatpush1.bf16.msra.mxu0 %v12648_v37  ;;  %v12738_v37 = vld [vmem:[#allocation7 + $0x1ae0] ss:$16 sps:$4 sm:$0xff]  }
 0x4b5   :  { %8684 = vmatpush1.bf16.msra.mxu1 %v12651_v4  ;;  %8040 = vmatprep.subr.bf16.mxu0 %v12656_v43  ;;  %v12741_v4 = vld [vmem:[#allocation7 + $0x1ae8] ss:$16 sps:$4 sm:$0xff]   ;;  %v12746_v43 = vld [vmem:[#allocation7 + $0x1b04] ss:$16 sps:$4 sm:$0xff]  }
 0x4b6   :  { %8685 = vmatprep.subr.bf16.mxu1 %v12659_v8  ;;  %v12749_v8 = vld [vmem:[#allocation7 + $0x1b0c] ss:$16 sps:$4 sm:$0xff]  }
 0x4b8   :  { %8041 = vmatpush1.bf16.msra.mxu0 %v12654_v17  ;;  %v12744_v17 = vld [vmem:[#allocation7 + $0x1b00] ss:$16 sps:$4 sm:$0xff]  }
 0x4b9   :  { %8686 = vmatpush1.bf16.msra.mxu1 %v12657_v59  ;;  %8042 = vmatprep.subr.bf16.mxu0 %v12662_v27  ;;  %v12747_v59 = vld [vmem:[#allocation7 + $0x1b08] ss:$16 sps:$4 sm:$0xff]   ;;  %v12752_v27 = vld [vmem:[#allocation7 + $0x1b24] ss:$16 sps:$4 sm:$0xff]  }
 0x4ba   :  { %8687 = vmatprep.subr.bf16.mxu1 %v12665_v49  ;;  %v12755_v49 = vld [vmem:[#allocation7 + $0x1b2c] ss:$16 sps:$4 sm:$0xff]  }
 0x4bc   :  { %8043 = vmatpush1.bf16.msra.mxu0 %v12660_v56  ;;  %v12750_v56 = vld [vmem:[#allocation7 + $0x1b20] ss:$16 sps:$4 sm:$0xff]  }
 0x4bd   :  { %8688 = vmatpush1.bf16.msra.mxu1 %v12663_v22  ;;  %8044 = vmatprep.subr.bf16.mxu0 %v12668_v23  ;;  %v12753_v22 = vld [vmem:[#allocation7 + $0x1b28] ss:$16 sps:$4 sm:$0xff]   ;;  %v12758_v23 = vld [vmem:[#allocation7 + $0x1b44] ss:$16 sps:$4 sm:$0xff]  }
 0x4be   :  { %8689 = vmatprep.subr.bf16.mxu1 %v12671_v34  ;;  %v12761_v34 = vld [vmem:[#allocation7 + $0x1b4c] ss:$16 sps:$4 sm:$0xff]  }
 0x4c0   :  { %8045 = vmatpush1.bf16.msra.mxu0 %v12666_v31  ;;  %v12756_v31 = vld [vmem:[#allocation7 + $0x1b40] ss:$16 sps:$4 sm:$0xff]  }
 0x4c1   :  { %8690 = vmatpush1.bf16.msra.mxu1 %v12669_v3  ;;  %8046 = vmatprep.subr.bf16.mxu0 %v12674_v1  ;;  %v12759_v3 = vld [vmem:[#allocation7 + $0x1b48] ss:$16 sps:$4 sm:$0xff]   ;;  %v12764_v1 = vld [vmem:[#allocation7 + $0x1b64] ss:$16 sps:$4 sm:$0xff]  }
 0x4c2   :  { %8691 = vmatprep.subr.bf16.mxu1 %v12677_v58  ;;  %v12767_v58 = vld [vmem:[#allocation7 + $0x1b6c] ss:$16 sps:$4 sm:$0xff]  }
 0x4c4   :  { %8047 = vmatpush1.bf16.msra.mxu0 %v12672_v28  ;;  %v12762_v28 = vld [vmem:[#allocation7 + $0x1b60] ss:$16 sps:$4 sm:$0xff]  }
 0x4c5   :  { %8692 = vmatpush1.bf16.msra.mxu1 %v12675_v60  ;;  %8048 = vmatprep.subr.bf16.mxu0 %v12680_v6  ;;  %v12765_v60 = vld [vmem:[#allocation7 + $0x1b68] ss:$16 sps:$4 sm:$0xff]   ;;  %v12770_v6 = vld [vmem:[#allocation7 + $0x1b84] ss:$16 sps:$4 sm:$0xff]  }
 0x4c6   :  { %8693 = vmatprep.subr.bf16.mxu1 %v12683_v55  ;;  %v12773_v55 = vld [vmem:[#allocation7 + $0x1b8c] ss:$16 sps:$4 sm:$0xff]  }
 0x4c8   :  { %8049 = vmatpush1.bf16.msra.mxu0 %v12678_v40  ;;  %v12768_v40 = vld [vmem:[#allocation7 + $0x1b80] ss:$16 sps:$4 sm:$0xff]  }
 0x4c9   :  { %8694 = vmatpush1.bf16.msra.mxu1 %v12681_v39  ;;  %8050 = vmatprep.subr.bf16.mxu0 %v12686_v29  ;;  %v12771_v39 = vld [vmem:[#allocation7 + $0x1b88] ss:$16 sps:$4 sm:$0xff]   ;;  %v12776_v29 = vld [vmem:[#allocation7 + $0x1ba4] ss:$16 sps:$4 sm:$0xff]  }
 0x4ca   :  { %8695 = vmatprep.subr.bf16.mxu1 %v12689_v46  ;;  %v12779_v46 = vld [vmem:[#allocation7 + $0x1bac] ss:$16 sps:$4 sm:$0xff]  }
 0x4cc   :  { %8051 = vmatpush1.bf16.msra.mxu0 %v12684_v16  ;;  %v12774_v16 = vld [vmem:[#allocation7 + $0x1ba0] ss:$16 sps:$4 sm:$0xff]  }
 0x4cd   :  { %8696 = vmatpush1.bf16.msra.mxu1 %v12687_v45  ;;  %8052 = vmatprep.subr.bf16.mxu0 %v12692_v57  ;;  %v12777_v45 = vld [vmem:[#allocation7 + $0x1ba8] ss:$16 sps:$4 sm:$0xff]   ;;  %v12782_v57 = vld [vmem:[#allocation7 + $0x1bc4] ss:$16 sps:$4 sm:$0xff]  }
 0x4ce   :  { %8697 = vmatprep.subr.bf16.mxu1 %v12695_v21  ;;  %v12785_v21 = vld [vmem:[#allocation7 + $0x1bcc] ss:$16 sps:$4 sm:$0xff]  }
 0x4d0   :  { %8053 = vmatpush1.bf16.msra.mxu0 %v12690_v15  ;;  %v12780_v15 = vld [vmem:[#allocation7 + $0x1bc0] ss:$16 sps:$4 sm:$0xff]  }
 0x4d1   :  { %8698 = vmatpush1.bf16.msra.mxu1 %v12693_v19  ;;  %8065 = vmatprep.subr.bf16.mxu0 %v12698_v14  ;;  %v12783_v19 = vld [vmem:[#allocation7 + $0x1bc8] ss:$16 sps:$4 sm:$0xff]   ;;  %v12788_v14 = vld [vmem:[#allocation7 + $0x1be4] ss:$16 sps:$4 sm:$0xff]  }
 0x4d2   :  { %8710 = vmatprep.subr.bf16.mxu1 %v12701_v5  ;;  %v12791_v5 = vld [vmem:[#allocation7 + $0x1bec] ss:$16 sps:$4 sm:$0xff]  }
 0x4d3   :  { %8055 = vmatmul.mubr.bf16.vlgmr.msra.gmra.mrb[36].mxu0 %v13639_v7 }
 0x4d4   :  { %8700 = vmatmul.mubr.bf16.vlgmr.msra.gmra.mrb[36].mxu1 %v13639_v7  ;;  %8066 = vmatpush1.bf16.msra.mxu0 %v12696_v11  ;;  %v12719_v7 = vld [vmem:[#allocation7 + $0x1a6c] ss:$16 sps:$4 sm:$0xff]   ;;  %v12786_v11 = vld [vmem:[#allocation7 + $0x1be0] ss:$16 sps:$4 sm:$0xff]  }
 0x4d5   :  { %8097 = vmatprep.mubr.bf16.mxu0 %v13858_v12  ;;  %8711 = vmatpush1.bf16.msra.mxu1 %v12699_v42  ;;  %v12789_v42 = vld [vmem:[#allocation7 + $0x1be8] ss:$16 sps:$4 sm:$0xff]  }
 0x4d6   :  { %8742 = vmatprep.mubr.bf16.mxu1 %v13858_v12  ;;  %8067 = vmatprep.subr.bf16.mxu0 %v12704_v36  ;;  %v12720_v12 = vld [vmem:[#allocation7 + $0x1a80] ss:$16 sps:$4 sm:$0xff]   ;;  %v12794_v36 = vld [vmem:[#allocation7 + $0x1c04] ss:$16 sps:$4 sm:$0xff]  }
 0x4d7   :  { %8712 = vmatprep.subr.bf16.mxu1 %v12707_v44  ;;  %v12797_v44 = vld [vmem:[#allocation7 + $0x1c0c] ss:$16 sps:$4 sm:$0xff]  }
 0x4d8   :  { %8068 = vmatpush1.bf16.msra.mxu0 %v12702_v0  ;;  %v12792_v0 = vld [vmem:[#allocation7 + $0x1c00] ss:$16 sps:$4 sm:$0xff]  }
 0x4d9   :  { %8713 = vmatpush1.bf16.msra.mxu1 %v12705_v26  ;;  %8069 = vmatprep.subr.bf16.mxu0 %v12710_v61  ;;  %v12795_v26 = vld [vmem:[#allocation7 + $0x1c08] ss:$16 sps:$4 sm:$0xff]   ;;  %v12800_v61 = vld [vmem:[#allocation7 + $0x1c24] ss:$16 sps:$4 sm:$0xff]  }
 0x4da   :  { %8714 = vmatprep.subr.bf16.mxu1 %v12713_v62  ;;  %v12803_v62 = vld [vmem:[#allocation7 + $0x1c2c] ss:$16 sps:$4 sm:$0xff]  }
 0x4dc   :  { %8070 = vmatpush1.bf16.msra.mxu0 %v12708_v50  ;;  %v12798_v50 = vld [vmem:[#allocation7 + $0x1c20] ss:$16 sps:$4 sm:$0xff]  }
 0x4dd   :  { %8715 = vmatpush1.bf16.msra.mxu1 %v12711_v52  ;;  %8071 = vmatprep.subr.bf16.mxu0 %v12716_v18  ;;  %v12801_v52 = vld [vmem:[#allocation7 + $0x1c28] ss:$16 sps:$4 sm:$0xff]   ;;  %v12806_v18 = vld [vmem:[#allocation7 + $0x1c44] ss:$16 sps:$4 sm:$0xff]  }
 0x4de   :  { %8716 = vmatprep.subr.bf16.mxu1 %v12719_v7  ;;  %v12809_v7 = vld [vmem:[#allocation7 + $0x1c4c] ss:$16 sps:$4 sm:$0xff]  }
 0x4e0   :  { %8072 = vmatpush1.bf16.msra.mxu0 %v12714_v35  ;;  %v12804_v35 = vld [vmem:[#allocation7 + $0x1c40] ss:$16 sps:$4 sm:$0xff]  }
 0x4e1   :  { %8717 = vmatpush1.bf16.msra.mxu1 %v12717_v24  ;;  %8073 = vmatprep.subr.bf16.mxu0 %v12722_v13  ;;  %v12807_v24 = vld [vmem:[#allocation7 + $0x1c48] ss:$16 sps:$4 sm:$0xff]   ;;  %v12812_v13 = vld [vmem:[#allocation7 + $0x1c64] ss:$16 sps:$4 sm:$0xff]  }
 0x4e2   :  { %8718 = vmatprep.subr.bf16.mxu1 %v12725_v53  ;;  %v12810_v53 = vld [vmem:[#allocation7 + $0x1c60] ss:$16 sps:$4 sm:$0xff]  }
 0x4e4   :  { %8074 = vmatpush1.bf16.msra.mxu0 %v12720_v12  ;;  %v12813_v12 = vld [vmem:[#allocation7 + $0x1c68] ss:$16 sps:$4 sm:$0xff]  }
 0x4e5   :  { %8719 = vmatpush1.bf16.msra.mxu1 %v12723_v38  ;;  %8075 = vmatprep.subr.bf16.mxu0 %v12728_v33  ;;  %v12818_v38 = vld [vmem:[#allocation7 + $0x1c84] ss:$16 sps:$4 sm:$0xff]   ;;  %v12821_v33 = vld [vmem:[#allocation7 + $0x1c8c] ss:$16 sps:$4 sm:$0xff]  }
 0x4e6   :  { %8720 = vmatprep.subr.bf16.mxu1 %v12731_v32  ;;  %v12819_v32 = vld [vmem:[#allocation7 + $0x1c88] ss:$16 sps:$4 sm:$0xff]  }
 0x4e8   :  { %8076 = vmatpush1.bf16.msra.mxu0 %v12726_v47  ;;  %v12824_v47 = vld [vmem:[#allocation7 + $0x1ca4] ss:$16 sps:$4 sm:$0xff]  }
 0x4e9   :  { %8721 = vmatpush1.bf16.msra.mxu1 %v12729_v25  ;;  %8077 = vmatprep.subr.bf16.mxu0 %v12734_v54  ;;  %v12827_v25 = vld [vmem:[#allocation7 + $0x1cac] ss:$16 sps:$4 sm:$0xff]   ;;  %v12822_v54 = vld [vmem:[#allocation7 + $0x1ca0] ss:$16 sps:$4 sm:$0xff]  }
 0x4ea   :  { %8722 = vmatprep.subr.bf16.mxu1 %v12737_v51  ;;  %v12825_v51 = vld [vmem:[#allocation7 + $0x1ca8] ss:$16 sps:$4 sm:$0xff]  }
 0x4ec   :  { %8078 = vmatpush1.bf16.msra.mxu0 %v12732_v30  ;;  %v12830_v30 = vld [vmem:[#allocation7 + $0x1cc4] ss:$16 sps:$4 sm:$0xff]  }
 0x4ed   :  { %8723 = vmatpush1.bf16.msra.mxu1 %v12735_v2  ;;  %8079 = vmatprep.subr.bf16.mxu0 %v12740_v63  ;;  %v12833_v2 = vld [vmem:[#allocation7 + $0x1ccc] ss:$16 sps:$4 sm:$0xff]   ;;  %v12828_v63 = vld [vmem:[#allocation7 + $0x1cc0] ss:$16 sps:$4 sm:$0xff]  }
 0x4ee   :  { %8724 = vmatprep.subr.bf16.mxu1 %v12743_v20  ;;  %v12831_v20 = vld [vmem:[#allocation7 + $0x1cc8] ss:$16 sps:$4 sm:$0xff]  }
 0x4f0   :  { %8080 = vmatpush1.bf16.msra.mxu0 %v12738_v37  ;;  %v12836_v37 = vld [vmem:[#allocation7 + $0x1ce4] ss:$16 sps:$4 sm:$0xff]  }
 0x4f1   :  { %8725 = vmatpush1.bf16.msra.mxu1 %v12741_v4  ;;  %8081 = vmatprep.subr.bf16.mxu0 %v12746_v43  ;;  %v12839_v4 = vld [vmem:[#allocation7 + $0x1cec] ss:$16 sps:$4 sm:$0xff]   ;;  %v12834_v43 = vld [vmem:[#allocation7 + $0x1ce0] ss:$16 sps:$4 sm:$0xff]  }
 0x4f2   :  { %8726 = vmatprep.subr.bf16.mxu1 %v12749_v8  ;;  %v12837_v8 = vld [vmem:[#allocation7 + $0x1ce8] ss:$16 sps:$4 sm:$0xff]  }
 0x4f4   :  { %8082 = vmatpush1.bf16.msra.mxu0 %v12744_v17  ;;  %v12842_v17 = vld [vmem:[#allocation7 + $0x1d04] ss:$16 sps:$4 sm:$0xff]  }
 0x4f5   :  { %8727 = vmatpush1.bf16.msra.mxu1 %v12747_v59  ;;  %8083 = vmatprep.subr.bf16.mxu0 %v12752_v27  ;;  %v12845_v59 = vld [vmem:[#allocation7 + $0x1d0c] ss:$16 sps:$4 sm:$0xff]   ;;  %v12840_v27 = vld [vmem:[#allocation7 + $0x1d00] ss:$16 sps:$4 sm:$0xff]  }
 0x4f6   :  { %8728 = vmatprep.subr.bf16.mxu1 %v12755_v49  ;;  %v12843_v49 = vld [vmem:[#allocation7 + $0x1d08] ss:$16 sps:$4 sm:$0xff]  }
 0x4f8   :  { %8084 = vmatpush1.bf16.msra.mxu0 %v12750_v56  ;;  %v12848_v56 = vld [vmem:[#allocation7 + $0x1d24] ss:$16 sps:$4 sm:$0xff]  }
 0x4f9   :  { %8729 = vmatpush1.bf16.msra.mxu1 %v12753_v22  ;;  %8085 = vmatprep.subr.bf16.mxu0 %v12758_v23  ;;  %v12851_v22 = vld [vmem:[#allocation7 + $0x1d2c] ss:$16 sps:$4 sm:$0xff]   ;;  %v12846_v23 = vld [vmem:[#allocation7 + $0x1d20] ss:$16 sps:$4 sm:$0xff]  }
 0x4fa   :  { %8730 = vmatprep.subr.bf16.mxu1 %v12761_v34  ;;  %v12849_v34 = vld [vmem:[#allocation7 + $0x1d28] ss:$16 sps:$4 sm:$0xff]  }
 0x4fc   :  { %8086 = vmatpush1.bf16.msra.mxu0 %v12756_v31  ;;  %v12854_v31 = vld [vmem:[#allocation7 + $0x1d44] ss:$16 sps:$4 sm:$0xff]  }
 0x4fd   :  { %8731 = vmatpush1.bf16.msra.mxu1 %v12759_v3  ;;  %8087 = vmatprep.subr.bf16.mxu0 %v12764_v1  ;;  %v12857_v3 = vld [vmem:[#allocation7 + $0x1d4c] ss:$16 sps:$4 sm:$0xff]   ;;  %v12852_v1 = vld [vmem:[#allocation7 + $0x1d40] ss:$16 sps:$4 sm:$0xff]  }
 0x4fe   :  { %8732 = vmatprep.subr.bf16.mxu1 %v12767_v58  ;;  %v12855_v58 = vld [vmem:[#allocation7 + $0x1d48] ss:$16 sps:$4 sm:$0xff]  }
 0x500   :  { %8088 = vmatpush1.bf16.msra.mxu0 %v12762_v28  ;;  %v12860_v28 = vld [vmem:[#allocation7 + $0x1d64] ss:$16 sps:$4 sm:$0xff]  }
 0x501   :  { %8733 = vmatpush1.bf16.msra.mxu1 %v12765_v60  ;;  %8089 = vmatprep.subr.bf16.mxu0 %v12770_v6  ;;  %v12863_v60 = vld [vmem:[#allocation7 + $0x1d6c] ss:$16 sps:$4 sm:$0xff]   ;;  %v12858_v6 = vld [vmem:[#allocation7 + $0x1d60] ss:$16 sps:$4 sm:$0xff]  }
 0x502   :  { %8734 = vmatprep.subr.bf16.mxu1 %v12773_v55  ;;  %v12861_v55 = vld [vmem:[#allocation7 + $0x1d68] ss:$16 sps:$4 sm:$0xff]  }
 0x504   :  { %8090 = vmatpush1.bf16.msra.mxu0 %v12768_v40  ;;  %v12866_v40 = vld [vmem:[#allocation7 + $0x1d84] ss:$16 sps:$4 sm:$0xff]  }
 0x505   :  { %8735 = vmatpush1.bf16.msra.mxu1 %v12771_v39  ;;  %8091 = vmatprep.subr.bf16.mxu0 %v12776_v29  ;;  %v12869_v39 = vld [vmem:[#allocation7 + $0x1d8c] ss:$16 sps:$4 sm:$0xff]   ;;  %v12864_v29 = vld [vmem:[#allocation7 + $0x1d80] ss:$16 sps:$4 sm:$0xff]  }
 0x506   :  { %8736 = vmatprep.subr.bf16.mxu1 %v12779_v46  ;;  %v12867_v46 = vld [vmem:[#allocation7 + $0x1d88] ss:$16 sps:$4 sm:$0xff]  }
 0x508   :  { %8092 = vmatpush1.bf16.msra.mxu0 %v12774_v16  ;;  %v12872_v16 = vld [vmem:[#allocation7 + $0x1da4] ss:$16 sps:$4 sm:$0xff]  }
 0x509   :  { %8737 = vmatpush1.bf16.msra.mxu1 %v12777_v45  ;;  %8093 = vmatprep.subr.bf16.mxu0 %v12782_v57  ;;  %v12875_v45 = vld [vmem:[#allocation7 + $0x1dac] ss:$16 sps:$4 sm:$0xff]   ;;  %v12870_v57 = vld [vmem:[#allocation7 + $0x1da0] ss:$16 sps:$4 sm:$0xff]  }
 0x50a   :  { %8738 = vmatprep.subr.bf16.mxu1 %v12785_v21  ;;  %v12873_v21 = vld [vmem:[#allocation7 + $0x1da8] ss:$16 sps:$4 sm:$0xff]  }
 0x50c   :  { %8094 = vmatpush1.bf16.msra.mxu0 %v12780_v15  ;;  %v12878_v15 = vld [vmem:[#allocation7 + $0x1dc4] ss:$16 sps:$4 sm:$0xff]  }
 0x50d   :  { %8739 = vmatpush1.bf16.msra.mxu1 %v12783_v19  ;;  %8095 = vmatprep.subr.bf16.mxu0 %v12788_v14  ;;  %v12881_v19 = vld [vmem:[#allocation7 + $0x1dcc] ss:$16 sps:$4 sm:$0xff]   ;;  %v12876_v14 = vld [vmem:[#allocation7 + $0x1dc0] ss:$16 sps:$4 sm:$0xff]  }
 0x50e   :  { %8740 = vmatprep.subr.bf16.mxu1 %v12791_v5  ;;  %v12879_v5 = vld [vmem:[#allocation7 + $0x1dc8] ss:$16 sps:$4 sm:$0xff]  }
 0x510   :  { %8096 = vmatpush1.bf16.msra.mxu0 %v12786_v11  ;;  %v12884_v11 = vld [vmem:[#allocation7 + $0x1de4] ss:$16 sps:$4 sm:$0xff]  }
 0x511   :  { %8741 = vmatpush1.bf16.msra.mxu1 %v12789_v42  ;;  %8108 = vmatprep.subr.bf16.mxu0 %v12794_v36  ;;  %v12887_v42 = vld [vmem:[#allocation7 + $0x1dec] ss:$16 sps:$4 sm:$0xff]   ;;  %v12882_v36 = vld [vmem:[#allocation7 + $0x1de0] ss:$16 sps:$4 sm:$0xff]  }
 0x512   :  { %8753 = vmatprep.subr.bf16.mxu1 %v12797_v44  ;;  %v12885_v44 = vld [vmem:[#allocation7 + $0x1de8] ss:$16 sps:$4 sm:$0xff]  }
 0x513   :  { %8098 = vmatmul.mubr.bf16.vlgmr.msra.gmra.mrb[36].mxu0 %v13867_v10 }
 0x514   :  { %8743 = vmatmul.mubr.bf16.vlgmr.msra.gmra.mrb[36].mxu1 %v13867_v10  ;;  %8109 = vmatpush1.bf16.msra.mxu0 %v12792_v0  ;;  %v12815_v10 = vld [vmem:[#allocation7 + $0x1c6c] ss:$16 sps:$4 sm:$0xff]   ;;  %v12888_v0 = vld [vmem:[#allocation10 + $0xc0] sm:$0xff]  }
 0x515   :  { %8140 = vmatprep.mubr.bf16.mxu0 %v13869_v48  ;;  %8754 = vmatpush1.bf16.msra.mxu1 %v12795_v26  ;;  %v12889_v26 = vld [vmem:[#allocation10 + $0x40] sm:$0xff]  }
 0x516   :  { %8785 = vmatprep.mubr.bf16.mxu1 %v13869_v48  ;;  %8110 = vmatprep.subr.bf16.mxu0 %v12800_v61  ;;  %v12816_v48 = vld [vmem:[#allocation7 + $0x1c80] ss:$16 sps:$4 sm:$0xff]  }
 0x517   :  { %8755 = vmatprep.subr.bf16.mxu1 %v12803_v62  ;;  %v12890_v61 = vld [vmem:[#allocation10 + $0x80] sm:$0xff]  }
 0x518   :  { %8111 = vmatpush1.bf16.msra.mxu0 %v12798_v50  ;;  %v12891_v62 = vld [vmem:[#allocation10] sm:$0xff]   ;;  %v12892_v50 = vld [vmem:[#allocation10 + $0xc8] sm:$0xff]  }
 0x519   :  { %8756 = vmatpush1.bf16.msra.mxu1 %v12801_v52  ;;  %8112 = vmatprep.subr.bf16.mxu0 %v12806_v18  ;;  %v12893_v52 = vld [vmem:[#allocation10 + $0x48] sm:$0xff]  }
 0x51a   :  { %8757 = vmatprep.subr.bf16.mxu1 %v12809_v7  ;;  %v12894_v18 = vld [vmem:[#allocation10 + $0x88] sm:$0xff]  }
 0x51b   :  { %v12895_v7 = vld [vmem:[#allocation10 + $0x8] sm:$0xff]  }
 0x51c   :  { %8113 = vmatpush1.bf16.msra.mxu0 %v12804_v35  ;;  %v12896_v35 = vld [vmem:[#allocation10 + $0xd0] sm:$0xff]  }
 0x51d   :  { %8758 = vmatpush1.bf16.msra.mxu1 %v12807_v24  ;;  %8114 = vmatprep.subr.bf16.mxu0 %v12812_v13  ;;  %v12897_v24 = vld [vmem:[#allocation10 + $0x50] sm:$0xff]  }
 0x51e   :  { %8759 = vmatprep.subr.bf16.mxu1 %v12815_v10  ;;  %v12898_v13 = vld [vmem:[#allocation10 + $0x90] sm:$0xff]  }
 0x51f   :  { %v12899_v10 = vld [vmem:[#allocation10 + $0x10] sm:$0xff]  }
 0x520   :  { %8115 = vmatpush1.bf16.msra.mxu0 %v12810_v53  ;;  %v12900_v53 = vld [vmem:[#allocation10 + $0xd8] sm:$0xff]  }
 0x521   :  { %8760 = vmatpush1.bf16.msra.mxu1 %v12813_v12  ;;  %8116 = vmatprep.subr.bf16.mxu0 %v12818_v38  ;;  %v12901_v12 = vld [vmem:[#allocation10 + $0x58] sm:$0xff]  }
 0x522   :  { %8761 = vmatprep.subr.bf16.mxu1 %v12821_v33  ;;  %v12902_v38 = vld [vmem:[#allocation10 + $0x98] sm:$0xff]   ;;  %v12904_v33 = vld [vmem:[#allocation10 + $0xe0] sm:$0xff]  }
 0x524   :  { %8117 = vmatpush1.bf16.msra.mxu0 %v12816_v48  ;;  %v12905_v48 = vld [vmem:[#allocation10 + $0x60] sm:$0xff]  }
 0x525   :  { %8762 = vmatpush1.bf16.msra.mxu1 %v12819_v32  ;;  %8118 = vmatprep.subr.bf16.mxu0 %v12824_v47  ;;  %v12906_v32 = vld [vmem:[#allocation10 + $0xa0] sm:$0xff]  }
 0x526   :  { %8763 = vmatprep.subr.bf16.mxu1 %v12827_v25  ;;  %v12907_v47 = vld [vmem:[#allocation10 + $0x20] sm:$0xff]   ;;  %v12908_v25 = vld [vmem:[#allocation10 + $0xe8] sm:$0xff]  }
 0x528   :  { %8119 = vmatpush1.bf16.msra.mxu0 %v12822_v54  ;;  %v12909_v54 = vld [vmem:[#allocation10 + $0x68] sm:$0xff]  }
 0x529   :  { %8764 = vmatpush1.bf16.msra.mxu1 %v12825_v51  ;;  %8120 = vmatprep.subr.bf16.mxu0 %v12830_v30  ;;  %v12910_v51 = vld [vmem:[#allocation10 + $0xa8] sm:$0xff]  }
 0x52a   :  { %8765 = vmatprep.subr.bf16.mxu1 %v12833_v2  ;;  %v12911_v30 = vld [vmem:[#allocation10 + $0x28] sm:$0xff]   ;;  %v12912_v2 = vld [vmem:[#allocation10 + $0xf0] sm:$0xff]  }
 0x52c   :  { %8121 = vmatpush1.bf16.msra.mxu0 %v12828_v63  ;;  %v12913_v63 = vld [vmem:[#allocation10 + $0x70] sm:$0xff]  }
 0x52d   :  { %8766 = vmatpush1.bf16.msra.mxu1 %v12831_v20  ;;  %8122 = vmatprep.subr.bf16.mxu0 %v12836_v37  ;;  %v12914_v20 = vld [vmem:[#allocation10 + $0xb0] sm:$0xff]  }
 0x52e   :  { %8767 = vmatprep.subr.bf16.mxu1 %v12839_v4  ;;  %v12915_v37 = vld [vmem:[#allocation10 + $0x30] sm:$0xff]   ;;  %v12916_v4 = vld [vmem:[#allocation10 + $0xf8] sm:$0xff]  }
 0x530   :  { %8123 = vmatpush1.bf16.msra.mxu0 %v12834_v43  ;;  %v12917_v43 = vld [vmem:[#allocation10 + $0x78] sm:$0xff]  }
 0x531   :  { %8768 = vmatpush1.bf16.msra.mxu1 %v12837_v8  ;;  %8124 = vmatprep.subr.bf16.mxu0 %v12842_v17  ;;  %v12918_v8 = vld [vmem:[#allocation10 + $0xb8] sm:$0xff]  }
 0x532   :  { %8769 = vmatprep.subr.bf16.mxu1 %v12845_v59  ;;  %v12919_v17 = vld [vmem:[#allocation10 + $0x38] sm:$0xff]   ;;  %v12920_v59 = vld [vmem:[#allocation10 + $0x140] sm:$0xff]  }
 0x534   :  { %8125 = vmatpush1.bf16.msra.mxu0 %v12840_v27  ;;  %v12921_v27 = vld [vmem:[#allocation10 + $0x1c0] sm:$0xff]  }
 0x535   :  { %8770 = vmatpush1.bf16.msra.mxu1 %v12843_v49  ;;  %8126 = vmatprep.subr.bf16.mxu0 %v12848_v56 }
 0x536   :  { %8771 = vmatprep.subr.bf16.mxu1 %v12851_v22  ;;  %v8800_v22 = vld [vmem:[#allocation8] sm:$0x3] }
 0x538   :  { %8127 = vmatpush1.bf16.msra.mxu0 %v12846_v23 }
 0x539   :  { %8772 = vmatpush1.bf16.msra.mxu1 %v12849_v34  ;;  %8128 = vmatprep.subr.bf16.mxu0 %v12854_v31 }
 0x53a   :  { %8773 = vmatprep.subr.bf16.mxu1 %v12857_v3 }
 0x53c   :  { %8129 = vmatpush1.bf16.msra.mxu0 %v12852_v1 }
 0x53d   :  { %8774 = vmatpush1.bf16.msra.mxu1 %v12855_v58  ;;  %8130 = vmatprep.subr.bf16.mxu0 %v12860_v28 }
 0x53e   :  { %8775 = vmatprep.subr.bf16.mxu1 %v12863_v60 }
 0x540   :  { %8131 = vmatpush1.bf16.msra.mxu0 %v12858_v6  ;;  %v14044_v6 = vsub.s32 0, %v13454_v41 }
 0x541   :  { %8776 = vmatpush1.bf16.msra.mxu1 %v12861_v55  ;;  %8132 = vmatprep.subr.bf16.mxu0 %v12866_v40 }
 0x542   :  { %8777 = vmatprep.subr.bf16.mxu1 %v12869_v39  ;;  %v8821_v55 = vrot.slane %v8800_v22, %v14044_v6  ;;  %v12928_v6 = vld [vmem:[#allocation10 + $0x150] sm:$0xff]  }
 0x544   :  { %8133 = vmatpush1.bf16.msra.mxu0 %v12864_v29 }
 0x545   :  { %8778 = vmatpush1.bf16.msra.mxu1 %v12867_v46  ;;  %8134 = vmatprep.subr.bf16.mxu0 %v12872_v16  ;;  %v14045_v46 = vsub.s32 1, %v13454_v41 }
 0x546   :  { %8779 = vmatprep.subr.bf16.mxu1 %v12875_v45 }
 0x547   :  { %v8825_v16 = vrot.slane %v8800_v22, %v14045_v46  ;;  %v12933_v46 = vld [vmem:[#allocation10 + $0x1d8] sm:$0xff]  }
 0x548   :  { %8135 = vmatpush1.bf16.msra.mxu0 %v12870_v57 }
 0x549   :  { %8780 = vmatpush1.bf16.msra.mxu1 %v12873_v21  ;;  %8136 = vmatprep.subr.bf16.mxu0 %v12878_v15 }
 0x54a   :  { %8781 = vmatprep.subr.bf16.mxu1 %v12881_v19 }
 0x54c   :  { %8137 = vmatpush1.bf16.msra.mxu0 %v12876_v14 }
 0x54d   :  { %8782 = vmatpush1.bf16.msra.mxu1 %v12879_v5  ;;  %8138 = vmatprep.subr.bf16.mxu0 %v12884_v11 }
 0x54e   :  { %8783 = vmatprep.subr.bf16.mxu1 %v12887_v42 }
 0x550   :  { %8139 = vmatpush1.bf16.msra.mxu0 %v12882_v36 }
 0x551   :  { %8784 = vmatpush1.bf16.msra.mxu1 %v12885_v44  ;;  %11014 = vmatprep.subr.bf16.mxu0 %v12888_v0 }
 0x552   :  { %11036 = vmatprep.subr.bf16.mxu1 %v12889_v26 }
 0x553   :  { %8141 = vmatmul.mubr.bf16.vlgmr.msra.gmra.mrb[36].mxu0 %v13871_v9 }
 0x554   :  { %8786 = vmatmul.mubr.bf16.vlgmr.msra.gmra.mrb[36].mxu1 %v13871_v9  ;;  %11015 = vmatpush3.bf16.msra.mxu0 %v12890_v61  ;;  %v12903_v9 = vld [vmem:[#allocation10 + $0x18] sm:$0xff]  }
 0x555   :  { %11037 = vmatpush3.bf16.msra.mxu1 %v12891_v62  ;;  %11016 = vmatprep.subr.bf16.mxu0 %v12892_v50 }
 0x556   :  { %11038 = vmatprep.subr.bf16.mxu1 %v12893_v52 }
 0x558   :  { %11017 = vmatpush3.bf16.msra.mxu0 %v12894_v18 }
 0x559   :  { %11039 = vmatpush3.bf16.msra.mxu1 %v12895_v7  ;;  %11018 = vmatprep.subr.bf16.mxu0 %v12896_v35 }
 0x55a   :  { %11040 = vmatprep.subr.bf16.mxu1 %v12897_v24 }
 0x55c   :  { %11019 = vmatpush3.bf16.msra.mxu0 %v12898_v13 }
 0x55d   :  { %11041 = vmatpush3.bf16.msra.mxu1 %v12899_v10  ;;  %11020 = vmatprep.subr.bf16.mxu0 %v12900_v53 }
 0x55e   :  { %11042 = vmatprep.subr.bf16.mxu1 %v12901_v12 }
 0x560   :  { %11021 = vmatpush3.bf16.msra.mxu0 %v12902_v38 }
 0x561   :  { %11043 = vmatpush3.bf16.msra.mxu1 %v12903_v9  ;;  %11022 = vmatprep.subr.bf16.mxu0 %v12904_v33 }
 0x562   :  { %11044 = vmatprep.subr.bf16.mxu1 %v12905_v48 }
 0x564   :  { %11023 = vmatpush3.bf16.msra.mxu0 %v12906_v32 }
 0x565   :  { %11045 = vmatpush3.bf16.msra.mxu1 %v12907_v47  ;;  %11024 = vmatprep.subr.bf16.mxu0 %v12908_v25 }
 0x566   :  { %11046 = vmatprep.subr.bf16.mxu1 %v12909_v54 }
 0x568   :  { %11025 = vmatpush3.bf16.msra.mxu0 %v12910_v51 }
 0x569   :  { %11047 = vmatpush3.bf16.msra.mxu1 %v12911_v30  ;;  %11026 = vmatprep.subr.bf16.mxu0 %v12912_v2 }
 0x56a   :  { %11048 = vmatprep.subr.bf16.mxu1 %v12913_v63 }
 0x56c   :  { %11027 = vmatpush3.bf16.msra.mxu0 %v12914_v20 }
 0x56d   :  { %11049 = vmatpush3.bf16.msra.mxu1 %v12915_v37  ;;  %11028 = vmatprep.subr.bf16.mxu0 %v12916_v4 }
 0x56e   :  { %11050 = vmatprep.subr.bf16.mxu1 %v12917_v43 }
 0x570   :  { %11029 = vmatpush3.bf16.msra.mxu0 %v12918_v8 }
 0x571   :  { %11051 = vmatpush3.bf16.msra.mxu1 %v12919_v17  ;;  %11058 = vmatprep.subr.bf16.mxu0 %v12920_v59 }
 0x572   :  { %11080 = vmatprep.subr.bf16.mxu1 %v12921_v27  ;;  %v12922_v27 = vld [vmem:[#allocation10 + $0x100] sm:$0xff]  }
 0x626   :  { %v8142_v49 = vpop.f32.mrb[36].mxu0 }
 0x627   :  { %v8787_v56 = vpop.f32.mrb[36].mxu1  ;;  %v8144_v23 = vpop.f32.mrb[37].mxu0 }
 0x628   :  { %v8796_v34 = vmax.f32 %v8142_v49, %v8787_v56  ;;  %v8789_v31 = vpop.f32.mrb[37].mxu1  ;;  %v8146_v3 = vpop.f32.mrb[38].mxu0  ;;  %v12923_v49 = vld [vmem:[#allocation10 + $0x180] sm:$0xff]  }
 0x629   :  { %v8797_v1 = vmax.f32 %v8144_v23, %v8789_v31  ;;  %v8791_v58 = vpop.f32.mrb[38].mxu1  ;;  %v8148_v28 = vpop.f32.mrb[39].mxu0  ;;  %v12924_v31 = vld [vmem:[#allocation10 + $0x148] sm:$0xff]  }
 0x62a   :  { %v8805_v60 = vrot.slane %v8796_v34, 1  ;;  %v8798_v40 = vmax.f32 %v8146_v3, %v8791_v58  ;;  %v8793_v39 = vpop.f32.mrb[39].mxu1  ;;  %v12925_v3 = vld [vmem:[#allocation10 + $0x1c8] sm:$0xff]  }
 0x62b   :  { %v8806_v29 = vrot.slane %v8797_v1, 1  ;;  %v8799_v45 = vmax.f32 %v8148_v28, %v8793_v39  ;;  %v12926_v28 = vld [vmem:[#allocation10 + $0x108] sm:$0xff]   ;;  %v12931_v39 = vld [vmem:[#allocation10 + $0x190] sm:$0xff]  }
 0x62c   :  { %v8813_v57 = vmax.f32 %v8796_v34, %v8805_v60  ;;  %v8807_v21 = vrot.slane %v8798_v40, 1  ;;  %v12927_v60 = vld [vmem:[#allocation10 + $0x188] sm:$0xff]  }
 0x62d   :  { %v8814_v15 = vmax.f32 %v8797_v1, %v8806_v29  ;;  %v8808_v19 = vrot.slane %v8799_v45, 1  ;;  %v12932_v29 = vld [vmem:[#allocation10 + $0x158] sm:$0xff]  }
 0x62e   :  { %v8828_v14 = vadd.f32 %v8821_v55, %v8813_v57  ;;  %v8815_v5 = vmax.f32 %v8798_v40, %v8807_v21  ;;  %v12930_v40 = vld [vmem:[#allocation10 + $0x110] sm:$0xff]   ;;  %v12936_v57 = vld [vmem:[#allocation10 + $0x160] sm:$0xff]  }
 0x62f   :  { %v8829_v11 = vadd.f32 %v8825_v16, %v8814_v15  ;;  %v8816_v42 = vmax.f32 %v8799_v45, %v8808_v19  ;;  %v12935_v45 = vld [vmem:[#allocation10 + $0x198] sm:$0xff]   ;;  %v12937_v21 = vld [vmem:[#allocation10 + $0x1e0] sm:$0xff]  }
 0x630   :  { %v8832_v36 = vmax.f32 %v8828_v14, 0.0  ;;  %v8830_v44 = vadd.f32 %v8821_v55, %v8815_v5  ;;  %v12929_v55 = vld [vmem:[#allocation10 + $0x1d0] sm:$0xff]   ;;  %v12938_v15 = vld [vmem:[#allocation10 + $0x120] sm:$0xff]   ;;  %v12940_v14 = vld [vmem:[#allocation10 + $0x168] sm:$0xff]  }
 0x631   :  { %v8833_v0 = vmax.f32 %v8829_v11, 0.0  ;;  %v8831_v26 = vadd.f32 %v8825_v16, %v8816_v42  ;;  %v12934_v16 = vld [vmem:[#allocation10 + $0x118] sm:$0xff]   ;;  %v12939_v19 = vld [vmem:[#allocation10 + $0x1a0] sm:$0xff]   ;;  %v12941_v5 = vld [vmem:[#allocation10 + $0x1e8] sm:$0xff]  }
 0x632   :  { %v8836_v61 = vpack.c.bf16 %v8832_v36, %v8832_v36  ;;  %v8834_v62 = vmax.f32 %v8830_v44, 0.0  ;;  %v12942_v11 = vld [vmem:[#allocation10 + $0x128] sm:$0xff]   ;;  %v12944_v36 = vld [vmem:[#allocation10 + $0x170] sm:$0xff]  }
 0x633   :  { %v8837_v50 = vpack.c.bf16 %v8833_v0, %v8833_v0  ;;  %v8835_v52 = vmax.f32 %v8831_v26, 0.0  ;;  %v12943_v42 = vld [vmem:[#allocation10 + $0x1a8] sm:$0xff]   ;;  %v12945_v44 = vld [vmem:[#allocation10 + $0x1f0] sm:$0xff]  }
 0x634   :  { %v8908_v18 = vunpack.c.l.b16 %v8836_v61  ;;  %v8838_v41 = vpack.c.bf16 %v8834_v62, %v8834_v62  ;;  %v12946_v0 = vld [vmem:[#allocation10 + $0x130] sm:$0xff]   ;;  %v12948_v61 = vld [vmem:[#allocation10 + $0x178] sm:$0xff]  }
 0x635   :  { %v8909_v7 = vunpack.c.l.b16 %v8837_v50  ;;  %v8839_v35 = vpack.c.bf16 %v8835_v52, %v8835_v52  ;;  %v12947_v26 = vld [vmem:[#allocation10 + $0x1b0] sm:$0xff]   ;;  %v12949_v62 = vld [vmem:[#allocation10 + $0x1f8] sm:$0xff]  }
 0x636   :  { %v8910_v24 = vunpack.c.l.b16 %v8838_v41  ;;  %v8912_v13 = vrot.slane %v8908_v18, 2  ;;  %v9235_v10 = vrot.slane %v8908_v18, 4  ;;  %v9414_v53 = vrot.slane %v8908_v18, 6  ;;  %v12950_v50 = vld [vmem:[#allocation10 + $0x138] sm:$0xff]  }
 0x637   :  { %v8911_v12 = vunpack.c.l.b16 %v8839_v35  ;;  %v8916_v38 = vrot.slane %v8909_v7, 2  ;;  %v9238_v9 = vrot.slane %v8909_v7, 4  ;;  %v9417_v33 = vrot.slane %v8909_v7, 6  ;;  %v12951_v52 = vld [vmem:[#allocation10 + $0x1b8] sm:$0xff]  }
 0x638   :  { %v8913_v48 = vrot.slane %v8910_v24, 1  ;;  %v9059_v32 = vrot.slane %v8910_v24, 7  ;;  %v9236_v47 = vrot.slane %v8910_v24, 3  ;;  %v9415_v25 = vrot.slane %v8910_v24, 5  ;;  %v12953_v24 = vld [vmem:[%s14019_s7 + $0x8] sm:$0xff]  }
 0x639   :  { %v8917_v54 = vrot.slane %v8911_v12, 1  ;;  %v9061_v51 = vrot.slane %v8911_v12, 7  ;;  %v9239_v30 = vrot.slane %v8911_v12, 3  ;;  %v9418_v2 = vrot.slane %v8911_v12, 5  ;;  %v12957_v12 = vld [vmem:[%s14019_s7 + $0x28] sm:$0xff]  }
 0x63a   :  { %v8915_v63 = vsel %vm8914_vm3, %v8913_v48, %v8912_v13  ;;  %v9060_v20 = vsel %vm8914_vm3, %v9059_v32, %v8908_v18  ;;  %v13934_v37 = vsel %vm8914_vm3, %v9236_v47, %v9235_v10  ;;  %v13937_v4 = vsel %vm8914_vm3, %v9415_v25, %v9414_v53  ;;  %v12954_v13 = vld [vmem:[%s14019_s7 + $0x10] sm:$0xff]   ;;  %v12955_v10 = vld [vmem:[%s14019_s7 + $0x18] sm:$0xff]   ;;  %v12956_v53 = vld [vmem:[%s14019_s7 + $0x20] sm:$0xff]  }
 0x63b   :  { %v8918_v43 = vsel %vm8914_vm3, %v8917_v54, %v8916_v38  ;;  %v9062_v8 = vsel %vm8914_vm3, %v9061_v51, %v8909_v7  ;;  %v9240_v56 = vsel %vm8914_vm3, %v9239_v30, %v9238_v9  ;;  %v9419_v22 = vsel %vm8914_vm3, %v9418_v2, %v9417_v33  ;;  %v12952_v7 = vld [vmem:[%s14019_s7] sm:$0xff]   ;;  %v12958_v38 = vld [vmem:[%s14019_s7 + $0x30] sm:$0xff]   ;;  %v12961_v33 = vld [vmem:[%s14021_s9 + $0x8] sm:$0xff]  }
 0x63c   :  { %v8920_v17 = vpack.c.b16 %v8918_v43, %v8918_v43  ;;  %v9064_v59 = vpack.c.b16 %v9062_v8, %v9062_v8  ;;  %v8919_v23 = vpack.c.b16 %v8915_v63, %v8915_v63  ;;  %v9063_v34 = vpack.c.b16 %v9060_v20, %v9060_v20  ;;  %v12960_v9 = vld [vmem:[%s14021_s9] sm:$0xff]   ;;  %v12959_v48 = vld [vmem:[%s14019_s7 + $0x38] sm:$0xff]  }
 0x63d   :  { %v9242_v1 = vpack.c.b16 %v9240_v56, %v9240_v56  ;;  %v9421_v58 = vpack.c.b16 %v9419_v22, %v9419_v22  ;;  %v9241_v18 = vpack.c.b16 %v13934_v37, %v13934_v37  ;;  %v9420_v41 = vpack.c.b16 %v13937_v4, %v13937_v4 }
 0x63e   :  { %9051 = vmatprep.mubr.bf16.mxu0 %v8920_v17  ;;  %9195 = vmatprep.mubr.bf16.mxu1 %v9064_v59  ;;  %v13192_v35 = vmov 0.0  }
 0x63f   :  { %9052 = vmatmul.mubr.bf16.vlgmr.msra.gmra.mrb[40].mxu0 %v8919_v23  ;;  %9196 = vmatmul.mubr.bf16.vlgmr.msra.gmra.mrb[40].mxu1 %v9063_v34 }
 0x640   :  { %11059 = vmatpush3.bf16.msra.mxu0 %v12922_v27  ;;  %11081 = vmatpush3.bf16.msra.mxu1 %v12923_v49 }
 0x641   :  { %9373 = vmatprep.mubr.bf16.mxu0 %v9242_v1  ;;  %9552 = vmatprep.mubr.bf16.mxu1 %v9421_v58 }
 0x642   :  { %11060 = vmatprep.subr.bf16.mxu0 %v12924_v31  ;;  %11082 = vmatprep.subr.bf16.mxu1 %v12925_v3  ;;  %v10992_v3 = vld [vmem:[#allocation11] ss:$0 sm:$0xff] }
 0x644   :  { %11061 = vmatpush3.bf16.msra.mxu0 %v12926_v28  ;;  %11083 = vmatpush3.bf16.msra.mxu1 %v12927_v60 }
 0x645   :  { %11062 = vmatprep.subr.bf16.mxu0 %v12928_v6  ;;  %11084 = vmatprep.subr.bf16.mxu1 %v12929_v55  ;;  %v12962_v6 = vld [vmem:[%s14021_s9 + $0x10] sm:$0xff]   ;;  %v12963_v55 = vld [vmem:[%s14021_s9 + $0x18] sm:$0xff]   ;;  %s13194_s9 = smov [#allocation16]  }
 0x646   :  { %s9787_s1 = sshll.u32 %s13194_s9, 4  ;;  %s9788_s1 = int_to_ptr.vmem [resolvable:$true] %s9787_s1 }
 0x647   :  { %s13144_s25 = scalar_lea.vmem %s9788_s1, 32  ;;  %p13149_p9 = scmp.lt.s32.totalorder %s9788_s1, %s9788_s1 }
 0x648   :  { %11063 = vmatpush3.bf16.msra.mxu0 %v12930_v40  ;;  %11085 = vmatpush3.bf16.msra.mxu1 %v12931_v39  ;;  %v10993_v40 = vld [vmem:[#allocation13] ss:$0 sm:$0xff]  ;;  %p13145_p8 = scmp.ne.s32.totalorder %s9788_s1, %s13144_s25  ;;  %p13150_p10 = scmp.lt.s32.totalorder %s13144_s25, %s13144_s25 }
 0x649   :  { %11064 = vmatprep.subr.bf16.mxu0 %v12932_v29  ;;  %11086 = vmatprep.subr.bf16.mxu1 %v12933_v46 }
 0x64a   :  { %p13151_p11 = por %p13150_p10, %p13149_p9 }
 0x64c   :  { %11065 = vmatpush3.bf16.msra.mxu0 %v12934_v16  ;;  %11087 = vmatpush3.bf16.msra.mxu1 %v12935_v45  ;;  %p13152_p12 = pnand %p13151_p11, %p13145_p8 }
 0x64d   :  { %11066 = vmatprep.subr.bf16.mxu0 %v12936_v57  ;;  %11088 = vmatprep.subr.bf16.mxu1 %v12937_v21 }
 0x650   :  { %11067 = vmatpush3.bf16.msra.mxu0 %v12938_v15  ;;  %11089 = vmatpush3.bf16.msra.mxu1 %v12939_v19  ;;  %v11002_v15 = vld [vmem:[#allocation14] ss:$0 sm:$0xff] }
 0x651   :  { %11068 = vmatprep.subr.bf16.mxu0 %v12940_v14  ;;  %11090 = vmatprep.subr.bf16.mxu1 %v12941_v5 }
 0x654   :  { %11069 = vmatpush3.bf16.msra.mxu0 %v12942_v11  ;;  %11091 = vmatpush3.bf16.msra.mxu1 %v12943_v42 }
 0x655   :  { %11070 = vmatprep.subr.bf16.mxu0 %v12944_v36  ;;  %11092 = vmatprep.subr.bf16.mxu1 %v12945_v44 }
 0x658   :  { %11071 = vmatpush3.bf16.msra.mxu0 %v12946_v0  ;;  %11093 = vmatpush3.bf16.msra.mxu1 %v12947_v26 }
 0x659   :  { %11072 = vmatprep.subr.bf16.mxu0 %v12948_v61  ;;  %11094 = vmatprep.subr.bf16.mxu1 %v12949_v62 }
 0x65c   :  { %11073 = vmatpush3.bf16.msra.mxu0 %v12950_v50  ;;  %11095 = vmatpush3.bf16.msra.mxu1 %v12951_v52 }
 0x65d   :  { %11116 = vmatprep.subr.bf16.mxu0 %v13192_v35  ;;  %11136 = vmatprep.subr.bf16.mxu1 %v13192_v35 }
 0x65f   :  { %9374 = vmatmul.mubr.bf16.vlgmr.msra.gmra.mrb[44].mxu0 %v9241_v18  ;;  %9553 = vmatmul.mubr.bf16.vlgmr.msra.gmra.mrb[44].mxu1 %v9420_v41 }
 0x660   :  { %11117 = vmatpush3.bf16.msra.mxu0 %v12952_v7  ;;  %11132 = vmatprep.mubr.msk.bf16.mxu0 %vm13193_vm4, %v13192_v35 }
 0x661   :  { %11118 = vmatprep.subr.bf16.mxu0 %v13192_v35  ;;  %11144 = vmatprep.mubr.msk.bf16.mxu1 %vm13193_vm4, %v13192_v35 }
 0x662   :  { %11137 = vmatpush3.bf16.msra.mxu1 %v12960_v9 }
 0x663   :  { %11138 = vmatprep.subr.bf16.mxu1 %v13192_v35 }
 0x664   :  { %11119 = vmatpush3.bf16.msra.mxu0 %v12953_v24 }
 0x665   :  { %11120 = vmatprep.subr.bf16.mxu0 %v13192_v35 }
 0x666   :  { %11139 = vmatpush3.bf16.msra.mxu1 %v12961_v33 }
 0x667   :  { %11140 = vmatprep.subr.bf16.mxu1 %v13192_v35 }
 0x668   :  { %11121 = vmatpush3.bf16.msra.mxu0 %v12954_v13 }
 0x669   :  { %11122 = vmatprep.subr.bf16.mxu0 %v13192_v35 }
 0x66a   :  { %11141 = vmatpush3.bf16.msra.mxu1 %v12962_v6 }
 0x66b   :  { %11142 = vmatprep.subr.bf16.mxu1 %v13192_v35 }
 0x66c   :  { %11123 = vmatpush3.bf16.msra.mxu0 %v12955_v10 }
 0x66d   :  { %11124 = vmatprep.subr.bf16.mxu0 %v13192_v35 }
 0x66e   :  { %11143 = vmatpush3.bf16.msra.mxu1 %v12963_v55 }
 0x670   :  { %11125 = vmatpush3.bf16.msra.mxu0 %v12956_v53 }
 0x671   :  { %11126 = vmatprep.subr.bf16.mxu0 %v13192_v35 }
 0x674   :  { %11127 = vmatpush3.bf16.msra.mxu0 %v12957_v12 }
 0x675   :  { %11128 = vmatprep.subr.bf16.mxu0 %v13192_v35 }
 0x678   :  { %11129 = vmatpush3.bf16.msra.mxu0 %v12958_v38 }
 0x679   :  { %11130 = vmatprep.subr.bf16.mxu0 %v13192_v35 }
 0x67c   :  { %11131 = vmatpush3.bf16.msra.mxu0 %v12959_v48 }
 0x712   :  { %v11030_v32 = vpop.f32.mrb[40].mxu0  ;;  %v11052_v47 = vpop.f32.mrb[40].mxu1 }
 0x713   :  { %v11031_v25 = vpop.f32.mrb[41].mxu0  ;;  %v11053_v54 = vpop.f32.mrb[41].mxu1 }
 0x714   :  { %v11032_v51 = vadd.f32 %v11031_v25, %v11030_v32  ;;  %v11054_v30 = vadd.f32 %v11053_v54, %v11052_v47  ;;  %v11033_v2 = vpop.f32.mrb[42].mxu0  ;;  %v11055_v63 = vpop.f32.mrb[42].mxu1 }
 0x715   :  { %v11034_v20 = vpop.f32.mrb[43].mxu0  ;;  %v11056_v37 = vpop.f32.mrb[43].mxu1 }
 0x716   :  { %v9198_v4 = vadd.f32 %v11054_v30, %v11032_v51 }
 0x732   :  { %v11074_v43 = vpop.f32.mrb[44].mxu0  ;;  %v11096_v8 = vpop.f32.mrb[44].mxu1 }
 0x733   :  { %v11075_v17 = vpop.f32.mrb[45].mxu0  ;;  %v11097_v59 = vpop.f32.mrb[45].mxu1 }
 0x734   :  { %v11076_v27 = vadd.f32 %v11075_v17, %v11074_v43  ;;  %v11098_v49 = vadd.f32 %v11097_v59, %v11096_v8  ;;  %v11077_v56 = vpop.f32.mrb[46].mxu0  ;;  %v11099_v22 = vpop.f32.mrb[46].mxu1 }
 0x735   :  { %v11078_v23 = vpop.f32.mrb[47].mxu0  ;;  %v11100_v34 = vpop.f32.mrb[47].mxu1 }
 0x736   :  { %v9381_v31 = vadd.f32 %v11076_v27, %v9198_v4 }
 0x738   :  { %v9560_v1 = vadd.f32 %v11098_v49, %v9381_v31 }
 0x73a   :  { %v9568_v58 = vadd.f32 %v10992_v3, %v9560_v1 }
 0x73c   :  { %v9569_v28 = vmax.f32 %v9568_v58, 0.0 }
 0x73e   :  { %v9570_v60 = vpack.c.bf16 %v9569_v28, %v9569_v28 }
 0x740   :  { %11133 = vmatmul.mubr.bf16.vlgmr.msra.gmra.mrb[48].mxu0 %v9570_v60 }
 0x813   :  { %v9676_v39 = vpop.f32.mrb[48].mxu0 }
 0x814   :  { %v9677_v29 = vadd.f32 %v10993_v40, %v9676_v39  ;;  %v11134_v46 = vpop.f32.mrb[49].mxu0 }
 0x815   :  { %v9679_v16 = vpop.f32.mrb[50].mxu0 }
 0x816   :  { %v9682_v45 = vmax.f32 %v9677_v29, 0.0  ;;  %v11135_v57 = vpop.f32.mrb[51].mxu0 }
 0x818   :  { %v9683_v21 = vpack.c.bf16 %v9682_v45, %v9682_v45 }
 0x81a   :  { %11145 = vmatmul.mubr.msk.bf16.vlgmr.msra.gmra.mrb[48].mxu1 %vm9723_vm5, %v9683_v21 }
 0x8ed   :  { %v9761_v19 = vpop.f32.mrb[48].mxu1 }
 0x8ee   :  { %v9762_v14 = vadd.f32 %v11002_v15, %v9761_v19  ;;  %v11146_v5 = vpop.f32.mrb[49].mxu1 }
 0x8ef   :  { %v9764_v11 = vpop.f32.mrb[50].mxu1 }
 0x8f0   :  { %v11147_v42 = vpop.f32.mrb[51].mxu1  ;;  %v9768_v36 = vsel %vm9767_vm6, %v9762_v14, -inf }
 0x8f1   :  { %9769 = vmax.xlane.f32.xlu0 %v9768_v36 }
 0x97e   :  { %v9770_v44 = vpop.xlane.xlu0 %9769 }
 0x97f   :  { %v9771_v0 = vsub.f32 %v9762_v14, %v9770_v44 }
 0x981   :  { %v9772_v26 = vmul.f32 1.442695, %v9771_v0 }
 0x983   :  { %12964 = vpow2.f32 %v9772_v26 }
 0x98d   :  { %v12965_v61 = vpop.eup %12964 }
 0x98e   :  { %v9774_v62 = vsel %vm9767_vm6, %v12965_v61, 0.0 }
 0x98f   :  { %9775 = vadd.xlane.f32.xlu0 %v9774_v62 }
 0xa1c   :  { %v9776_v50 = vpop.xlane.xlu0 %9775 }
 0xa1d   :  { %12966 = vlog2.f32 %v9776_v50 }
 0xa27   :  { %v12967_v52 = vpop.eup %12966 }
 0xa28   :  { %v9778_v18 = vmul.f32 0.6931472, %v12967_v52 }
 0xa2a   :  { %v9779_v41 = vsub.f32 %v9771_v0, %v9778_v18 }
 0xa2c   :  { %9780 = vst.msk [vmem:[#allocation16] sm:$0x3] %vm9767_vm6, %v9779_v41 }
 0xa2d   :  { %13155 = shalt.err (!%p13152_p12)
}
 0xa2e   :  { %s13156_s21 = scalar_lea.hbm %s14023_s11, 32 }
 0xa2f   :  { %p13157_p13 = scmp.ne.s32.totalorder %s14023_s11, %s13156_s21  ;;  %p13160_p0 = scmp.lt.u32.totalorder %s13156_s21, %s14023_s11 }
 0xa31   :  { %p13162_p1 = pnand %p13160_p0, %p13157_p13 }
 0xa33   :  { %13165 = shalt.err (!%p13162_p1)
}
 0xa34   :  { %9790 = dma.vmem_to_hbm [thread:$0]  %s9788_s1, 32, %s14023_s11, [#allocation4]  }
 0xa35   :  { %13176 = dma.done.wait [#allocation4], 32  }
 0xa36   :  { %13177 = vsyncadd [#allocation4], 4294967264 }
 0xa37   :  { %9794 = vsyncpa [#allocation3], 1 }
 0xa38   :  { %9795 = vsyncpa [#allocation6], 1 }
 0xa39   :  { %9796 = vsyncpa [#allocation9], 1 }
 0xa3a   :  { %9797 = vsyncpa [#allocation12], 1 }
 0xa3b   :  { %9798 = vsyncpa [#allocation15], 1 }
 0xa3c   :  { %9799 = vsyncpa [#allocation4], 1 }

</bundles_post_ra>
